<compile_context>
chip_gen: v6e
topology: v6e:2x2x1
jax: 0.10.0
libtpu: 0.0.40
codegen_flags: <defaults>
</compile_context>

<pallas_src>
import math
from functools import partial

import jax
import jax.numpy as jnp
from jax.experimental import pallas as pl
from jax.experimental.pallas import tpu as pltpu

_BN_EPS = 1e-5  # PyTorch BatchNorm2d default


# ---------------------------------------------------------------------------
# Fused BasicBlock kernel (one grid step == one batch image)
# ---------------------------------------------------------------------------
def _basic_block_kernel(*refs, stride, ho, wo, cin, cout, cp, shortcut):
    if shortcut == 'B':
        (x_ref, w1_ref, b1_ref, w2_ref, b2_ref, wsc_ref, bsc_ref,
         o_ref, mid_ref) = refs
    else:
        x_ref, w1_ref, b1_ref, w2_ref, b2_ref, o_ref, mid_ref = refs

    m = ho * wo

    # Whole padded (or parity-split) image for this grid step, upcast once so
    # all tap slicing happens on a plain f32 value (robust layouts); the LHS
    # is cast back to bf16 right before each MXU matmul.
    xv = x_ref[0].astype(jnp.float32)

    def tap(dy, dx):
        if stride == 1:
            return xv[dy:dy + ho, dx:dx + wo, :]
        p = 2 * (dy % 2) + (dx % 2)              # (row parity, col parity)
        return xv[p, dy // 2:dy // 2 + ho, dx // 2:dx // 2 + wo, :]

    # ---- conv1 + BN1 + ReLU : ONE MXU matmul with K = 9*Cin ----------------
    # (wo is a multiple of 8 in the demo, so the (ho,wo,c)->(m,c) reshapes are
    #  tile-compatible / free.)
    lhs1 = jnp.concatenate(
        [tap(dy, dx).reshape(m, cin) for dy in range(3) for dx in range(3)],
        axis=-1).astype(jnp.bfloat16)
    y1 = jnp.dot(lhs1, w1_ref[...], preferred_element_type=jnp.float32)
    y1 = jnp.maximum(y1 + b1_ref[...], 0.0)      # f32 epilogue

    # Stage conv1 output with a zero halo in VMEM scratch for conv2's taps
    # (intermediate never touches HBM).
    mid_ref[...] = jnp.zeros_like(mid_ref)
    mid_ref[1:1 + ho, 1:1 + wo, :] = y1.reshape(ho, wo, cout)

    # ---- conv2 + BN2 : ONE MXU matmul with K = 9*Cout ----------------------
    lhs2 = jnp.concatenate(
        [mid_ref[dy:dy + ho, dx:dx + wo, :].reshape(m, cout)
         for dy in range(3) for dx in range(3)],
        axis=-1).astype(jnp.bfloat16)
    y2 = jnp.dot(lhs2, w2_ref[...], preferred_element_type=jnp.float32)
    y2 = y2 + b2_ref[...]

    # ---- shortcut -----------------------------------------------------------
    def pad_lanes(v, left, right):
        parts = ([jnp.zeros((m, left), jnp.float32)] if left else []) + [v] + \
                ([jnp.zeros((m, right), jnp.float32)] if right else [])
        return jnp.concatenate(parts, axis=-1) if len(parts) > 1 else v

    if shortcut == 'identity':                   # stride 1, cin == cout
        sc = xv[1:1 + ho, 1:1 + wo, :].reshape(m, cin)
        sc = pad_lanes(sc, 0, cp - cout)
    elif shortcut == 'A':                        # x[:, ::2, ::2] + channel pad
        p4 = cout // 4
        sc = xv[3, 0:ho, 0:wo, :].reshape(m, cin)   # parity (1,1) = x[::2, ::2]
        sc = pad_lanes(sc, p4, cp - p4 - cin)
    else:                                        # option 'B': 1x1 conv + BN
        if stride == 1:
            lhs_sc = xv[1:1 + ho, 1:1 + wo, :].reshape(m, cin)
        else:
            lhs_sc = xv[3, 0:ho, 0:wo, :].reshape(m, cin)
        sc = jnp.dot(lhs_sc.astype(jnp.bfloat16), wsc_ref[...],
                     preferred_element_type=jnp.float32) + bsc_ref[...]

    # Residual add + final ReLU, all in f32 (v5e has no bf16 VALU).
    # Output channel dim is padded to cp (multiple of 128): lane-dense stores.
    o_ref[0] = jnp.maximum(y2 + sc, 0.0)


# ---------------------------------------------------------------------------
# Wrapper-side preparation (BN folding into weights, padding, parity split)
# ---------------------------------------------------------------------------
def _fold_conv_bn(w_torch, bn, pad_to):
    """Fold eval-mode BN (scale) into conv weights -> bf16 (K, pad_to) matrix
    plus an f32 (1, pad_to) bias; K rows ordered (dy, dx, cin)."""
    gamma, beta, mean, var = bn
    scale = gamma * jax.lax.rsqrt(var + _BN_EPS)
    bias = beta - mean * scale
    cout, cin, kh, kw = w_torch.shape
    wm = (jnp.transpose(w_torch, (2, 3, 1, 0)).reshape(kh * kw * cin, cout)
          * scale[None, :])
    wm = jnp.pad(wm, ((0, 0), (0, pad_to - cout)))
    bv = jnp.pad(bias, (0, pad_to - cout)).reshape(1, pad_to)
    return wm.astype(jnp.bfloat16), bv.astype(jnp.float32)


def basic_block_forward(x_nchw, params, *, stride=1, option='A'):
    """Pallas TPU forward of the PyTorch BasicBlock (eval-mode BatchNorm)."""
    # TODO(synk): training-mode BatchNorm (batch statistics + running-stat
    # updates) is not computed in-kernel; this implements eval-mode BN.
    x = jnp.transpose(x_nchw, (0, 2, 3, 1)).astype(jnp.float32)   # NHWC
    b, h, w, cin = x.shape
    cout = params['conv1_w'].shape[0]
    assert stride in (1, 2)
    ho = (h + 2 - 3) // stride + 1
    wo = (w + 2 - 3) // stride + 1
    m = ho * wo
    cp = max(128, ((cout + 127) // 128) * 128)   # lane-dense output channels

    # Shortcut type (mirrors the PyTorch module's construction logic).
    if stride != 1 or cin != cout:
        shortcut = option
        if option == 'A':
            assert stride == 2 and cin + 2 * (cout // 4) == cout, \
                "option-A shortcut is only shape-consistent for stride-2 blocks"
    else:
        shortcut = 'identity'

    # Spatial zero-pad once (bf16 stream to HBM).  For stride 2, split into the
    # four (row, col) parities so every in-kernel tap is a contiguous slice.
    xp = jnp.pad(x, ((0, 0), (1, 1), (1, 1), (0, 0)))
    if stride == 2:
        hp = xp.shape[1] + (xp.shape[1] % 2)
        wp = xp.shape[2] + (xp.shape[2] % 2)
        xp = jnp.pad(xp, ((0, 0), (0, hp - xp.shape[1]),
                          (0, wp - xp.shape[2]), (0, 0)))
        xp = xp.reshape(b, hp // 2, 2, wp // 2, 2, cin)
        xp = jnp.transpose(xp, (0, 2, 4, 1, 3, 5)).reshape(
            b, 4, hp // 2, wp // 2, cin)
    x_in = xp.astype(jnp.bfloat16)

    # BN folded into bf16 weight matrices; conv2 / shortcut padded to cp
    # output channels so every HBM store is a full 128-lane vreg.
    w1m, b1v = _fold_conv_bn(params['conv1_w'], params['bn1'], cout)
    w2m, b2v = _fold_conv_bn(params['conv2_w'], params['bn2'], cp)

    x_spec = pl.BlockSpec((1,) + x_in.shape[1:],
                          lambda i: (i,) + (0,) * (x_in.ndim - 1))

    def resident(a):  # grid-invariant block -> stays resident in VMEM
        return pl.BlockSpec(a.shape, lambda i: (0,) * a.ndim)

    args = [x_in, w1m, b1v, w2m, b2v]
    in_specs = [x_spec, resident(w1m), resident(b1v),
                resident(w2m), resident(b2v)]
    if shortcut == 'B':
        wscm, bscv = _fold_conv_bn(params['conv_sc_w'], params['bn_sc'], cp)
        args += [wscm, bscv]
        in_specs += [resident(wscm), resident(bscv)]

    kernel = partial(_basic_block_kernel, stride=stride, ho=ho, wo=wo,
                     cin=cin, cout=cout, cp=cp, shortcut=shortcut)

    flops = (2 * b * m * (9 * cin) * cout + 2 * b * m * (9 * cout) * cp
             + (2 * b * m * cin * cp if shortcut == 'B' else 0))
    bytes_accessed = (sum(int(a.size) * a.dtype.itemsize for a in args)
                      + b * m * cp * 4)

    out = pl.pallas_call(
        kernel,
        out_shape=jax.ShapeDtypeStruct((b, m, cp), jnp.float32),
        grid_spec=pltpu.PrefetchScalarGridSpec(
            num_scalar_prefetch=0,
            grid=(b,),                                   # >= 2 steps for v7x
            in_specs=in_specs,
            out_specs=pl.BlockSpec((1, m, cp), lambda i: (i, 0, 0)),
            scratch_shapes=[pltpu.VMEM((ho + 2, wo + 2, cout), jnp.float32)],
        ),
        compiler_params=pltpu.CompilerParams(
            dimension_semantics=("parallel",)),
        cost_estimate=pl.CostEstimate(flops=flops, transcendentals=0,
                                      bytes_accessed=bytes_accessed),
    )(*args)

    out = out[:, :, :cout].reshape(b, ho, wo, cout)
    return jnp.transpose(out, (0, 3, 1, 2)).astype(x_nchw.dtype)


# ---------------------------------------------------------------------------
# Params / pure-JAX reference / demo
# ---------------------------------------------------------------------------
def init_basic_block_params(key, in_planes, planes, *, stride=1, option='A'):
    keys = jax.random.split(key, 6)

    def conv_w(k, cout, cin, ksize):
        fan_in = cin * ksize * ksize
        bound = 1.0 / math.sqrt(fan_in)
        return jax.random.uniform(k, (cout, cin, ksize, ksize), jnp.float32,
                                  minval=-bound, maxval=bound)

    def bn_p(k):
        kg, kb, km, kv = jax.random.split(k, 4)
        gamma = jax.random.uniform(kg, (planes,), jnp.float32, 0.5, 1.5)
        beta = 0.1 * jax.random.normal(kb, (planes,), jnp.float32)
        mean = 0.1 * jax.random.normal(km, (planes,), jnp.float32)
        var = jax.random.uniform(kv, (planes,), jnp.float32, 0.5, 1.5)
        return (gamma, beta, mean, var)

    params = {
        'conv1_w': conv_w(keys[0], planes, in_planes, 3),
        'bn1': bn_p(keys[1]),
        'conv2_w': conv_w(keys[2], planes, planes, 3),
        'bn2': bn_p(keys[3]),
    }
    if (stride != 1 or in_planes != planes) and option == 'B':
        params['conv_sc_w'] = conv_w(keys[4], planes, in_planes, 1)
        params['bn_sc'] = bn_p(keys[5])
    return params


def _conv_ref(x_nhwc, w_torch, stride, padding):
    w_hwio = jnp.transpose(w_torch, (2, 3, 1, 0))
    return jax.lax.conv_general_dilated(
        x_nhwc, w_hwio, window_strides=(stride, stride),
        padding=((padding, padding), (padding, padding)),
        dimension_numbers=('NHWC', 'HWIO', 'NHWC'),
        precision=jax.lax.Precision.HIGHEST)


def _bn_ref(y, bn, eps=_BN_EPS):
    gamma, beta, mean, var = bn
    return (y - mean) * (gamma * jax.lax.rsqrt(var + eps)) + beta


def basic_block_reference(x_nchw, params, *, stride=1, option='A'):
    x = jnp.transpose(x_nchw, (0, 2, 3, 1)).astype(jnp.float32)
    in_planes = x.shape[-1]
    planes = params['conv1_w'].shape[0]
    out = jax.nn.relu(_bn_ref(_conv_ref(x, params['conv1_w'], stride, 1),
                              params['bn1']))
    out = _bn_ref(_conv_ref(out, params['conv2_w'], 1, 1), params['bn2'])
    if stride != 1 or in_planes != planes:
        if option == 'A':
            p4 = planes // 4
            sc = jnp.pad(x[:, ::2, ::2, :], ((0, 0), (0, 0), (0, 0), (p4, p4)))
        else:
            sc = _bn_ref(_conv_ref(x, params['conv_sc_w'], stride, 0),
                         params['bn_sc'])
    else:
        sc = x
    out = jax.nn.relu(out + sc)
    return jnp.transpose(out, (0, 3, 1, 2))


def _check(name, y, ref, shape, tol=5e-2):
    # Tolerance loosened vs. the pure-f32 version because the kernel uses the
    # bf16 MXU path (bf16 activations / weights, f32 accumulation).
    assert y.shape == shape, (name, y.shape, shape)
    err = float(jnp.max(jnp.abs(y - ref)))
    assert err < tol, (name, err)


if __name__ == "__main__":
    key = jax.random.PRNGKey(0)
    kx1, kx2, kp1, kp2, kp3 = jax.random.split(key, 5)

    B, H, W = 2, 16, 16

    # Case 1: identity shortcut (stride=1, in_planes == planes).
    c_in, c_out = 16, 16
    x1 = jax.random.normal(kx1, (B, c_in, H, W), jnp.float32)
    p1 = init_basic_block_params(kp1, c_in, c_out, stride=1, option='A')
    y1 = jax.block_until_ready(basic_block_forward(x1, p1, stride=1, option='A'))
    _check("identity", y1,
           basic_block_reference(x1, p1, stride=1, option='A'),
           (B, c_out, H, W))

    # Case 2: option-A shortcut (stride=2, channels 8 -> 16, zero-pad shortcut).
    c_in, c_out = 8, 16
    x2 = jax.random.normal(kx2, (B, c_in, H, W), jnp.float32)
    p2 = init_basic_block_params(kp2, c_in, c_out, stride=2, option='A')
    y2 = jax.block_until_ready(basic_block_forward(x2, p2, stride=2, option='A'))
    _check("optionA", y2,
           basic_block_reference(x2, p2, stride=2, option='A'),
           (B, c_out, H // 2, W // 2))

    # Case 3: option-B shortcut (1x1 conv + BN fused into the same kernel).
    p3 = init_basic_block_params(kp3, c_in, c_out, stride=2, option='B')
    y3 = jax.block_until_ready(basic_block_forward(x2, p3, stride=2, option='B'))
    _check("optionB", y3,
           basic_block_reference(x2, p3, stride=2, option='B'),
           (B, c_out, H // 2, W // 2))

    print("KERNEL_OK")
</pallas_src>

<mosaic_0001>
module attributes {stable_mosaic.version = 11 : i64} {
  func.func @_basic_block_kernel(%arg0: i32, %arg1: memref<1x18x18x16xbf16, #tpu.memory_space<vmem>>, %arg2: memref<144x16xbf16, #tpu.memory_space<vmem>>, %arg3: memref<1x16xf32, #tpu.memory_space<vmem>>, %arg4: memref<144x128xbf16, #tpu.memory_space<vmem>>, %arg5: memref<1x128xf32, #tpu.memory_space<vmem>>, %arg6: memref<1x256x128xf32, #tpu.memory_space<vmem>>, %arg7: memref<18x18x16xf32, #tpu.memory_space<vmem>>) attributes {dimension_semantics = [#tpu.dimension_semantics<parallel>], iteration_bounds = array<i64: 2>, scalar_prefetch = 0 : i64, scratch_operands = 1 : i64, tpu.core_type = #tpu.core_type<tc>, window_params = [{transform_indices = @transform_0, window_bounds = array<i64: 1, 18, 18, 16>}, {pipeline_mode = #tpu.pipeline_mode<synchronous>, transform_indices = @transform_1, window_bounds = array<i64: 144, 16>}, {pipeline_mode = #tpu.pipeline_mode<synchronous>, transform_indices = @transform_2, window_bounds = array<i64: 1, 16>}, {pipeline_mode = #tpu.pipeline_mode<synchronous>, transform_indices = @transform_3, window_bounds = array<i64: 144, 128>}, {pipeline_mode = #tpu.pipeline_mode<synchronous>, transform_indices = @transform_4, window_bounds = array<i64: 1, 128>}, {transform_indices = @transform_5, window_bounds = array<i64: 1, 256, 128>}]} {
    %c0 = arith.constant 0 : index
    %c0_0 = arith.constant 0 : index
    %c0_1 = arith.constant 0 : index
    %c0_2 = arith.constant 0 : index
    %0 = vector.load %arg1[%c0, %c0_0, %c0_1, %c0_2] : memref<1x18x18x16xbf16, #tpu.memory_space<vmem>>, vector<1x18x18x16xbf16>
    %1 = vector.shape_cast %0 : vector<1x18x18x16xbf16> to vector<18x18x16xbf16>
    %2 = arith.extf %1 : vector<18x18x16xbf16> to vector<18x18x16xf32>
    %3 = vector.extract_strided_slice %2 {offsets = [0, 0, 0], sizes = [16, 16, 16], strides = [1, 1, 1]} : vector<18x18x16xf32> to vector<16x16x16xf32>
    %4 = vector.shape_cast %3 : vector<16x16x16xf32> to vector<256x16xf32>
    %5 = vector.extract_strided_slice %2 {offsets = [0, 1, 0], sizes = [16, 16, 16], strides = [1, 1, 1]} : vector<18x18x16xf32> to vector<16x16x16xf32>
    %6 = vector.shape_cast %5 : vector<16x16x16xf32> to vector<256x16xf32>
    %7 = vector.extract_strided_slice %2 {offsets = [0, 2, 0], sizes = [16, 16, 16], strides = [1, 1, 1]} : vector<18x18x16xf32> to vector<16x16x16xf32>
    %8 = vector.shape_cast %7 : vector<16x16x16xf32> to vector<256x16xf32>
    %9 = vector.extract_strided_slice %2 {offsets = [1, 0, 0], sizes = [16, 16, 16], strides = [1, 1, 1]} : vector<18x18x16xf32> to vector<16x16x16xf32>
    %10 = vector.shape_cast %9 : vector<16x16x16xf32> to vector<256x16xf32>
    %11 = vector.extract_strided_slice %2 {offsets = [1, 1, 0], sizes = [16, 16, 16], strides = [1, 1, 1]} : vector<18x18x16xf32> to vector<16x16x16xf32>
    %12 = vector.shape_cast %11 : vector<16x16x16xf32> to vector<256x16xf32>
    %13 = vector.extract_strided_slice %2 {offsets = [1, 2, 0], sizes = [16, 16, 16], strides = [1, 1, 1]} : vector<18x18x16xf32> to vector<16x16x16xf32>
    %14 = vector.shape_cast %13 : vector<16x16x16xf32> to vector<256x16xf32>
    %15 = vector.extract_strided_slice %2 {offsets = [2, 0, 0], sizes = [16, 16, 16], strides = [1, 1, 1]} : vector<18x18x16xf32> to vector<16x16x16xf32>
    %16 = vector.shape_cast %15 : vector<16x16x16xf32> to vector<256x16xf32>
    %17 = vector.extract_strided_slice %2 {offsets = [2, 1, 0], sizes = [16, 16, 16], strides = [1, 1, 1]} : vector<18x18x16xf32> to vector<16x16x16xf32>
    %18 = vector.shape_cast %17 : vector<16x16x16xf32> to vector<256x16xf32>
    %19 = vector.extract_strided_slice %2 {offsets = [2, 2, 0], sizes = [16, 16, 16], strides = [1, 1, 1]} : vector<18x18x16xf32> to vector<16x16x16xf32>
    %20 = vector.shape_cast %19 : vector<16x16x16xf32> to vector<256x16xf32>
    %21 = tpu.concatenate %4, %6, %8, %10, %12, %14, %16, %18, %20 in 1 : vector<256x16xf32>, vector<256x16xf32>, vector<256x16xf32>, vector<256x16xf32>, vector<256x16xf32>, vector<256x16xf32>, vector<256x16xf32>, vector<256x16xf32>, vector<256x16xf32> -> vector<256x144xf32>
    %22 = arith.truncf %21 : vector<256x144xf32> to vector<256x144xbf16>
    %c0_3 = arith.constant 0 : index
    %c0_4 = arith.constant 0 : index
    %23 = vector.load %arg2[%c0_3, %c0_4] : memref<144x16xbf16, #tpu.memory_space<vmem>>, vector<144x16xbf16>
    %cst = arith.constant dense<0.000000e+00> : vector<256x16xf32>
    %24 = tpu.matmul %22, %23, %cst {dimension_numbers = #tpu.dot_dimension_numbers<[1], [0], [0], [1], [0, 0, 1, 1], [], []>} : vector<256x144xbf16>, vector<144x16xbf16>, vector<256x16xf32> -> vector<256x16xf32>
    %c0_5 = arith.constant 0 : index
    %c0_6 = arith.constant 0 : index
    %25 = vector.load %arg3[%c0_5, %c0_6] : memref<1x16xf32, #tpu.memory_space<vmem>>, vector<1x16xf32>
    %26 = vector.broadcast %25 : vector<1x16xf32> to vector<256x16xf32>
    %27 = arith.addf %24, %26 : vector<256x16xf32>
    %cst_7 = arith.constant 0.000000e+00 : f32
    %28 = vector.broadcast %cst_7 : f32 to vector<256x16xf32>
    %29 = arith.maximumf %27, %28 : vector<256x16xf32>
    %cst_8 = arith.constant 0.000000e+00 : f32
    %30 = vector.broadcast %cst_8 : f32 to vector<18x18x16xf32>
    %c0_9 = arith.constant 0 : index
    %c0_10 = arith.constant 0 : index
    %c0_11 = arith.constant 0 : index
    %31 = vector.load %arg7[%c0_9, %c0_10, %c0_11] : memref<18x18x16xf32, #tpu.memory_space<vmem>>, vector<18x18x16xf32>
    tpu.vector_store %arg7[%c0_9, %c0_10, %c0_11], %30 {strides = array<i32>} : memref<18x18x16xf32, #tpu.memory_space<vmem>>, vector<18x18x16xf32>,
    %32 = vector.shape_cast %29 : vector<256x16xf32> to vector<16x16x16xf32>
    %c1 = arith.constant 1 : index
    %c1_12 = arith.constant 1 : index
    %c0_13 = arith.constant 0 : index
    %33 = vector.load %arg7[%c1, %c1_12, %c0_13] : memref<18x18x16xf32, #tpu.memory_space<vmem>>, vector<16x16x16xf32>
    tpu.vector_store %arg7[%c1, %c1_12, %c0_13], %32 {strides = array<i32>} : memref<18x18x16xf32, #tpu.memory_space<vmem>>, vector<16x16x16xf32>,
    %c0_14 = arith.constant 0 : index
    %c0_15 = arith.constant 0 : index
    %c0_16 = arith.constant 0 : index
    %34 = vector.load %arg7[%c0_14, %c0_15, %c0_16] : memref<18x18x16xf32, #tpu.memory_space<vmem>>, vector<16x16x16xf32>
    %35 = vector.shape_cast %34 : vector<16x16x16xf32> to vector<256x16xf32>
    %c0_17 = arith.constant 0 : index
    %c1_18 = arith.constant 1 : index
    %c0_19 = arith.constant 0 : index
    %36 = vector.load %arg7[%c0_17, %c1_18, %c0_19] : memref<18x18x16xf32, #tpu.memory_space<vmem>>, vector<16x16x16xf32>
    %37 = vector.shape_cast %36 : vector<16x16x16xf32> to vector<256x16xf32>
    %c0_20 = arith.constant 0 : index
    %c2 = arith.constant 2 : index
    %c0_21 = arith.constant 0 : index
    %38 = vector.load %arg7[%c0_20, %c2, %c0_21] : memref<18x18x16xf32, #tpu.memory_space<vmem>>, vector<16x16x16xf32>
    %39 = vector.shape_cast %38 : vector<16x16x16xf32> to vector<256x16xf32>
    %c1_22 = arith.constant 1 : index
    %c0_23 = arith.constant 0 : index
    %c0_24 = arith.constant 0 : index
    %40 = vector.load %arg7[%c1_22, %c0_23, %c0_24] : memref<18x18x16xf32, #tpu.memory_space<vmem>>, vector<16x16x16xf32>
    %41 = vector.shape_cast %40 : vector<16x16x16xf32> to vector<256x16xf32>
    %c1_25 = arith.constant 1 : index
    %c1_26 = arith.constant 1 : index
    %c0_27 = arith.constant 0 : index
    %42 = vector.load %arg7[%c1_25, %c1_26, %c0_27] : memref<18x18x16xf32, #tpu.memory_space<vmem>>, vector<16x16x16xf32>
    %43 = vector.shape_cast %42 : vector<16x16x16xf32> to vector<256x16xf32>
    %c1_28 = arith.constant 1 : index
    %c2_29 = arith.constant 2 : index
    %c0_30 = arith.constant 0 : index
    %44 = vector.load %arg7[%c1_28, %c2_29, %c0_30] : memref<18x18x16xf32, #tpu.memory_space<vmem>>, vector<16x16x16xf32>
    %45 = vector.shape_cast %44 : vector<16x16x16xf32> to vector<256x16xf32>
    %c2_31 = arith.constant 2 : index
    %c0_32 = arith.constant 0 : index
    %c0_33 = arith.constant 0 : index
    %46 = vector.load %arg7[%c2_31, %c0_32, %c0_33] : memref<18x18x16xf32, #tpu.memory_space<vmem>>, vector<16x16x16xf32>
    %47 = vector.shape_cast %46 : vector<16x16x16xf32> to vector<256x16xf32>
    %c2_34 = arith.constant 2 : index
    %c1_35 = arith.constant 1 : index
    %c0_36 = arith.constant 0 : index
    %48 = vector.load %arg7[%c2_34, %c1_35, %c0_36] : memref<18x18x16xf32, #tpu.memory_space<vmem>>, vector<16x16x16xf32>
    %49 = vector.shape_cast %48 : vector<16x16x16xf32> to vector<256x16xf32>
    %c2_37 = arith.constant 2 : index
    %c2_38 = arith.constant 2 : index
    %c0_39 = arith.constant 0 : index
    %50 = vector.load %arg7[%c2_37, %c2_38, %c0_39] : memref<18x18x16xf32, #tpu.memory_space<vmem>>, vector<16x16x16xf32>
    %51 = vector.shape_cast %50 : vector<16x16x16xf32> to vector<256x16xf32>
    %52 = tpu.concatenate %35, %37, %39, %41, %43, %45, %47, %49, %51 in 1 : vector<256x16xf32>, vector<256x16xf32>, vector<256x16xf32>, vector<256x16xf32>, vector<256x16xf32>, vector<256x16xf32>, vector<256x16xf32>, vector<256x16xf32>, vector<256x16xf32> -> vector<256x144xf32>
    %53 = arith.truncf %52 : vector<256x144xf32> to vector<256x144xbf16>
    %c0_40 = arith.constant 0 : index
    %c0_41 = arith.constant 0 : index
    %54 = vector.load %arg4[%c0_40, %c0_41] : memref<144x128xbf16, #tpu.memory_space<vmem>>, vector<144x128xbf16>
    %cst_42 = arith.constant dense<0.000000e+00> : vector<256x128xf32>
    %55 = tpu.matmul %53, %54, %cst_42 {dimension_numbers = #tpu.dot_dimension_numbers<[1], [0], [0], [1], [0, 0, 1, 1], [], []>} : vector<256x144xbf16>, vector<144x128xbf16>, vector<256x128xf32> -> vector<256x128xf32>
    %c0_43 = arith.constant 0 : index
    %c0_44 = arith.constant 0 : index
    %56 = vector.load %arg5[%c0_43, %c0_44] : memref<1x128xf32, #tpu.memory_space<vmem>>, vector<1x128xf32>
    %57 = vector.broadcast %56 : vector<1x128xf32> to vector<256x128xf32>
    %58 = arith.addf %55, %57 : vector<256x128xf32>
    %59 = vector.extract_strided_slice %2 {offsets = [1, 1, 0], sizes = [16, 16, 16], strides = [1, 1, 1]} : vector<18x18x16xf32> to vector<16x16x16xf32>
    %60 = vector.shape_cast %59 : vector<16x16x16xf32> to vector<256x16xf32>
    %cst_45 = arith.constant 0.000000e+00 : f32
    %61 = vector.broadcast %cst_45 : f32 to vector<256x112xf32>
    %62 = tpu.concatenate %60, %61 in 1 : vector<256x16xf32>, vector<256x112xf32> -> vector<256x128xf32>
    %63 = arith.addf %58, %62 : vector<256x128xf32>
    %cst_46 = arith.constant 0.000000e+00 : f32
    %64 = vector.broadcast %cst_46 : f32 to vector<256x128xf32>
    %65 = arith.maximumf %63, %64 : vector<256x128xf32>
    %c0_47 = arith.constant 0 : index
    %c0_48 = arith.constant 0 : index
    %c0_49 = arith.constant 0 : index
    %66 = vector.load %arg6[%c0_47, %c0_48, %c0_49] : memref<1x256x128xf32, #tpu.memory_space<vmem>>, vector<1x256x128xf32>
    %67 = vector.shape_cast %66 : vector<1x256x128xf32> to vector<256x128xf32>
    %68 = vector.shape_cast %65 : vector<256x128xf32> to vector<1x256x128xf32>
    tpu.vector_store %arg6[%c0_47, %c0_48, %c0_49], %68 {strides = array<i32>} : memref<1x256x128xf32, #tpu.memory_space<vmem>>, vector<1x256x128xf32>,
    return
  }
  func.func @transform_0(%arg0: i32) -> (i32, i32, i32, i32) {
    %c0_i32 = arith.constant 0 : i32
    %c0_i32_0 = arith.constant 0 : i32
    %c0_i32_1 = arith.constant 0 : i32
    %c0_i32_2 = arith.constant 0 : i32
    return %arg0, %c0_i32, %c0_i32_0, %c0_i32_1 : i32, i32, i32, i32
  }
  func.func @transform_1(%arg0: i32) -> (i32, i32) {
    %c0_i32 = arith.constant 0 : i32
    %c0_i32_0 = arith.constant 0 : i32
    %c0_i32_1 = arith.constant 0 : i32
    return %c0_i32, %c0_i32_0 : i32, i32
  }
  func.func @transform_2(%arg0: i32) -> (i32, i32) {
    %c0_i32 = arith.constant 0 : i32
    %c0_i32_0 = arith.constant 0 : i32
    %c0_i32_1 = arith.constant 0 : i32
    return %c0_i32, %c0_i32_0 : i32, i32
  }
  func.func @transform_3(%arg0: i32) -> (i32, i32) {
    %c0_i32 = arith.constant 0 : i32
    %c0_i32_0 = arith.constant 0 : i32
    %c0_i32_1 = arith.constant 0 : i32
    return %c0_i32, %c0_i32_0 : i32, i32
  }
  func.func @transform_4(%arg0: i32) -> (i32, i32) {
    %c0_i32 = arith.constant 0 : i32
    %c0_i32_0 = arith.constant 0 : i32
    %c0_i32_1 = arith.constant 0 : i32
    return %c0_i32, %c0_i32_0 : i32, i32
  }
  func.func @transform_5(%arg0: i32) -> (i32, i32, i32) {
    %c0_i32 = arith.constant 0 : i32
    %c0_i32_0 = arith.constant 0 : i32
    %c0_i32_1 = arith.constant 0 : i32
    return %arg0, %c0_i32, %c0_i32_0 : i32, i32, i32
  }
}

</mosaic_0001>

<bundles_post_ra>
// kernel: tpu_custom_call.1
= control target key start
LH: loop header
LB: loop body
LE: loop exit
PB: predicated region body
PF: predicated region fallthrough
CT: control target
= control target key end

     0   :  { %10 = vsyncpa [#allocation4], 0  ;;  %s7955_s0 = inlined_call_operand.vmem [shape: bf16[2,18,18,16], index: 0, kind: input, shape index: {}]   ;;  %s7956_s1 = inlined_call_operand.vmem [shape: bf16[144,16], index: 1, kind: input, shape index: {}]   ;;  %s7957_s2 = inlined_call_operand.vmem [shape: f32[1,16], index: 2, kind: input, shape index: {}]   ;;  %s7958_s3 = inlined_call_operand.vmem [shape: bf16[144,128], index: 3, kind: input, shape index: {}]   ;;  %s7959_s4 = inlined_call_operand.vmem [shape: f32[1,128], index: 4, kind: input, shape index: {}]   ;;  %s7960_s5 = inlined_call_operand.hbm [shape: f32[2,256,128], index: 5, kind: output, shape index: {}]  }
   0x1   :  { %12 = vsyncpa [#allocation4 + $0x1], 0  ;;  %s5309_s18 = smov 0   ;;  %s5311_s19 = smov 0  }
   0x2   :  { %s5313_s20 = smov 0   ;;  %s5315_s21 = smov 0  }
   0x3 LB: > { %s5330_s22 = sadd.s32 4294967295, %s5265_s21   ;;  %s3908_s23 = sadd.s32 4294967294, %s5265_s21   ;;  %s5265_s21 = sphi %s5315_s21, %s8395_s21   ;;  %s5261_s20 = sphi %s5313_s20, %s8394_s20   ;;  %s5257_s19 = sphi %s5311_s19, %s8393_s19   ;;  %s5253_s18 = sphi %s5309_s18, %s8392_s18  }
   0x4   : > { %s5334_s24 = sadd.s32 1, %s5265_s21   ;;  %s135_s25 = sadd.s32 1, %s5261_s20 }
   0x5   : > { %s132_s26 = ssub.s32 %s5265_s21, %s5334_s24  ;;  %p145_p0 = scmp.ne.s32.totalorder %s5261_s20, %s5257_s19 }
   0x6   : > { %p133_p1 = scmp.eq.s32.totalorder %s132_s26, 0  ;;  %p146_p2 = scmp.eq.s32.totalorder %s5330_s22, 1 }
   0x7   : > { %p151_p3 = scmp.ne.s32.totalorder %s5257_s19, %s5253_s18  ;;  %p152_p4 = scmp.eq.s32.totalorder %s3908_s23, 1 }
   0x8   : > { %s5345_s27 = scalar_select %p133_p1, %s5261_s20, %s135_s25  }
   0x9   : > { %p5347_p5 = por %p146_p2, %p145_p0  ;;  %p5351_p6 = por %p152_p4, %p151_p3 }
   0xa   : > { %p3911_p7 = scmp.ge.s32.totalorder %s5265_s21, 1  ;;  %p190_p8 = scmp.lt.s32.totalorder %s5265_s21, 3 }
   0xc   : > { %p191_p9 = pnand %p3911_p7, %p190_p8 }
   0xe   : > { %194 = sbr.rel (%p191_p9) target bundleno = 1046 (0x416), region = 40 }
  0x13   : > { %p218_p10 = scmp.lt.s32.totalorder %s5330_s22, 1  ;;  %vm380_vm0 = vcmask 1046528   ;;  %s5267_s10 = smov 16   ;;  %vm461_vm1 = vcmask 1045504   ;;  %vm1304_vm2 = vcmask 130048   ;;  %vm1337_vm3 = vcmask 261120  }
  0x14   : > { %s5268_s11 = smov 32   ;;  %s5269_s12 = smov 48   ;;  %vm1370_vm4 = vcmask 392192   ;;  %vm1403_vm5 = vcmask 523264   ;;  %vm1436_vm6 = vcmask 654336   ;;  %vm1469_vm7 = vcmask 785408  }
  0x15   : > { %s219_s30 = scalar_select %p218_p10, %s5330_s22, 1  ;;  %vm1502_vm8 = vcmask 916480   ;;  %vm1889_vm9 = vcmask 123904  }
  0x16   : > { %s5271_s7 = smov 64   ;;  %s5272_s26 = smov 96  }
  0x17   : > { %s4016_s6 = smul.u32 216, %s219_s30  ;;  %s5273_s30 = smov 80  }
  0x18   : > { %s5276_s17 = smov [#allocation3]  }
  0x19   : > { %s5362_s9 = scalar_lea.vmem %s7955_s0, %s4016_s6  ;;  %s5274_s6 = smov 112  }
  0x1a   : > { %v4008_v0 = vld [vmem:[%s5362_s9 + $0x18] sm:$0xff]   ;;  %v5366_v1 = vld [vmem:[%s5362_s9 + $0x20] sm:$0x1]  ;;  %v5377_v7 = vld [vmem:[%s5362_s9 + $0x8] sm:$0x1]  ;;  %s5209_s23 = sshll.u32 %s5276_s17, 4  ;;  %s5210_s23 = int_to_ptr.vmem [resolvable:$false] %s5209_s23 }
  0x1b   : > { %v3973_v2 = vld [vmem:[%s5362_s9] sm:$0xff]   ;;  %v5369_v3 = vunpack.c.l.bf16 %v4008_v0  ;;  %v5371_v4 = vunpack.c.h.bf16 %v4008_v0  ;;  %v7965_v5 = vunpack.c.l.bf16 %v5366_v1  ;;  %v5381_v9 = vld [vmem:[%s5362_s9 + $0x2c] sm:$0x1]  ;;  %v7967_v11 = vunpack.c.l.bf16 %v5377_v7  ;;  %v5402_v23 = vld [vmem:[%s5362_s9 + $0x14] sm:$0x1]  ;;  %s5211_s25 = scalar_lea.vmem %s5210_s23, 8192 }
  0x1c   : > { %v5374_v6 = vunpack.c.l.bf16 %v3973_v2  ;;  %v233_v8 = vld [vmem:[%s5362_s9 + $0x24] sm:$0xff]   ;;  %v5383_v10 = vunpack.c.h.bf16 %v3973_v2  ;;  %v227_v14 = vld [vmem:[%s5362_s9 + $0xc] sm:$0xff]   ;;  %v7966_v21 = vunpack.c.l.bf16 %v5381_v9  ;;  %v239_v28 = vld [vmem:[%s5362_s9 + $0x3c] sm:$0xff]   ;;  %v7969_v37 = vunpack.c.l.bf16 %v5402_v23 }
  0x1d   : > { %v5386_v12 = vunpack.c.l.bf16 %v233_v8  ;;  %v5388_v13 = vunpack.c.h.bf16 %v233_v8  ;;  %v391_v15 = vrot.slane %v5369_v3, 1  ;;  %v392_v16 = vrot.slane %v5371_v4, 1  ;;  %v5423_v33 = vld [vmem:[%s5362_s9 + $0x44] sm:$0x1]  ;;  %v4009_v38 = vld [vmem:[%s5362_s9 + $0x30] sm:$0xff]   ;;  %v4010_v58 = vld [vmem:[%s5362_s9 + $0x48] sm:$0xff]  }
  0x1e   : > { %8116 = vst [vmem:[#allocation6_spill] sm:$0xff] %v5374_v6  ;;  %8117 = vst [vmem:[#allocation7_spill] sm:$0xff] %v5383_v10  ;;  %v394_v17 = vrot.slane %v7965_v5, 1  ;;  %v381_v18 = vrot.slane %v5374_v6, 1  ;;  %v382_v19 = vrot.slane %v5383_v10, 1  ;;  %v384_v20 = vrot.slane %v7967_v11, 1 }
  0x1f   : > { %v396_v22 = vrot.slane %v5386_v12, 1  ;;  %v5405_v24 = vsel %vm380_vm0, %v391_v15, %v392_v16  ;;  %v397_v26 = vrot.slane %v5388_v13, 1  ;;  %v5411_v27 = vunpack.c.l.bf16 %v227_v14  ;;  %v5443_v43 = vld [vmem:[%s5362_s9 + $0x38] sm:$0x1]  ;;  %v5471_v57 = vld [vmem:[%s5362_s9 + $0x5c] sm:$0x1] }
  0x20   : > { %8118 = vst [vmem:[#allocation8_spill] sm:$0xff] %v5405_v24  ;;  %v5408_v25 = vsel %vm380_vm0, %v392_v16, %v394_v17  ;;  %v383_v30 = vsel %vm380_vm0, %v381_v18, %v382_v19  ;;  %v385_v31 = vsel %vm380_vm0, %v382_v19, %v384_v20  ;;  %v399_v32 = vrot.slane %v7966_v21, 1  ;;  %v245_v52 = vld [vmem:[%s5362_s9 + $0x54] sm:$0xff]   ;;  %v5475_v59 = vld [vmem:[%s5362_s9 + $0x50] sm:$0x1]  ;;  %v4011_v17 = vld [vmem:[%s5362_s9 + $0x60] sm:$0xff]  }
  0x21   : > { %8119 = vst [vmem:[#allocation9_spill] sm:$0xff] %v5408_v25  ;;  %v5416_v29 = vpack.i.bf16 %v5408_v25, %v5405_v24  ;;  %v4067_v34 = vpack.i.bf16 %v385_v31, %v383_v30  ;;  %v5426_v35 = vsel %vm380_vm0, %v396_v22, %v397_v26  ;;  %v5428_v36 = vunpack.c.h.bf16 %v227_v14  ;;  %v251_v0 = vld [vmem:[%s5362_s9 + $0x6c] sm:$0xff]   ;;  %v5499_v16 = vld [vmem:[%s5362_s9 + $0x74] sm:$0x1]  ;;  %v4012_v21 = vld [vmem:[%s5362_s9 + $0x78] sm:$0xff]  }
  0x22   : > { %8121 = vst [vmem:[#allocation11_spill] sm:$0xff] %v5426_v35  ;;  %v5435_v39 = vsel %vm380_vm0, %v397_v26, %v399_v32  ;;  %v386_v40 = vrot.slane %v5411_v27, 1  ;;  %v5438_v41 = vunpack.c.l.bf16 %v239_v28  ;;  %v5440_v42 = vunpack.c.h.bf16 %v239_v28  ;;  %v5522_v32 = vld [vmem:[%s5362_s9 + $0x68] sm:$0x1]  ;;  %v5575_v11 = vld [vmem:[%s5362_s9 + $0x80] sm:$0x1] }
  0x23   : > { %8120 = vst [vmem:[#allocation10_spill] sm:$0xff] %v5416_v29  ;;  %4078 = vrot.lane.b32.xlu1 %v5416_v29, %s5267_s10  ;;  %8122 = vst [vmem:[#allocation12_spill] sm:$0xff] %v5435_v39  ;;  %4068 = vrot.lane.b32.xlu0 %v4067_v34, %s5267_s10  ;;  %v5448_v44 = vpack.i.bf16 %v5435_v39, %v5426_v35  ;;  %v387_v45 = vrot.slane %v5428_v36, 1  ;;  %v389_v46 = vrot.slane %v7969_v37, 1  ;;  %v7964_v47 = vunpack.c.l.bf16 %v5423_v33  ;;  %v5640_v25 = vld [vmem:[%s5362_s9 + $0x98] sm:$0x1] }
  0x24   : > { %v406_v48 = vrot.slane %v5438_v41, 1  ;;  %v407_v49 = vrot.slane %v5440_v42, 1  ;;  %v5456_v50 = vunpack.c.l.bf16 %v4009_v38  ;;  %v5458_v51 = vunpack.c.h.bf16 %v4009_v38 }
  0x25   : > { %8123 = vst [vmem:[#allocation13_spill] sm:$0xff] %v5448_v44  ;;  %v5462_v53 = vsel %vm380_vm0, %v386_v40, %v387_v45  ;;  %v5465_v54 = vsel %vm380_vm0, %v387_v45, %v389_v46  ;;  %v409_v55 = vrot.slane %v7964_v47, 1  ;;  %v7963_v56 = vunpack.c.l.bf16 %v5443_v43 }
  0x26   : > { %8124 = vst [vmem:[#allocation14_spill] sm:$0xff] %v5462_v53  ;;  %8125 = vst [vmem:[#allocation15_spill] sm:$0xff] %v5465_v54  ;;  %v5481_v60 = vpack.i.bf16 %v5465_v54, %v5462_v53  ;;  %v5484_v61 = vsel %vm380_vm0, %v406_v48, %v407_v49  ;;  %v401_v62 = vrot.slane %v5456_v50, 1  ;;  %v402_v63 = vrot.slane %v5458_v51, 1 }
  0x27   : > { %4083 = vrot.lane.b32.xlu1 %v5448_v44, %s5267_s10  ;;  %8127 = vst [vmem:[#allocation17_spill] sm:$0xff] %v5484_v61  ;;  %v5490_v2 = vsel %vm380_vm0, %v407_v49, %v409_v55  ;;  %v404_v8 = vrot.slane %v7963_v56, 1  ;;  %v5494_v14 = vunpack.c.l.bf16 %v245_v52  ;;  %v5496_v15 = vunpack.c.h.bf16 %v245_v52 }
  0x28   : > { %8126 = vst [vmem:[#allocation16_spill] sm:$0xff] %v5481_v60  ;;  %8128 = vst [vmem:[#allocation18_spill] sm:$0xff] %v5490_v2  ;;  %4073 = vrot.lane.b32.xlu0 %v5481_v60, %s5267_s10  ;;  %v5506_v18 = vpack.i.bf16 %v5490_v2, %v5484_v61  ;;  %v5509_v19 = vsel %vm380_vm0, %v401_v62, %v402_v63  ;;  %v7961_v20 = vunpack.c.l.bf16 %v5471_v57  ;;  %v5512_v22 = vunpack.c.l.bf16 %v4010_v58 }
  0x29   : > { %8129 = vst [vmem:[#allocation19_spill] sm:$0xff] %v5494_v14  ;;  %8130 = vst [vmem:[#allocation20_spill] sm:$0xff] %v5496_v15  ;;  %v5515_v26 = vsel %vm380_vm0, %v402_v63, %v404_v8  ;;  %v416_v28 = vrot.slane %v5494_v14, 1  ;;  %v417_v30 = vrot.slane %v5496_v15, 1  ;;  %v5519_v31 = vunpack.c.h.bf16 %v4010_v58  ;;  %v257_v8 = vld [vmem:[%s5362_s9 + $0x84] sm:$0xff]  }
  0x2a   : > { %8131 = vst [vmem:[#allocation21_spill] sm:$0xff] %v5506_v18  ;;  %8132 = vst [vmem:[#allocation22_spill] sm:$0xff] %v5509_v19  ;;  %v5528_v34 = vpack.i.bf16 %v5515_v26, %v5509_v19  ;;  %v419_v38 = vrot.slane %v7961_v20, 1  ;;  %v7962_v40 = vunpack.c.l.bf16 %v5475_v59  ;;  %v411_v45 = vrot.slane %v5512_v22, 1 }
  0x2b   : > { %8133 = vst [vmem:[#allocation23_spill] sm:$0xff] %v5515_v26  ;;  %4093 = vrot.lane.b32.xlu1 %v5506_v18, %s5267_s10  ;;  %v5535_v46 = vsel %vm380_vm0, %v416_v28, %v417_v30  ;;  %v412_v48 = vrot.slane %v5519_v31, 1  ;;  %v5538_v49 = vunpack.c.l.bf16 %v251_v0  ;;  %v5540_v52 = vunpack.c.h.bf16 %v251_v0  ;;  %v5554_v28 = vld [vmem:[%s5362_s9 + $0x8c] sm:$0x1] }
  0x2c   : > { %8134 = vst [vmem:[#allocation24_spill] sm:$0xff] %v5528_v34  ;;  %8135 = vst [vmem:[#allocation25_spill] sm:$0xff] %v5535_v46  ;;  %4088 = vrot.lane.b32.xlu0 %v5528_v34, %s5267_s10  ;;  %v5545_v55 = vsel %vm380_vm0, %v417_v30, %v419_v38  ;;  %v414_v58 = vrot.slane %v7962_v40, 1  ;;  %v7968_v62 = vunpack.c.l.bf16 %v5499_v16  ;;  %v5550_v63 = vunpack.c.l.bf16 %v4011_v17 }
  0x2d   : > { %8136 = vst [vmem:[#allocation26_spill] sm:$0xff] %v5538_v49  ;;  %8137 = vst [vmem:[#allocation27_spill] sm:$0xff] %v5540_v52  ;;  %v5558_v0 = vpack.i.bf16 %v5545_v55, %v5535_v46  ;;  %v5561_v20 = vsel %vm380_vm0, %v411_v45, %v412_v48  ;;  %v426_v30 = vrot.slane %v5538_v49, 1  ;;  %v427_v38 = vrot.slane %v5540_v52, 1 }
  0x2e   : > { %8138 = vst [vmem:[#allocation28_spill] sm:$0xff] %v5545_v55  ;;  %8139 = vst [vmem:[#allocation29_spill] sm:$0xff] %v5550_v63  ;;  %v5566_v40 = vsel %vm380_vm0, %v412_v48, %v414_v58  ;;  %v429_v56 = vrot.slane %v7968_v62, 1  ;;  %v5570_v47 = vunpack.c.h.bf16 %v4011_v17  ;;  %v7975_v5 = vunpack.c.l.bf16 %v5522_v32 }
  0x2f   : > { %8140 = vst [vmem:[#allocation30_spill] sm:$0xff] %v5558_v0  ;;  %8141 = vst [vmem:[#allocation31_spill] sm:$0xff] %v5561_v20  ;;  %4103 = vrot.lane.b32.xlu1 %v5558_v0, %s5267_s10  ;;  %v5581_v45 = vpack.i.bf16 %v5566_v40, %v5561_v20  ;;  %v5584_v48 = vsel %vm380_vm0, %v426_v30, %v427_v38  ;;  %v421_v58 = vrot.slane %v5550_v63, 1  ;;  %v5587_v17 = vunpack.c.l.bf16 %v257_v8 }
  0x30   : > { %8142 = vst [vmem:[#allocation32_spill] sm:$0xff] %v5566_v40  ;;  %8143 = vst [vmem:[#allocation33_spill] sm:$0xff] %v5570_v47  ;;  %v5590_v62 = vsel %vm380_vm0, %v427_v38, %v429_v56  ;;  %v422_v37 = vrot.slane %v5570_v47, 1  ;;  %v424_v55 = vrot.slane %v7975_v5, 1  ;;  %v5595_v46 = vunpack.c.h.bf16 %v257_v8  ;;  %v263_v38 = vld [vmem:[%s5362_s9 + $0x9c] sm:$0xff]  }
  0x31   : > { %8144 = vst [vmem:[#allocation34_spill] sm:$0xff] %v5581_v45  ;;  %8145 = vst [vmem:[#allocation35_spill] sm:$0xff] %v5584_v48  ;;  %4098 = vrot.lane.b32.xlu0 %v5581_v45, %s5267_s10  ;;  %v5601_v30 = vpack.i.bf16 %v5590_v62, %v5584_v48  ;;  %v436_v20 = vrot.slane %v5587_v17, 1  ;;  %v5605_v56 = vunpack.c.l.bf16 %v4012_v21  ;;  %v5615_v61 = vunpack.c.h.bf16 %v4012_v21  ;;  %v4013_v48 = vld [vmem:[%s5362_s9 + $0x90] sm:$0xff]  }
  0x32   : > { %8146 = vst [vmem:[#allocation36_spill] sm:$0xff] %v5587_v17  ;;  %8147 = vst [vmem:[#allocation37_spill] sm:$0xff] %v5590_v62  ;;  %v5609_v2 = vsel %vm380_vm0, %v421_v58, %v422_v37  ;;  %v5612_v8 = vsel %vm380_vm0, %v422_v37, %v424_v55  ;;  %v437_v5 = vrot.slane %v5595_v46, 1  ;;  %v5618_v62 = vld [vmem:[%s5362_s9 + $0xa4] sm:$0x1]  ;;  %v8155_v58 = vunpack.c.l.bf16 %v5554_v28 }
  0x33   : > { %8148 = vst [vmem:[#allocation38_spill] sm:$0xff] %v5595_v46  ;;  %8149 = vst [vmem:[#allocation39_spill] sm:$0xff] %v5601_v30  ;;  %4113 = vrot.lane.b32.xlu1 %v5601_v30, %s5267_s10  ;;  %v5625_v40 = vpack.i.bf16 %v5612_v8, %v5609_v2  ;;  %v7989_v37 = vunpack.c.l.bf16 %v5575_v11  ;;  %v431_v55 = vrot.slane %v5605_v56, 1  ;;  %v432_v19 = vrot.slane %v5615_v61, 1  ;;  %v5695_v45 = vld [vmem:[%s5362_s9 + $0xb0] sm:$0x1] }
  0x34   : > { %8150 = vst [vmem:[#allocation40_spill] sm:$0xff] %v5605_v56  ;;  %8151 = vst [vmem:[#allocation41_spill] sm:$0xff] %v5609_v2  ;;  %v439_v26 = vrot.slane %v8155_v58, 1  ;;  %v5632_v21 = vsel %vm380_vm0, %v436_v20, %v437_v5  ;;  %v5635_v39 = vunpack.c.l.bf16 %v263_v38  ;;  %v5637_v35 = vunpack.c.h.bf16 %v263_v38  ;;  %v269_v38 = vld [vmem:[%s5362_s9 + $0xb4] sm:$0xff]  }
  0x35   : > { %8152 = vst [vmem:[#allocation42_spill] sm:$0xff] %v5612_v8  ;;  %8153 = vst [vmem:[#allocation43_spill] sm:$0xff] %v5615_v61  ;;  %4108 = vrot.lane.b32.xlu0 %v5625_v40, %s5267_s10  ;;  %v434_v20 = vrot.slane %v7989_v37, 1  ;;  %v7996_v8 = vunpack.c.l.bf16 %v5618_v62  ;;  %v5650_v2 = vunpack.c.l.bf16 %v4013_v48  ;;  %v5658_v54 = vsel %vm380_vm0, %v431_v55, %v432_v19 }
  0x36   : > { %8154 = vst [vmem:[#allocation44_spill] sm:$0xff] %v5625_v40  ;;  %8156 = vst [vmem:[#allocation45_spill] sm:$0xff] %v5632_v21  ;;  %v5645_v58 = vsel %vm380_vm0, %v437_v5, %v439_v26  ;;  %v446_v53 = vrot.slane %v5635_v39, 1  ;;  %v447_v5 = vrot.slane %v5637_v35, 1  ;;  %v5667_v30 = vunpack.c.h.bf16 %v4013_v48 }
  0x37   : > { %8157 = vst [vmem:[#allocation46_spill] sm:$0xff] %v5635_v39  ;;  %8158 = vst [vmem:[#allocation47_spill] sm:$0xff] %v5637_v35  ;;  %v5655_v24 = vpack.i.bf16 %v5645_v58, %v5632_v21  ;;  %v5663_v26 = vsel %vm380_vm0, %v432_v19, %v434_v20  ;;  %v449_v37 = vrot.slane %v7996_v8, 1  ;;  %v4014_v21 = vld [vmem:[%s5362_s9 + $0xa8] sm:$0xff]   ;;  %v441_v20 = vrot.slane %v5650_v2, 1 }
  0x38   : > { %8159 = vst [vmem:[#allocation48_spill] sm:$0xff] %v5645_v58  ;;  %8160 = vst [vmem:[#allocation49_spill] sm:$0xff] %v5650_v2  ;;  %v5671_v58 = vld [vmem:[%s5362_s9 + $0xbc] sm:$0x1]  ;;  %v5678_v55 = vpack.i.bf16 %v5663_v26, %v5658_v54  ;;  %v5681_v19 = vsel %vm380_vm0, %v446_v53, %v447_v5  ;;  %v5684_v8 = vunpack.c.l.bf16 %v269_v38  ;;  %v442_v0 = vrot.slane %v5667_v30, 1 }
  0x39   : > { %8161 = vst [vmem:[#allocation50_spill] sm:$0xff] %v5655_v24  ;;  %8162 = vst [vmem:[#allocation51_spill] sm:$0xff] %v5658_v54  ;;  %4123 = vrot.lane.b32.xlu1 %v5655_v24, %s5267_s10  ;;  %v5687_v48 = vsel %vm380_vm0, %v447_v5, %v449_v37  ;;  %v8169_v40 = vunpack.c.l.bf16 %v5640_v25  ;;  %v5692_v24 = vunpack.c.h.bf16 %v269_v38  ;;  %v5705_v5 = vunpack.c.l.bf16 %v4014_v21 }
  0x3a   : > { %8163 = vst [vmem:[#allocation52_spill] sm:$0xff] %v5663_v26  ;;  %8164 = vst [vmem:[#allocation53_spill] sm:$0xff] %v5667_v30  ;;  %4118 = vrot.lane.b32.xlu0 %v5678_v55, %s5267_s10  ;;  %v5701_v53 = vpack.i.bf16 %v5687_v48, %v5681_v19  ;;  %v456_v37 = vrot.slane %v5684_v8, 1  ;;  %v5708_v54 = vsel %vm380_vm0, %v441_v20, %v442_v0  ;;  %v5714_v44 = vunpack.c.h.bf16 %v4014_v21 }
  0x3b   : > { %8165 = vst [vmem:[#allocation54_spill] sm:$0xff] %v5678_v55  ;;  %8166 = vst [vmem:[#allocation55_spill] sm:$0xff] %v5681_v19  ;;  %v444_v18 = vrot.slane %v8169_v40, 1  ;;  %v457_v38 = vrot.slane %v5692_v24, 1  ;;  %v8024_v20 = vunpack.c.l.bf16 %v5695_v45  ;;  %v451_v55 = vrot.slane %v5705_v5, 1 }
  0x3c   : > { %8167 = vst [vmem:[#allocation56_spill] sm:$0xff] %v5684_v8  ;;  %8168 = vst [vmem:[#allocation57_spill] sm:$0xff] %v5687_v48  ;;  %v8177_v48 = vunpack.c.l.bf16 %v5671_v58  ;;  %v467_v21 = vrot.slane %v5411_v27, 2 }
  0x3d   : > { %8170 = vst [vmem:[#allocation58_spill] sm:$0xff] %v5692_v24  ;;  %8171 = vst [vmem:[#allocation59_spill] sm:$0xff] %v5701_v53  ;;  %v5711_v40 = vsel %vm380_vm0, %v442_v0, %v444_v18  ;;  %4133 = vrot.lane.b32.xlu1 %v5701_v53, %s5267_s10  ;;  %v5727_v18 = vsel %vm380_vm0, %v456_v37, %v457_v38  ;;  %v452_v0 = vrot.slane %v5714_v44, 1  ;;  %v468_v53 = vrot.slane %v5428_v36, 2 }
  0x3e   : > { %8172 = vst [vmem:[#allocation60_spill] sm:$0xff] %v5705_v5  ;;  %8173 = vst [vmem:[#allocation61_spill] sm:$0xff] %v5708_v54  ;;  %v5720_v26 = vpack.i.bf16 %v5711_v40, %v5708_v54  ;;  %v459_v19 = vrot.slane %v8177_v48, 1  ;;  %v454_v48 = vrot.slane %v8024_v20, 1  ;;  %v8180_v54 = vunpack.c.l.bf16 %v5402_v23 }
  0x3f   : > { %8174 = vst [vmem:[#allocation62_spill] sm:$0xff] %v5711_v40  ;;  %8175 = vst [vmem:[#allocation63_spill] sm:$0xff] %v5714_v44  ;;  %v462_v37 = vrot.slane %v5374_v6, 2  ;;  %v5747_v29 = vsel %vm380_vm0, %v451_v55, %v452_v0  ;;  %v8183_v23 = vunpack.c.l.bf16 %v5377_v7  ;;  %v477_v6 = vrot.slane %v5386_v12, 2 }
  0x40   : > { %8176 = vst [vmem:[#allocation64_spill] sm:$0xff] %v5720_v26  ;;  %8178 = vst [vmem:[#allocation65_spill] sm:$0xff] %v5727_v18  ;;  %4128 = vrot.lane.b32.xlu0 %v5720_v26, %s5267_s10  ;;  %v5735_v40 = vsel %vm380_vm0, %v457_v38, %v459_v19  ;;  %v470_v34 = vrot.slane %v8180_v54, 2  ;;  %v469_v26 = vsel %vm461_vm1, %v467_v21, %v468_v53  ;;  %v463_v19 = vrot.slane %v5383_v10, 2 }
  0x41   : > { %8179 = vst [vmem:[#allocation66_spill] sm:$0xff] %v5735_v40  ;;  %v5744_v60 = vpack.i.bf16 %v5735_v40, %v5727_v18  ;;  %8181 = vst [vmem:[#allocation67_spill] sm:$0xff] %v5747_v29  ;;  %v5752_v38 = vsel %vm380_vm0, %v452_v0, %v454_v48  ;;  %v465_v54 = vrot.slane %v8183_v23, 2  ;;  %v478_v0 = vrot.slane %v5388_v13, 2 }
  0x42   : > { %8182 = vst [vmem:[#allocation68_spill] sm:$0xff] %v5752_v38  ;;  %v471_v20 = vsel %vm461_vm1, %v468_v53, %v470_v34  ;;  %v5762_v55 = vpack.i.bf16 %v5752_v38, %v5747_v29  ;;  %v464_v40 = vsel %vm461_vm1, %v462_v37, %v463_v19  ;;  %v8184_v7 = vunpack.c.l.bf16 %v5381_v9 }
  0x43   : > { %4143 = vrot.lane.b32.xlu1 %v5744_v60, %s5267_s10  ;;  %v5764_v21 = vpack.i.bf16 %v471_v20, %v469_v26  ;;  %v466_v34 = vsel %vm461_vm1, %v463_v19, %v465_v54  ;;  %v472_v48 = vrot.slane %v5369_v3, 2  ;;  %v473_v23 = vrot.slane %v5371_v4, 2 }
  0x44   : > { %v480_v53 = vrot.slane %v8184_v7, 2  ;;  %4138 = vrot.lane.b32.xlu0 %v5762_v55, %s5267_s10  ;;  %v4147_v18 = vpack.i.bf16 %v466_v34, %v464_v40  ;;  %v5776_v26 = vsel %vm461_vm1, %v477_v6, %v478_v0  ;;  %v8186_v20 = vunpack.c.l.bf16 %v5366_v1 }
  0x45   : > { %8185 = vst [vmem:[#allocation69_spill] sm:$0xff] %v5776_v26  ;;  %v487_v38 = vrot.slane %v5438_v41, 2  ;;  %v5785_v9 = vsel %vm461_vm1, %v472_v48, %v473_v23  ;;  %v488_v54 = vrot.slane %v5440_v42, 2  ;;  %v8188_v7 = vunpack.c.l.bf16 %v5423_v33 }
  0x46   : > { %v475_v37 = vrot.slane %v8186_v20, 2  ;;  %v5782_v19 = vsel %vm461_vm1, %v478_v0, %v480_v53  ;;  %v482_v40 = vrot.slane %v5456_v50, 2  ;;  %v483_v0 = vrot.slane %v5458_v51, 2 }
  0x47   : > { %8187 = vst [vmem:[#allocation70_spill] sm:$0xff] %v5782_v19  ;;  %v490_v29 = vrot.slane %v8188_v7, 2  ;;  %4153 = vrot.lane.b32.xlu1 %v5764_v21, %s5268_s11  ;;  %v5794_v1 = vpack.i.bf16 %v5782_v19, %v5776_v26  ;;  %v5802_v34 = vsel %vm461_vm1, %v487_v38, %v488_v54  ;;  %v8191_v53 = vunpack.c.l.bf16 %v5443_v43 }
  0x48   : > { %v5797_v6 = vsel %vm461_vm1, %v473_v23, %v475_v37  ;;  %8189 = vst [vmem:[#allocation71_spill] sm:$0xff] %v5802_v34  ;;  %4148 = vrot.lane.b32.xlu0 %v4147_v18, %s5268_s11  ;;  %v5815_v23 = vsel %vm461_vm1, %v482_v40, %v483_v0  ;;  %v497_v37 = vrot.slane %v5494_v14, 2  ;;  %v498_v38 = vrot.slane %v5496_v15, 2 }
  0x49   : > { %v5805_v33 = vsel %vm461_vm1, %v488_v54, %v490_v29  ;;  %v485_v48 = vrot.slane %v8191_v53, 2  ;;  %v5812_v20 = vpack.i.bf16 %v5797_v6, %v5785_v9  ;;  %v8193_v29 = vunpack.c.l.bf16 %v5471_v57 }
  0x4a   : > { %8190 = vst [vmem:[#allocation72_spill] sm:$0xff] %v5805_v33  ;;  %v492_v54 = vrot.slane %v5512_v22, 2  ;;  %v493_v18 = vrot.slane %v5519_v31, 2  ;;  %v5830_v40 = vpack.i.bf16 %v5805_v33, %v5802_v34  ;;  %v8194_v53 = vunpack.c.l.bf16 %v5475_v59 }
  0x4b   : > { %v5820_v7 = vsel %vm461_vm1, %v483_v0, %v485_v48  ;;  %v500_v43 = vrot.slane %v8193_v29, 2  ;;  %4163 = vrot.lane.b32.xlu1 %v5794_v1, %s5268_s11  ;;  %v507_v0 = vrot.slane %v5538_v49, 2  ;;  %v5836_v48 = vsel %vm461_vm1, %v497_v37, %v498_v38 }
  0x4c   : > { %8192 = vst [vmem:[#allocation73_spill] sm:$0xff] %v5820_v7  ;;  %v495_v19 = vrot.slane %v8194_v53, 2  ;;  %8195 = vst [vmem:[#allocation74_spill] sm:$0xff] %v5836_v48  ;;  %v508_v29 = vrot.slane %v5540_v52, 2  ;;  %v8197_v26 = vunpack.c.l.bf16 %v5499_v16  ;;  %4158 = vrot.lane.b32.xlu0 %v5812_v20, %s5268_s11  ;;  %v5848_v59 = vpack.i.bf16 %v5820_v7, %v5815_v23 }
  0x4d   : > { %v5839_v57 = vsel %vm461_vm1, %v498_v38, %v500_v43  ;;  %v502_v53 = vrot.slane %v5550_v63, 2  ;;  %v503_v37 = vrot.slane %v5570_v47, 2  ;;  %v5853_v33 = vsel %vm461_vm1, %v492_v54, %v493_v18 }
  0x4e   : > { %8196 = vst [vmem:[#allocation75_spill] sm:$0xff] %v5839_v57  ;;  %v510_v10 = vrot.slane %v8197_v26, 2  ;;  %8198 = vst [vmem:[#allocation76_spill] sm:$0xff] %v5853_v33  ;;  %v5856_v38 = vsel %vm461_vm1, %v493_v18, %v495_v19  ;;  %v8200_v16 = vunpack.c.l.bf16 %v5522_v32  ;;  %v5864_v43 = vpack.i.bf16 %v5839_v57, %v5836_v48 }
  0x4f   : > { %8199 = vst [vmem:[#allocation77_spill] sm:$0xff] %v5856_v38  ;;  %4173 = vrot.lane.b32.xlu1 %v5830_v40, %s5268_s11  ;;  %v5867_v34 = vsel %vm461_vm1, %v507_v0, %v508_v29  ;;  %v517_v54 = vrot.slane %v5587_v17, 2  ;;  %v518_v19 = vrot.slane %v5595_v46, 2  ;;  %v8203_v32 = vunpack.c.l.bf16 %v5554_v28 }
  0x50   : > { %v505_v26 = vrot.slane %v8200_v16, 2  ;;  %8201 = vst [vmem:[#allocation78_spill] sm:$0xff] %v5867_v34  ;;  %v5870_v7 = vsel %vm461_vm1, %v508_v29, %v510_v10  ;;  %4168 = vrot.lane.b32.xlu0 %v5848_v59, %s5268_s11  ;;  %v5880_v16 = vpack.i.bf16 %v5856_v38, %v5853_v33  ;;  %v5883_v0 = vsel %vm461_vm1, %v502_v53, %v503_v37 }
  0x51   : > { %8202 = vst [vmem:[#allocation79_spill] sm:$0xff] %v5870_v7  ;;  %v520_v18 = vrot.slane %v8203_v32, 2  ;;  %8204 = vst [vmem:[#allocation80_spill] sm:$0xff] %v5883_v0  ;;  %v512_v29 = vrot.slane %v5605_v56, 2  ;;  %v513_v57 = vrot.slane %v5615_v61, 2  ;;  %v8206_v28 = vunpack.c.l.bf16 %v5575_v11 }
  0x52   : > { %v5886_v10 = vsel %vm461_vm1, %v503_v37, %v505_v26  ;;  %v5896_v48 = vpack.i.bf16 %v5870_v7, %v5867_v34  ;;  %v527_v53 = vrot.slane %v5635_v39, 2  ;;  %v528_v38 = vrot.slane %v5637_v35, 2 }
  0x53   : > { %8205 = vst [vmem:[#allocation81_spill] sm:$0xff] %v5886_v10  ;;  %v515_v32 = vrot.slane %v8206_v28, 2  ;;  %4183 = vrot.lane.b32.xlu1 %v5864_v43, %s5268_s11  ;;  %v5901_v37 = vsel %vm461_vm1, %v517_v54, %v518_v19  ;;  %v5904_v26 = vsel %vm461_vm1, %v518_v19, %v520_v18  ;;  %v8209_v11 = vunpack.c.l.bf16 %v5618_v62 }
  0x54   : > { %8207 = vst [vmem:[#allocation82_spill] sm:$0xff] %v5901_v37  ;;  %8208 = vst [vmem:[#allocation83_spill] sm:$0xff] %v5904_v26  ;;  %4178 = vrot.lane.b32.xlu0 %v5880_v16, %s5268_s11  ;;  %v5912_v7 = vpack.i.bf16 %v5886_v10, %v5883_v0  ;;  %v522_v34 = vrot.slane %v5650_v2, 2  ;;  %v523_v33 = vrot.slane %v5667_v30, 2  ;;  %v5917_v54 = vsel %vm461_vm1, %v512_v29, %v513_v57 }
  0x55   : > { %v530_v28 = vrot.slane %v8209_v11, 2  ;;  %8210 = vst [vmem:[#allocation84_spill] sm:$0xff] %v5917_v54  ;;  %v5920_v19 = vsel %vm461_vm1, %v513_v57, %v515_v32  ;;  %v8212_v62 = vunpack.c.l.bf16 %v5640_v25  ;;  %v5928_v11 = vpack.i.bf16 %v5904_v26, %v5901_v37 }
  0x56   : > { %8211 = vst [vmem:[#allocation85_spill] sm:$0xff] %v5920_v19  ;;  %v5931_v10 = vsel %vm461_vm1, %v527_v53, %v528_v38  ;;  %v537_v29 = vrot.slane %v5684_v8, 2  ;;  %v538_v57 = vrot.slane %v5692_v24, 2  ;;  %v8215_v25 = vunpack.c.l.bf16 %v5671_v58 }
  0x57   : > { %v525_v18 = vrot.slane %v8212_v62, 2  ;;  %4193 = vrot.lane.b32.xlu1 %v5896_v48, %s5268_s11  ;;  %8213 = vst [vmem:[#allocation86_spill] sm:$0xff] %v5931_v10  ;;  %v5934_v0 = vsel %vm461_vm1, %v528_v38, %v530_v28  ;;  %v5944_v62 = vpack.i.bf16 %v5920_v19, %v5917_v54  ;;  %v5947_v53 = vsel %vm461_vm1, %v522_v34, %v523_v33  ;;  %v5188_v54 = vld [vmem:[%s7956_s1 + $0x30] sm:$0xff]  }
  0x58   : > { %8214 = vst [vmem:[#allocation87_spill] sm:$0xff] %v5934_v0  ;;  %v540_v32 = vrot.slane %v8215_v25, 2  ;;  %4188 = vrot.lane.b32.xlu0 %v5912_v7, %s5268_s11  ;;  %8216 = vst [vmem:[#allocation88_spill] sm:$0xff] %v5947_v53  ;;  %v532_v28 = vrot.slane %v5705_v5, 2  ;;  %v533_v26 = vrot.slane %v5714_v44, 2  ;;  %v8218_v58 = vunpack.c.l.bf16 %v5695_v45 }
  0x59   : > { %v5950_v38 = vsel %vm461_vm1, %v523_v33, %v525_v18  ;;  %v5960_v37 = vpack.i.bf16 %v5934_v0, %v5931_v10  ;;  %v5963_v34 = vsel %vm461_vm1, %v537_v29, %v538_v57  ;;  %v4015_v0 = vld [vmem:[%s5362_s9 + $0xc0] sm:$0xff]   ;;  %v5187_v10 = vld [vmem:[%s7956_s1 + $0x38] sm:$0xff]  }
  0x5a   : > { %8217 = vst [vmem:[#allocation89_spill] sm:$0xff] %v5950_v38  ;;  %v535_v25 = vrot.slane %v8218_v58, 2  ;;  %8219 = vst [vmem:[#allocation90_spill] sm:$0xff] %v5963_v34  ;;  %v5966_v33 = vsel %vm461_vm1, %v538_v57, %v540_v32  ;;  %v5972_v45 = vpack.i.bf16 %v5950_v38, %v5947_v53  ;;  %v5975_v18 = vsel %vm461_vm1, %v532_v28, %v533_v26 }
  0x5b   : > { %4203 = vrot.lane.b32.xlu1 %v5928_v11, %s5268_s11  ;;  %8220 = vst [vmem:[#allocation91_spill] sm:$0xff] %v5966_v33  ;;  %8221 = vst [vmem:[#allocation92_spill] sm:$0xff] %v5975_v18  ;;  %v5984_v29 = vpack.i.bf16 %v5966_v33, %v5963_v34  ;;  %v4227_v32 = vpack.i.bf16 %v5428_v36, %v5411_v27  ;;  %v6006_v28 = vpack.i.bf16 %v5458_v51, %v5456_v50  ;;  %v8063_v53 = vmov 0  }
  0x5c   : > { %4198 = vrot.lane.b32.xlu0 %v5944_v62, %s5268_s11  ;;  %v5978_v58 = vsel %vm461_vm1, %v533_v26, %v535_v25  ;;  %v5996_v26 = vpack.i.bf16 %v5371_v4, %v5369_v3  ;;  %v6011_v25 = vpack.i.bf16 %v5388_v13, %v5386_v12  ;;  %v6017_v33 = vpack.i.bf16 %v5519_v31, %v5512_v22 }
  0x5d   : > { %8222 = vst [vmem:[#allocation93_spill] sm:$0xff] %v5978_v58  ;;  %v5990_v57 = vpack.i.bf16 %v5978_v58, %v5975_v18  ;;  %v6023_v34 = vpack.i.bf16 %v5440_v42, %v5438_v41  ;;  %v6035_v58 = vpack.i.bf16 %v5496_v15, %v5494_v14  ;;  %v6041_v18 = vpack.i.bf16 %v5615_v61, %v5605_v56 }
  0x5e   : > { %v6051_v38 = vpack.i.bf16 %v5540_v52, %v5538_v49  ;;  %1694 = vmatprep.subr.bf16.mxu0 %v8063_v53  ;;  %3543 = vmatprep.subr.bf16.mxu1 %v8063_v53  ;;  %v6059_v56 = vpack.i.bf16 %v5667_v30, %v5650_v2  ;;  %v4006_v61 = vunpack.c.l.bf16 %v4015_v0  ;;  %v6061_v19 = vunpack.c.h.bf16 %v4015_v0 }
  0x5f   : > { %4213 = vrot.lane.b32.xlu1 %v5960_v37, %s5268_s11  ;;  %1695 = vmatpush1.bf16.msra.mxu0 %v5187_v10  ;;  %v6071_v10 = vpack.i.bf16 %v5595_v46, %v5587_v17  ;;  %v6078_v0 = vpack.i.bf16 %v5714_v44, %v5705_v5  ;;  %v6096_v5 = vpack.i.bf16 %v5637_v35, %v5635_v39  ;;  %v5190_v46 = vld [vmem:[%s7956_s1 + $0x20] sm:$0xff]   ;;  %v8230_v39 = vld [vmem:[#allocation34_spill] sm:$0xff] }
  0x60   : > { %4208 = vrot.lane.b32.xlu0 %v5972_v45, %s5268_s11  ;;  %1696 = vmatprep.subr.bf16.mxu0 %v8063_v53  ;;  %v8066_v2 = vrot.slane %v6061_v19, 1  ;;  %v6082_v30 = vpack.i.bf16 %v6061_v19, %v4006_v61  ;;  %v8068_v44 = vrot.slane %v6061_v19, 2  ;;  %v8232_v35 = vld [vmem:[#allocation44_spill] sm:$0xff]  ;;  %v1536_v52 = vpack.c.bf16 %v5797_v6, %v5785_v9 }
  0x62   : > { %3924 = vmatprep.mubr.msk.bf16.mxu0 %vm1304_vm2, %v1536_v52 }
  0x63   : > { %4223 = vrot.lane.b32.xlu1 %v5984_v29, %s5268_s11  ;;  %1697 = vmatpush1.bf16.msra.mxu0 %v5188_v54  ;;  %v5189_v54 = vld [vmem:[%s7956_s1 + $0x28] sm:$0xff]  }
  0x64   : > { %4218 = vrot.lane.b32.xlu0 %v5990_v57, %s5268_s11  ;;  %1698 = vmatprep.subr.bf16.mxu0 %v8063_v53  ;;  %v582_v53 = vrot.slane %v4006_v61, 2 }
  0x67   : > { %4233 = vrot.lane.b32.xlu1 %v5996_v26, %s5269_s12  ;;  %1699 = vmatpush1.bf16.msra.mxu0 %v5189_v54  ;;  %v8226_v54 = vld [vmem:[#allocation10_spill] sm:$0xff] }
  0x68   : > { %4228 = vrot.lane.b32.xlu0 %v4227_v32, %s5269_s12  ;;  %v6029_v32 = vpack.i.bf16 %v5570_v47, %v5550_v63  ;;  %v545_v47 = vrot.slane %v4006_v61, 1  ;;  %v6114_v61 = vpack.i.bf16 %v5692_v24, %v5684_v8  ;;  %v8228_v8 = vld [vmem:[#allocation24_spill] sm:$0xff]  ;;  %v8229_v24 = vld [vmem:[#allocation13_spill] sm:$0xff]  ;;  %v8233_v63 = vld [vmem:[#allocation30_spill] sm:$0xff] }
  0x6a   : > { %v6087_v17 = vsel %vm380_vm0, %v545_v47, %v8066_v2  ;;  %v8224_v47 = vmov 0   ;;  %v6105_v2 = vsel %vm461_vm1, %v582_v53, %v8068_v44  ;;  %v5191_v53 = vld [vmem:[%s7956_s1 + $0x18] sm:$0xff]   ;;  %v8227_v44 = vld [vmem:[#allocation16_spill] sm:$0xff] }
  0x6b   : > { %4243 = vrot.lane.b32.xlu1 %v6006_v28, %s5269_s12  ;;  %8223 = vst [vmem:[#allocation94_spill] sm:$0xff] %v6087_v17  ;;  %1700 = vmatprep.subr.bf16.mxu0 %v8224_v47  ;;  %8225 = vst [vmem:[#allocation95_spill] sm:$0xff] %v6105_v2 }
  0x6c   : > { %4238 = vrot.lane.b32.xlu0 %v6011_v25, %s5269_s12  ;;  %1701 = vmatpush1.bf16.msra.mxu0 %v5190_v46  ;;  %v5192_v46 = vld [vmem:[%s7956_s1 + $0x10] sm:$0xff]  }
  0x6d   : > { %1702 = vmatprep.subr.bf16.mxu0 %v8224_v47 }
  0x6f   : > { %4253 = vrot.lane.b32.xlu1 %v6017_v33, %s5269_s12 }
  0x70   : > { %4248 = vrot.lane.b32.xlu0 %v6023_v34, %s5269_s12  ;;  %1703 = vmatpush1.bf16.msra.mxu0 %v5191_v53  ;;  %v5193_v53 = vld [vmem:[%s7956_s1 + $0x8] sm:$0xff]  }
  0x71   : > { %1704 = vmatprep.subr.bf16.mxu0 %v8224_v47 }
  0x73   : > { %4263 = vrot.lane.b32.xlu1 %v6029_v32, %s5269_s12 }
  0x74   : > { %4258 = vrot.lane.b32.xlu0 %v6035_v58, %s5269_s12  ;;  %1705 = vmatpush1.bf16.msra.mxu0 %v5192_v46  ;;  %v8231_v46 = vld [vmem:[#allocation21_spill] sm:$0xff] }
  0x75   : > { %1706 = vmatprep.subr.bf16.mxu0 %v8224_v47 }
  0x77   : > { %4273 = vrot.lane.b32.xlu1 %v6041_v18, %s5269_s12 }
  0x78   : > { %4268 = vrot.lane.b32.xlu0 %v6051_v38, %s5269_s12  ;;  %1707 = vmatpush1.bf16.msra.mxu0 %v5193_v53  ;;  %v5195_v53 = vld [vmem:[%s7956_s1 + $0x40] sm:$0xff]  }
  0x79   : > { %1708 = vmatprep.subr.bf16.mxu0 %v8224_v47 }
  0x7b   : > { %4283 = vrot.lane.b32.xlu1 %v6059_v56, %s5269_s12 }
  0x7c   : > { %4278 = vrot.lane.b32.xlu0 %v6071_v10, %s5269_s12 }
  0x7f   : > { %4293 = vrot.lane.b32.xlu1 %v6078_v0, %s5269_s12 }
  0x80   : > { %4288 = vrot.lane.b32.xlu0 %v6096_v5, %s5269_s12 }
  0x83   : > { %4303 = vrot.lane.b32.xlu1 %v6082_v30, %s5269_s12 }
  0x84   : > { %4298 = vrot.lane.b32.xlu0 %v6114_v61, %s5269_s12 }
  0x87   : > { %4313 = vrot.lane.b32.xlu1 %v8226_v54, %s5271_s7 }
  0x88   : > { %4308 = vrot.lane.b32.xlu0 %v8227_v44, %s5271_s7  ;;  %v5194_v44 = vld [vmem:[%s7956_s1] sm:$0xff]  }
  0x89   : > { %1709 = vmatpush1.bf16.msra.mxu0 %v5194_v44  ;;  %v8234_v44 = vld [vmem:[#allocation54_spill] sm:$0xff] }
  0x8a   : > { %1724 = vmatprep.subr.bf16.mxu0 %v8224_v47  ;;  %v8235_v47 = vld [vmem:[#allocation39_spill] sm:$0xff] }
  0x8b   : > { %4323 = vrot.lane.b32.xlu1 %v8228_v8, %s5271_s7 }
  0x8c   : > { %4318 = vrot.lane.b32.xlu0 %v8229_v24, %s5271_s7 }
  0x8d   : > { %1725 = vmatpush2.bf16.msra.mxu0 %v5195_v53 }
  0x8f   : > { %4333 = vrot.lane.b32.xlu1 %v8230_v39, %s5271_s7 }
  0x90   : > { %4328 = vrot.lane.b32.xlu0 %v8231_v46, %s5271_s7 }
  0x93   : > { %4343 = vrot.lane.b32.xlu1 %v8232_v35, %s5271_s7 }
  0x94   : > { %4338 = vrot.lane.b32.xlu0 %v8233_v63, %s5271_s7 }
  0x95   : > { %v6156_v49 = vpop.permute.xlu1 %4078  ;;  %v6162_v14 = vpop.permute.xlu0 %4068 }
  0x97   : > { %4353 = vrot.lane.b32.xlu1 %v8234_v44, %s5271_s7 }
  0x98   : > { %4348 = vrot.lane.b32.xlu0 %v8235_v47, %s5271_s7 }
  0x99   : > { %v6167_v15 = vpop.permute.xlu1 %4083 }
  0x9a   : > { %v6171_v53 = vpop.permute.xlu0 %4073 }
  0x9b   : > { %4363 = vrot.lane.b32.xlu1 %v5996_v26, %s5272_s26 }
  0x9c   : > { %4358 = vrot.lane.b32.xlu0 %v5764_v21, %s5273_s30 }
  0x9d   : > { %v6175_v9 = vpop.permute.xlu1 %4093 }
  0x9e   : > { %v6179_v52 = vpop.permute.xlu0 %4088 }
  0x9f   : > { %4373 = vrot.lane.b32.xlu1 %v5812_v20, %s5273_s30 }
  0xa0   : > { %4368 = vrot.lane.b32.xlu0 %v8226_v54, %s5274_s6 }
  0xa1   : > { %v6185_v6 = vpop.permute.xlu1 %4103 }
  0xa3   : > { %4383 = vrot.lane.b32.xlu1 %v8229_v24, %s5274_s6  ;;  %v6189_v21 = vpop.permute.xlu0 %4098 }
  0xa4   : > { %4378 = vrot.lane.b32.xlu0 %v6011_v25, %s5272_s26 }
  0xa5   : > { %v6193_v20 = vpop.permute.xlu1 %4113 }
  0xa7   : > { %4393 = vrot.lane.b32.xlu1 %v6006_v28, %s5272_s26  ;;  %v6197_v26 = vpop.permute.xlu0 %4108 }
  0xa8   : > { %4388 = vrot.lane.b32.xlu0 %v5794_v1, %s5273_s30  ;;  %8236 = vst [vmem:[#allocation10_spill] sm:$0xff] %v6197_v26 }
  0xab   : > { %4403 = vrot.lane.b32.xlu1 %v5848_v59, %s5273_s30  ;;  %v6201_v24 = vpop.permute.xlu1 %4123 }
  0xac   : > { %8237 = vst [vmem:[#allocation16_spill] sm:$0xff] %v6201_v24  ;;  %4398 = vrot.lane.b32.xlu0 %v8228_v8, %s5274_s6  ;;  %v6205_v25 = vpop.permute.xlu0 %4118 }
  0xad   : > { %8238 = vst [vmem:[#allocation24_spill] sm:$0xff] %v6205_v25  ;;  %v8276_v25 = vld [vmem:[#allocation6_spill] sm:$0xff] }
  0xaf   : > { %4413 = vrot.lane.b32.xlu1 %v8231_v46, %s5274_s6  ;;  %v6209_v28 = vpop.permute.xlu1 %4133  ;;  %v8250_v46 = vld [vmem:[#allocation50_spill] sm:$0xff] }
  0xb0   : > { %8239 = vst [vmem:[#allocation13_spill] sm:$0xff] %v6209_v28  ;;  %4408 = vrot.lane.b32.xlu0 %v6023_v34, %s5272_s26 }
  0xb2   : > { %v6213_v1 = vpop.permute.xlu0 %4128 }
  0xb3   : > { %8240 = vst [vmem:[#allocation34_spill] sm:$0xff] %v6213_v1  ;;  %4423 = vrot.lane.b32.xlu1 %v6017_v33, %s5272_s26  ;;  %v6344_v1 = vld [vmem:[%s5362_s9 + $0xd4] sm:$0x1] }
  0xb4   : > { %4418 = vrot.lane.b32.xlu0 %v5830_v40, %s5273_s30  ;;  %8261 = vst [vmem:[#allocation105_spill] sm:$0xff] %v6344_v1 }
  0xb5   : > { %v6219_v59 = vpop.permute.xlu1 %4143 }
  0xb6   : > { %8241 = vst [vmem:[#allocation21_spill] sm:$0xff] %v6219_v59  ;;  %v6221_v8 = vpop.permute.xlu0 %4138 }
  0xb7   : > { %8242 = vst [vmem:[#allocation44_spill] sm:$0xff] %v6221_v8  ;;  %4433 = vrot.lane.b32.xlu1 %v5880_v16, %s5273_s30  ;;  %v8253_v8 = vld [vmem:[#allocation64_spill] sm:$0xff] }
  0xb8   : > { %4428 = vrot.lane.b32.xlu0 %v8230_v39, %s5274_s6 }
  0xb9   : > { %v6227_v54 = vpop.permute.xlu1 %4153 }
  0xba   : > { %v6229_v34 = vpop.permute.xlu0 %4148 }
  0xbb   : > { %4443 = vrot.lane.b32.xlu1 %v8233_v63, %s5274_s6 }
  0xbc   : > { %4438 = vrot.lane.b32.xlu0 %v6035_v58, %s5272_s26 }
  0xbd   : > { %v6235_v40 = vpop.permute.xlu1 %4163 }
  0xbe   : > { %v6237_v33 = vpop.permute.xlu0 %4158 }
  0xbf   : > { %4453 = vrot.lane.b32.xlu1 %v6029_v32, %s5272_s26 }
  0xc0   : > { %4448 = vrot.lane.b32.xlu0 %v5864_v43, %s5273_s30 }
  0xc1   : > { %v6243_v39 = vpop.permute.xlu1 %4173 }
  0xc2   : > { %v6245_v16 = vpop.permute.xlu0 %4168 }
  0xc3   : > { %4463 = vrot.lane.b32.xlu1 %v5912_v7, %s5273_s30 }
  0xc4   : > { %4458 = vrot.lane.b32.xlu0 %v8232_v35, %s5274_s6 }
  0xc5   : > { %v6251_v63 = vpop.permute.xlu1 %4183 }
  0xc6   : > { %8243 = vst [vmem:[#allocation30_spill] sm:$0xff] %v6251_v63  ;;  %v6253_v58 = vpop.permute.xlu0 %4178 }
  0xc7   : > { %4473 = vrot.lane.b32.xlu1 %v8235_v47, %s5274_s6 }
  0xc8   : > { %4468 = vrot.lane.b32.xlu0 %v6051_v38, %s5272_s26 }
  0xc9   : > { %v6259_v43 = vpop.permute.xlu1 %4193 }
  0xca   : > { %8244 = vst [vmem:[#allocation54_spill] sm:$0xff] %v6259_v43  ;;  %v6261_v32 = vpop.permute.xlu0 %4188 }
  0xcb   : > { %8245 = vst [vmem:[#allocation39_spill] sm:$0xff] %v6261_v32  ;;  %4483 = vrot.lane.b32.xlu1 %v6041_v18, %s5272_s26 }
  0xcc   : > { %4478 = vrot.lane.b32.xlu0 %v5896_v48, %s5273_s30 }
  0xcd   : > { %v6267_v35 = vpop.permute.xlu1 %4203 }
  0xce   : > { %8246 = vst [vmem:[#allocation96_spill] sm:$0xff] %v6267_v35  ;;  %v6269_v7 = vpop.permute.xlu0 %4198  ;;  %v275_v35 = vld [vmem:[%s5362_s9 + $0xcc] sm:$0xff]  }
  0xcf   : > { %8247 = vst [vmem:[#allocation97_spill] sm:$0xff] %v6269_v7  ;;  %4493 = vrot.lane.b32.xlu1 %v5944_v62, %s5273_s30  ;;  %v6357_v7 = vunpack.c.h.bf16 %v275_v35 }
  0xd0   : > { %4488 = vrot.lane.b32.xlu0 %v8234_v44, %s5274_s6 }
  0xd1   : > { %v6275_v38 = vpop.permute.xlu1 %4213  ;;  %8266 = vst [vmem:[#allocation109_spill] sm:$0xff] %v6357_v7 }
  0xd2   : > { %8248 = vst [vmem:[#allocation98_spill] sm:$0xff] %v6275_v38  ;;  %v6277_v47 = vpop.permute.xlu0 %4208 }
  0xd3   : > { %8249 = vst [vmem:[#allocation99_spill] sm:$0xff] %v6277_v47  ;;  %4503 = vrot.lane.b32.xlu1 %v8250_v46, %s5274_s6 }
  0xd4   : > { %4498 = vrot.lane.b32.xlu0 %v6071_v10, %s5272_s26 }
  0xd5   : > { %v6283_v48 = vpop.permute.xlu1 %4223 }
  0xd6   : > { %8251 = vst [vmem:[#allocation50_spill] sm:$0xff] %v6283_v48  ;;  %v6285_v18 = vpop.permute.xlu0 %4218 }
  0xd7   : > { %8252 = vst [vmem:[#allocation100_spill] sm:$0xff] %v6285_v18  ;;  %4513 = vrot.lane.b32.xlu1 %v5928_v11, %s5273_s30  ;;  %v8254_v18 = vld [vmem:[#allocation59_spill] sm:$0xff] }
  0xd8   : > { %4508 = vrot.lane.b32.xlu0 %v8250_v46, %s5271_s7 }
  0xd9   : > { %v6291_v62 = vpop.permute.xlu1 %4233 }
  0xda   : > { %v6293_v44 = vpop.permute.xlu0 %4228 }
  0xdb   : > { %4523 = vrot.lane.b32.xlu1 %v8253_v8, %s5274_s6 }
  0xdc   : > { %4518 = vrot.lane.b32.xlu0 %v6059_v56, %s5272_s26 }
  0xdd   : > { %v6299_v10 = vpop.permute.xlu1 %4243 }
  0xde   : > { %v6301_v48 = vpop.permute.xlu0 %4238 }
  0xdf   : > { %4533 = vrot.lane.b32.xlu1 %v5972_v45, %s5273_s30  ;;  %v274_v45 = vld [vmem:[%s5362_s9 + $0xc8] sm:$0x1] }
  0xe0   : > { %4528 = vrot.lane.b32.xlu0 %v8253_v8, %s5271_s7 }
  0xe1   : > { %v6307_v11 = vpop.permute.xlu1 %4253 }
  0xe2   : > { %v6309_v46 = vpop.permute.xlu0 %4248 }
  0xe3   : > { %4543 = vrot.lane.b32.xlu1 %v8254_v18, %s5274_s6 }
  0xe4   : > { %4538 = vrot.lane.b32.xlu0 %v6096_v5, %s5272_s26  ;;  %v328_v5 = vunpack.c.l.bf16 %v274_v45 }
  0xe5   : > { %v6315_v56 = vpop.permute.xlu1 %4263 }
  0xe6   : > { %8255 = vst [vmem:[#allocation64_spill] sm:$0xff] %v6315_v56  ;;  %v6317_v59 = vpop.permute.xlu0 %4258 }
  0xe7   : > { %4553 = vrot.lane.b32.xlu1 %v5960_v37, %s5273_s30  ;;  %v548_v37 = vrot.slane %v328_v5, 1 }
  0xe8   : > { %4548 = vrot.lane.b32.xlu0 %v8254_v18, %s5271_s7 }
  0xe9   : > { %v6324_v8 = vpop.permute.xlu1 %4273 }
  0xea   : > { %8256 = vst [vmem:[#allocation59_spill] sm:$0xff] %v6324_v8  ;;  %v6326_v38 = vpop.permute.xlu0 %4268 }
  0xeb   : > { %8257 = vst [vmem:[#allocation101_spill] sm:$0xff] %v6326_v38  ;;  %4563 = vrot.lane.b32.xlu1 %v5762_v55, %s5274_s6  ;;  %v8277_v38 = vld [vmem:[#allocation69_spill] sm:$0xff] }
  0xec   : > { %4558 = vrot.lane.b32.xlu0 %v6078_v0, %s5272_s26  ;;  %v8263_v0 = vrot.slane %v6061_v19, 1 }
  0xed   : > { %v6332_v28 = vpop.permute.xlu1 %4283 }
  0xee   : > { %8258 = vst [vmem:[#allocation102_spill] sm:$0xff] %v6332_v28  ;;  %v6334_v47 = vpop.permute.xlu0 %4278  ;;  %v6353_v28 = vsel %vm380_vm0, %v8263_v0, %v548_v37 }
  0xef   : > { %8259 = vst [vmem:[#allocation103_spill] sm:$0xff] %v6334_v47  ;;  %4573 = vrot.lane.b32.xlu1 %v5990_v57, %s5273_s30  ;;  %8264 = vst [vmem:[#allocation107_spill] sm:$0xff] %v6353_v28  ;;  %v585_v57 = vrot.slane %v328_v5, 2  ;;  %v6355_v47 = vunpack.c.l.bf16 %v275_v35  ;;  %v4602_v37 = vpack.i.bf16 %v6353_v28, %v6087_v17  ;;  %v8269_v5 = vrot.slane %v6061_v19, 2 }
  0xf0   : > { %4568 = vrot.lane.b32.xlu0 %v5762_v55, %s5271_s7  ;;  %v591_v55 = vrot.slane %v6357_v7, 1 }
  0xf1   : > { %v6340_v18 = vpop.permute.xlu1 %4293  ;;  %8265 = vst [vmem:[#allocation108_spill] sm:$0xff] %v6355_v47  ;;  %v6373_v35 = vsel %vm461_vm1, %v8269_v5, %v585_v57  ;;  %v590_v0 = vrot.slane %v6355_v47, 1 }
  0xf2   : > { %8260 = vst [vmem:[#allocation104_spill] sm:$0xff] %v6340_v18  ;;  %v6346_v45 = vpop.permute.xlu0 %4288  ;;  %8270 = vst [vmem:[#allocation112_spill] sm:$0xff] %v6373_v35  ;;  %v4612_v19 = vpack.i.bf16 %v6373_v35, %v6105_v2  ;;  %v4230_v35 = vunpack.i.l.bf16 %v6293_v44  ;;  %v8275_v2 = vld [vmem:[#allocation7_spill] sm:$0xff] }
  0xf3   : > { %8262 = vst [vmem:[#allocation106_spill] sm:$0xff] %v6346_v45  ;;  %4583 = vrot.lane.b32.xlu1 %v5744_v60, %s5274_s6  ;;  %v592_v57 = vsel %vm380_vm0, %v590_v0, %v591_v55 }
  0xf4   : > { %4578 = vrot.lane.b32.xlu0 %v6114_v61, %s5272_s26  ;;  %v8271_v61 = vunpack.c.l.bf16 %v6344_v1  ;;  %v4617_v1 = vpack.i.bf16 %v6357_v7, %v6355_v47  ;;  %v4231_v47 = vunpack.i.h.bf16 %v6293_v44  ;;  %v4076_v7 = vunpack.i.h.bf16 %v6171_v53  ;;  %v8278_v44 = vld [vmem:[#allocation70_spill] sm:$0xff] }
  0xf5   : > { %v6362_v18 = vpop.permute.xlu1 %4303  ;;  %v1538_v32 = vpack.c.bf16 %v8278_v44, %v8277_v38 }
  0xf6   : > { %8267 = vst [vmem:[#allocation110_spill] sm:$0xff] %v6362_v18  ;;  %v6364_v45 = vpop.permute.xlu0 %4298  ;;  %v593_v18 = vrot.slane %v8271_v61, 1 }
  0xf7   : > { %8268 = vst [vmem:[#allocation111_spill] sm:$0xff] %v6364_v45  ;;  %4593 = vrot.lane.b32.xlu1 %v5984_v29, %s5273_s30 }
  0xf8   : > { %4588 = vrot.lane.b32.xlu0 %v5744_v60, %s5271_s7  ;;  %v594_v5 = vsel %vm380_vm0, %v591_v55, %v593_v18  ;;  %v4080_v55 = vunpack.i.l.bf16 %v6156_v49 }
  0xf9   : > { %v6381_v45 = vpop.permute.xlu1 %4313  ;;  %v4622_v60 = vpack.i.bf16 %v594_v5, %v592_v57  ;;  %v4070_v57 = vunpack.i.l.bf16 %v6162_v14  ;;  %v4151_v5 = vunpack.i.h.bf16 %v6229_v34 }
  0xfa   : > { %v4309_v29 = vpop.permute.xlu0 %4308 }
  0xfb   : > { %4603 = vrot.lane.b32.xlu1 %v4602_v37, %s5274_s6  ;;  %v4311_v8 = vunpack.i.h.bf16 %v4309_v29  ;;  %v1305_v24 = vsel %vm1304_vm2, %v8276_v25, %v4070_v57 }
  0xfc   : > { %4598 = vrot.lane.b32.xlu0 %v6082_v30, %s5272_s26 }
  0xfd   : > { %v6390_v28 = vpop.permute.xlu1 %4323 }
  0xfe   : > { %v6392_v61 = vpop.permute.xlu0 %4318 }
  0xff   : > { %4613 = vrot.lane.b32.xlu1 %v4612_v19, %s5273_s30  ;;  %v4071_v19 = vunpack.i.h.bf16 %v6162_v14  ;;  %v6422_v14 = vsel %vm1304_vm2, %v5369_v3, %v4080_v55  ;;  %v4155_v3 = vunpack.i.l.bf16 %v6227_v54 }
 0x100   : > { %4608 = vrot.lane.b32.xlu0 %v4602_v37, %s5271_s7 }
 0x101   : > { %v6396_v17 = vpop.permute.xlu1 %4333 }
 0x102   : > { %v6400_v0 = vpop.permute.xlu0 %4328 }
 0x103   : > { %4623 = vrot.lane.b32.xlu1 %v4622_v60, %s5274_s6  ;;  %v4150_v60 = vunpack.i.l.bf16 %v6229_v34  ;;  %v4310_v34 = vunpack.i.l.bf16 %v4309_v29 }
 0x104   : > { %4618 = vrot.lane.b32.xlu0 %v4617_v1, %s5272_s26 }
 0x105   : > { %v6404_v30 = vpop.permute.xlu1 %4343  ;;  %v1338_v55 = vsel %vm1337_vm3, %v1305_v24, %v4150_v60  ;;  %v4235_v24 = vunpack.i.l.bf16 %v6291_v62  ;;  %v4316_v60 = vunpack.i.h.bf16 %v6381_v45 }
 0x106   : > { %8272 = vst [vmem:[#allocation113_spill] sm:$0xff] %v6404_v30  ;;  %v6406_v18 = vpop.permute.xlu0 %4338  ;;  %v4156_v30 = vunpack.i.h.bf16 %v6227_v54  ;;  %v4236_v54 = vunpack.i.h.bf16 %v6291_v62 }
 0x109   : > { %v6410_v37 = vpop.permute.xlu1 %4353 }
 0x10a   : > { %8273 = vst [vmem:[#allocation114_spill] sm:$0xff] %v6410_v37  ;;  %v6415_v1 = vpop.permute.xlu0 %4348  ;;  %v1306_v37 = vsel %vm1304_vm2, %v8275_v2, %v4071_v19  ;;  %v1371_v19 = vsel %vm1370_vm4, %v1338_v55, %v4230_v35 }
 0x10b   : > { %8274 = vst [vmem:[#allocation115_spill] sm:$0xff] %v6415_v1  ;;  %v4075_v1 = vunpack.i.l.bf16 %v6171_v53  ;;  %v1339_v2 = vsel %vm1337_vm3, %v1306_v37, %v4151_v5  ;;  %v1404_v53 = vsel %vm1403_vm5, %v1371_v19, %v4310_v34 }
 0x10c   : > { %v1372_v25 = vsel %vm1370_vm4, %v1339_v2, %v4231_v47  ;;  %v1308_v47 = vsel %vm1304_vm2, %v5428_v36, %v4076_v7 }
 0x10d   : > { %v4364_v43 = vpop.permute.xlu1 %4363  ;;  %v1405_v26 = vsel %vm1403_vm5, %v1372_v25, %v4311_v8  ;;  %v1307_v35 = vsel %vm1304_vm2, %v5411_v27, %v4075_v1  ;;  %v4315_v8 = vunpack.i.l.bf16 %v6381_v45  ;;  %v1341_v55 = vsel %vm1337_vm3, %v1308_v47, %v4156_v30 }
 0x10e   : > { %v4359_v29 = vpop.permute.xlu0 %4358  ;;  %v4366_v38 = vunpack.i.h.bf16 %v4364_v43  ;;  %v4365_v44 = vunpack.i.l.bf16 %v4364_v43  ;;  %v1340_v34 = vsel %vm1337_vm3, %v1307_v35, %v4155_v3  ;;  %v1374_v7 = vsel %vm1370_vm4, %v1341_v55, %v4236_v54 }
 0x10f   : > { %v4361_v57 = vunpack.i.h.bf16 %v4359_v29  ;;  %v4360_v56 = vunpack.i.l.bf16 %v4359_v29  ;;  %v1373_v27 = vsel %vm1370_vm4, %v1340_v34, %v4235_v24  ;;  %v4160_v3 = vunpack.i.l.bf16 %v6237_v33 }
 0x110   : > { %v1406_v30 = vsel %vm1403_vm5, %v1373_v27, %v4315_v8  ;;  %v1407_v25 = vsel %vm1403_vm5, %v1374_v7, %v4316_v60  ;;  %v4161_v24 = vunpack.i.h.bf16 %v6237_v33  ;;  %v4240_v54 = vunpack.i.l.bf16 %v6301_v48  ;;  %v8280_v7 = vld [vmem:[#allocation73_spill] sm:$0xff] }
 0x111   : > { %v4374_v63 = vpop.permute.xlu1 %4373  ;;  %v1437_v37 = vsel %vm1436_vm6, %v1404_v53, %v4360_v56  ;;  %v1438_v5 = vsel %vm1436_vm6, %v1405_v26, %v4361_v57  ;;  %v4241_v8 = vunpack.i.h.bf16 %v6301_v48  ;;  %v4320_v60 = vunpack.i.l.bf16 %v6392_v61 }
 0x112   : > { %v4369_v43 = vpop.permute.xlu0 %4368  ;;  %v4376_v56 = vunpack.i.h.bf16 %v4374_v63  ;;  %v4375_v29 = vunpack.i.l.bf16 %v4374_v63  ;;  %v1470_v19 = vsel %vm1469_vm7, %v1437_v37, %v4365_v44  ;;  %v1471_v36 = vsel %vm1469_vm7, %v1438_v5, %v4366_v38 }
 0x113   : > { %v4371_v62 = vunpack.i.h.bf16 %v4369_v43  ;;  %v4370_v2 = vunpack.i.l.bf16 %v4369_v43  ;;  %v8279_v33 = vunpack.i.h.bf16 %v6156_v49 }
 0x114   : > { %v1439_v5 = vsel %vm1436_vm6, %v1406_v30, %v4375_v29  ;;  %v1440_v47 = vsel %vm1436_vm6, %v1407_v25, %v4376_v56 }
 0x115   : > { %v4384_v26 = vpop.permute.xlu1 %4383  ;;  %v1503_v45 = vsel %vm1502_vm8, %v1470_v19, %v4370_v2  ;;  %v1504_v1 = vsel %vm1502_vm8, %v1471_v36, %v4371_v62  ;;  %v1310_v55 = vsel %vm1304_vm2, %v5371_v4, %v8279_v33  ;;  %v1342_v62 = vsel %vm1337_vm3, %v6422_v14, %v4160_v3 }
 0x116   : > { %v4379_v63 = vpop.permute.xlu0 %4378  ;;  %v1535_v57 = vpack.c.bf16 %v1504_v1, %v1503_v45  ;;  %v4386_v53 = vunpack.i.h.bf16 %v4384_v26  ;;  %v4385_v44 = vunpack.i.l.bf16 %v4384_v26  ;;  %v4321_v2 = vunpack.i.h.bf16 %v6392_v61 }
 0x117   : > { %v4381_v37 = vunpack.i.h.bf16 %v4379_v63  ;;  %v4380_v38 = vunpack.i.l.bf16 %v4379_v63  ;;  %v4086_v19 = vunpack.i.h.bf16 %v6167_v15  ;;  %v1343_v36 = vsel %vm1337_vm3, %v1310_v55, %v4161_v24 }
 0x118   : > { %1727 = vmatmul.mubr.bf16.vlgmr.msra.gmra.mxu0 %v1535_v57  ;;  %v1375_v49 = vsel %vm1370_vm4, %v1342_v62, %v4240_v54  ;;  %v4085_v4 = vunpack.i.l.bf16 %v6167_v15  ;;  %v1376_v14 = vsel %vm1370_vm4, %v1343_v36, %v4241_v8  ;;  %v1540_v45 = vpack.c.bf16 %v8280_v7, %v5815_v23 }
 0x119   : > { %v4394_v35 = vpop.permute.xlu1 %4393  ;;  %3925 = vmatprep.mubr.msk.bf16.mxu0 %vm1304_vm2, %v1538_v32  ;;  %v1472_v43 = vsel %vm1469_vm7, %v1439_v5, %v4380_v38  ;;  %v1473_v34 = vsel %vm1469_vm7, %v1440_v47, %v4381_v37  ;;  %v1408_v61 = vsel %vm1403_vm5, %v1375_v49, %v4320_v60  ;;  %v1409_v1 = vsel %vm1403_vm5, %v1376_v14, %v4321_v2 }
 0x11a   : > { %v4389_v56 = vpop.permute.xlu0 %4388  ;;  %v1505_v26 = vsel %vm1502_vm8, %v1472_v43, %v4385_v44  ;;  %v1506_v32 = vsel %vm1502_vm8, %v1473_v34, %v4386_v53  ;;  %v4396_v3 = vunpack.i.h.bf16 %v4394_v35  ;;  %v4395_v30 = vunpack.i.l.bf16 %v4394_v35 }
 0x11b   : > { %v4391_v48 = vunpack.i.h.bf16 %v4389_v56  ;;  %v4390_v29 = vunpack.i.l.bf16 %v4389_v56  ;;  %v1537_v63 = vpack.c.bf16 %v1506_v32, %v1505_v26  ;;  %v1312_v15 = vsel %vm1304_vm2, %v5388_v13, %v4086_v19  ;;  %v8281_v32 = vld [vmem:[#allocation71_spill] sm:$0xff]  ;;  %v8282_v19 = vld [vmem:[#allocation72_spill] sm:$0xff] }
 0x11c   : > { %v4166_v38 = vunpack.i.h.bf16 %v6235_v40  ;;  %v4165_v24 = vunpack.i.l.bf16 %v6235_v40  ;;  %v1311_v54 = vsel %vm1304_vm2, %v5386_v12, %v4085_v4  ;;  %v4091_v5 = vunpack.i.h.bf16 %v6179_v52 }
 0x11d   : > { %v4404_v27 = vpop.permute.xlu1 %4403  ;;  %v1441_v57 = vsel %vm1436_vm6, %v1408_v61, %v4390_v29  ;;  %v1442_v53 = vsel %vm1436_vm6, %v1409_v1, %v4391_v48  ;;  %v4246_v47 = vunpack.i.h.bf16 %v6299_v10  ;;  %v4245_v35 = vunpack.i.l.bf16 %v6299_v10 }
 0x11e   : > { %v4399_v25 = vpop.permute.xlu0 %4398  ;;  %v4326_v8 = vunpack.i.h.bf16 %v6390_v28  ;;  %v4325_v13 = vunpack.i.l.bf16 %v6390_v28  ;;  %v1474_v40 = vsel %vm1469_vm7, %v1441_v57, %v4395_v30  ;;  %v1475_v43 = vsel %vm1469_vm7, %v1442_v53, %v4396_v3 }
 0x11f   : > { %v4401_v44 = vunpack.i.h.bf16 %v4399_v25  ;;  %v4400_v37 = vunpack.i.l.bf16 %v4399_v25  ;;  %v4406_v34 = vunpack.i.h.bf16 %v4404_v27  ;;  %v4405_v33 = vunpack.i.l.bf16 %v4404_v27 }
 0x120   : > { %1735 = vmatmul.mubr.bf16.gmra.mxu0 %v1537_v63  ;;  %v1345_v62 = vsel %vm1337_vm3, %v1312_v15, %v4166_v38  ;;  %v1344_v10 = vsel %vm1337_vm3, %v1311_v54, %v4165_v24  ;;  %v4090_v28 = vunpack.i.l.bf16 %v6179_v52  ;;  %v1542_v36 = vpack.c.bf16 %v8282_v19, %v8281_v32 }
 0x121   : > { %v4414_v23 = vpop.permute.xlu1 %4413  ;;  %3926 = vmatprep.mubr.msk.bf16.mxu0 %vm1304_vm2, %v1540_v45  ;;  %v1507_v12 = vsel %vm1502_vm8, %v1474_v40, %v4400_v37  ;;  %v1508_v55 = vsel %vm1502_vm8, %v1475_v43, %v4401_v44  ;;  %v1377_v29 = vsel %vm1370_vm4, %v1344_v10, %v4245_v35  ;;  %v1378_v26 = vsel %vm1370_vm4, %v1345_v62, %v4246_v47  ;;  %v8284_v40 = vld [vmem:[#allocation77_spill] sm:$0xff] }
 0x122   : > { %v4409_v60 = vpop.permute.xlu0 %4408  ;;  %v4170_v49 = vunpack.i.l.bf16 %v6245_v16  ;;  %v1410_v27 = vsel %vm1403_vm5, %v1377_v29, %v4325_v13  ;;  %v1411_v4 = vsel %vm1403_vm5, %v1378_v26, %v4326_v8  ;;  %v1539_v61 = vpack.c.bf16 %v1508_v55, %v1507_v12 }
 0x123   : > { %v4411_v2 = vunpack.i.h.bf16 %v4409_v60  ;;  %v4410_v56 = vunpack.i.l.bf16 %v4409_v60  ;;  %v1443_v7 = vsel %vm1436_vm6, %v1410_v27, %v4405_v33  ;;  %v1444_v45 = vsel %vm1436_vm6, %v1411_v4, %v4406_v34  ;;  %v8283_v60 = vld [vmem:[#allocation76_spill] sm:$0xff] }
 0x124   : > { %v4416_v52 = vunpack.i.h.bf16 %v4414_v23  ;;  %v4415_v1 = vunpack.i.l.bf16 %v4414_v23  ;;  %v4171_v3 = vunpack.i.h.bf16 %v6245_v16  ;;  %v4250_v30 = vunpack.i.l.bf16 %v6309_v46 }
 0x125   : > { %v6508_v48 = vpop.permute.xlu1 %4423  ;;  %v1476_v63 = vsel %vm1469_vm7, %v1443_v7, %v4410_v56  ;;  %v1477_v57 = vsel %vm1469_vm7, %v1444_v45, %v4411_v2  ;;  %v1313_v53 = vsel %vm1304_vm2, %v5456_v50, %v4090_v28  ;;  %v4251_v44 = vunpack.i.h.bf16 %v6309_v46 }
 0x126   : > { %v4419_v14 = vpop.permute.xlu0 %4418  ;;  %v4330_v37 = vunpack.i.l.bf16 %v6400_v0  ;;  %v1314_v16 = vsel %vm1304_vm2, %v5458_v51, %v4091_v5  ;;  %v1346_v15 = vsel %vm1337_vm3, %v1313_v53, %v4170_v49  ;;  %v4331_v38 = vunpack.i.h.bf16 %v6400_v0 }
 0x127   : > { %v4421_v23 = vunpack.i.h.bf16 %v4419_v14  ;;  %v4420_v54 = vunpack.i.l.bf16 %v4419_v14  ;;  %v1509_v47 = vsel %vm1502_vm8, %v1476_v63, %v4415_v1  ;;  %v1510_v50 = vsel %vm1502_vm8, %v1477_v57, %v4416_v52 }
 0x128   : > { %1743 = vmatmul.mubr.bf16.gmra.mxu0 %v1539_v61  ;;  %v4096_v46 = vunpack.i.h.bf16 %v6175_v9  ;;  %v4095_v35 = vunpack.i.l.bf16 %v6175_v9  ;;  %v1347_v8 = vsel %vm1337_vm3, %v1314_v16, %v4171_v3  ;;  %v1379_v13 = vsel %vm1370_vm4, %v1346_v15, %v4250_v30 }
 0x129   : > { %v6522_v25 = vpop.permute.xlu1 %4433  ;;  %3927 = vmatprep.mubr.msk.bf16.mxu0 %vm1304_vm2, %v1542_v36  ;;  %v1380_v5 = vsel %vm1370_vm4, %v1347_v8, %v4251_v44  ;;  %v1412_v0 = vsel %vm1403_vm5, %v1379_v13, %v4330_v37  ;;  %v1544_v43 = vpack.c.bf16 %v8284_v40, %v8283_v60  ;;  %v4426_v33 = vunpack.i.h.bf16 %v6508_v48  ;;  %v8285_v44 = vld [vmem:[#allocation74_spill] sm:$0xff] }
 0x12a   : > { %v4429_v24 = vpop.permute.xlu0 %4428  ;;  %v1413_v34 = vsel %vm1403_vm5, %v1380_v5, %v4331_v38  ;;  %v4425_v12 = vunpack.i.l.bf16 %v6508_v48  ;;  %v1541_v55 = vpack.c.bf16 %v1510_v50, %v1509_v47  ;;  %v1445_v62 = vsel %vm1436_vm6, %v1412_v0, %v4420_v54 }
 0x12b   : > { %v1446_v10 = vsel %vm1436_vm6, %v1413_v34, %v4421_v23  ;;  %v4431_v2 = vunpack.i.h.bf16 %v4429_v24  ;;  %v4430_v56 = vunpack.i.l.bf16 %v4429_v24  ;;  %v1316_v28 = vsel %vm1304_vm2, %v5440_v42, %v4096_v46 }
 0x12c   : > { %v1315_v29 = vsel %vm1304_vm2, %v5438_v41, %v4095_v35  ;;  %v4176_v26 = vunpack.i.h.bf16 %v6243_v39  ;;  %v4175_v32 = vunpack.i.l.bf16 %v6243_v39  ;;  %v4106_v19 = vunpack.i.h.bf16 %v6185_v6 }
 0x12d   : > { %v6541_v51 = vpop.permute.xlu1 %4443  ;;  %v4101_v36 = vunpack.i.h.bf16 %v6189_v21  ;;  %v4256_v49 = vunpack.i.h.bf16 %v6307_v11  ;;  %v4255_v27 = vunpack.i.l.bf16 %v6307_v11  ;;  %v4336_v42 = vunpack.i.h.bf16 %v6396_v17 }
 0x12e   : > { %v4439_v9 = vpop.permute.xlu0 %4438  ;;  %v4335_v41 = vunpack.i.l.bf16 %v6396_v17  ;;  %v1478_v39 = vsel %vm1469_vm7, %v1445_v62, %v4425_v12  ;;  %v1479_v14 = vsel %vm1469_vm7, %v1446_v10, %v4426_v33  ;;  %v4436_v61 = vunpack.i.h.bf16 %v6522_v25 }
 0x12f   : > { %v4435_v7 = vunpack.i.l.bf16 %v6522_v25  ;;  %v1511_v45 = vsel %vm1502_vm8, %v1478_v39, %v4430_v56  ;;  %v1512_v52 = vsel %vm1502_vm8, %v1479_v14, %v4431_v2  ;;  %v1349_v11 = vsel %vm1337_vm3, %v1316_v28, %v4176_v26  ;;  %v8286_v25 = vld [vmem:[#allocation75_spill] sm:$0xff]  ;;  %v8289_v26 = vld [vmem:[#allocation81_spill] sm:$0xff] }
 0x130   : > { %1751 = vmatmul.mubr.bf16.gmra.mxu0 %v1541_v55  ;;  %v1348_v1 = vsel %vm1337_vm3, %v1315_v29, %v4175_v32  ;;  %v4441_v3 = vunpack.i.h.bf16 %v4439_v9  ;;  %v4440_v30 = vunpack.i.l.bf16 %v4439_v9  ;;  %v4100_v63 = vunpack.i.l.bf16 %v6189_v21  ;;  %v8288_v29 = vld [vmem:[#allocation80_spill] sm:$0xff]  ;;  %v8290_v14 = vld [vmem:[#allocation19_spill] sm:$0xff] }
 0x131   : > { %v6558_v48 = vpop.permute.xlu1 %4453  ;;  %3928 = vmatprep.mubr.msk.bf16.mxu0 %vm1304_vm2, %v1544_v43  ;;  %v1381_v57 = vsel %vm1370_vm4, %v1348_v1, %v4255_v27  ;;  %v1382_v53 = vsel %vm1370_vm4, %v1349_v11, %v4256_v49  ;;  %v1546_v37 = vpack.c.bf16 %v8286_v25, %v8285_v44  ;;  %v4180_v16 = vunpack.i.l.bf16 %v6253_v58  ;;  %v8292_v1 = vld [vmem:[#allocation27_spill] sm:$0xff] }
 0x132   : > { %v4449_v4 = vpop.permute.xlu0 %4448  ;;  %v1414_v15 = vsel %vm1403_vm5, %v1381_v57, %v4335_v41  ;;  %v1415_v38 = vsel %vm1403_vm5, %v1382_v53, %v4336_v42  ;;  %v1543_v23 = vpack.c.bf16 %v1512_v52, %v1511_v45  ;;  %v4446_v47 = vunpack.i.h.bf16 %v6541_v51  ;;  %v8291_v45 = vld [vmem:[#allocation30_spill] sm:$0xff]  ;;  %v8294_v57 = vld [vmem:[#allocation64_spill] sm:$0xff] }
 0x133   : > { %v1447_v54 = vsel %vm1436_vm6, %v1414_v15, %v4435_v7  ;;  %v1448_v21 = vsel %vm1436_vm6, %v1415_v38, %v4436_v61  ;;  %v4445_v50 = vunpack.i.l.bf16 %v6541_v51  ;;  %v4181_v46 = vunpack.i.h.bf16 %v6253_v58 }
 0x134   : > { %v4260_v35 = vunpack.i.l.bf16 %v6317_v59  ;;  %v1480_v13 = vsel %vm1469_vm7, %v1447_v54, %v4440_v30  ;;  %v1481_v5 = vsel %vm1469_vm7, %v1448_v21, %v4441_v3  ;;  %v1317_v0 = vsel %vm1304_vm2, %v5512_v22, %v4100_v63  ;;  %v8293_v30 = vld [vmem:[#allocation10_spill] sm:$0xff] }
 0x135   : > { %v6575_v17 = vpop.permute.xlu1 %4463  ;;  %v4261_v60 = vunpack.i.h.bf16 %v6317_v59  ;;  %v4340_v40 = vunpack.i.l.bf16 %v6406_v18  ;;  %v1318_v58 = vsel %vm1304_vm2, %v5519_v31, %v4101_v36  ;;  %v1350_v51 = vsel %vm1337_vm3, %v1317_v0, %v4180_v16  ;;  %v8287_v59 = vld [vmem:[#allocation20_spill] sm:$0xff] }
 0x136   : > { %v6585_v24 = vpop.permute.xlu0 %4458  ;;  %v4341_v43 = vunpack.i.h.bf16 %v6406_v18  ;;  %v4451_v33 = vunpack.i.h.bf16 %v4449_v4  ;;  %v4450_v12 = vunpack.i.l.bf16 %v4449_v4  ;;  %v1513_v9 = vsel %vm1502_vm8, %v1480_v13, %v4445_v50 }
 0x137   : > { %v1514_v22 = vsel %vm1502_vm8, %v1481_v5, %v4446_v47  ;;  %v1320_v55 = vsel %vm1304_vm2, %v8287_v59, %v4106_v19  ;;  %v4105_v62 = vunpack.i.l.bf16 %v6185_v6  ;;  %v1351_v10 = vsel %vm1337_vm3, %v1318_v58, %v4181_v46 }
 0x138   : > { %1759 = vmatmul.mubr.bf16.gmra.mxu0 %v1543_v23  ;;  %v1383_v31 = vsel %vm1370_vm4, %v1350_v51, %v4260_v35  ;;  %v4116_v18 = vunpack.i.h.bf16 %v6193_v20  ;;  %v1384_v56 = vsel %vm1370_vm4, %v1351_v10, %v4261_v60  ;;  %v1548_v32 = vpack.c.bf16 %v8289_v26, %v8288_v29  ;;  %v8296_v60 = vld [vmem:[#allocation78_spill] sm:$0xff]  ;;  %v8298_v51 = vld [vmem:[#allocation39_spill] sm:$0xff] }
 0x139   : > { %v6593_v8 = vpop.permute.xlu1 %4473  ;;  %3929 = vmatprep.mubr.msk.bf16.mxu0 %vm1304_vm2, %v1546_v37  ;;  %v1416_v28 = vsel %vm1403_vm5, %v1383_v31, %v4340_v40  ;;  %v1417_v36 = vsel %vm1403_vm5, %v1384_v56, %v4341_v43  ;;  %v4456_v19 = vunpack.i.h.bf16 %v6558_v48  ;;  %v4455_v6 = vunpack.i.l.bf16 %v6558_v48  ;;  %v8297_v40 = vld [vmem:[#allocation79_spill] sm:$0xff]  ;;  %v8299_v31 = vld [vmem:[#allocation101_spill] sm:$0xff]  ;;  %v8300_v26 = vld [vmem:[#allocation26_spill] sm:$0xff] }
 0x13a   : > { %v6606_v34 = vpop.permute.xlu0 %4468  ;;  %v1545_v27 = vpack.c.bf16 %v1514_v22, %v1513_v9  ;;  %v1449_v42 = vsel %vm1436_vm6, %v1416_v28, %v4450_v12  ;;  %v1450_v41 = vsel %vm1436_vm6, %v1417_v36, %v4451_v33  ;;  %v4461_v4 = vunpack.i.h.bf16 %v6585_v24  ;;  %v8301_v36 = vld [vmem:[#allocation29_spill] sm:$0xff] }
 0x13b   : > { %v4460_v39 = vunpack.i.l.bf16 %v6585_v24  ;;  %v1319_v61 = vsel %vm1304_vm2, %v8290_v14, %v4105_v62  ;;  %v4115_v7 = vunpack.i.l.bf16 %v6193_v20  ;;  %v4186_v52 = vunpack.i.h.bf16 %v8291_v45  ;;  %v8295_v20 = vld [vmem:[#allocation113_spill] sm:$0xff] }
 0x13c   : > { %v4185_v48 = vunpack.i.l.bf16 %v8291_v45  ;;  %v6640_v3 = vsel %vm1304_vm2, %v8292_v1, %v4116_v18  ;;  %v4111_v63 = vunpack.i.h.bf16 %v8293_v30  ;;  %v4266_v53 = vunpack.i.h.bf16 %v8294_v57 }
 0x13d   : > { %v6615_v2 = vpop.permute.xlu1 %4483  ;;  %v4265_v44 = vunpack.i.l.bf16 %v8294_v57  ;;  %v4346_v25 = vunpack.i.h.bf16 %v8295_v20  ;;  %v4345_v37 = vunpack.i.l.bf16 %v8295_v20  ;;  %v1482_v15 = vsel %vm1469_vm7, %v1449_v42, %v4455_v6  ;;  %v8303_v42 = vld [vmem:[#allocation33_spill] sm:$0xff] }
 0x13e   : > { %v6625_v49 = vpop.permute.xlu0 %4478  ;;  %v1483_v38 = vsel %vm1469_vm7, %v1450_v41, %v4456_v19  ;;  %v4466_v24 = vunpack.i.h.bf16 %v6575_v17  ;;  %v4465_v23 = vunpack.i.l.bf16 %v6575_v17  ;;  %v1515_v54 = vsel %vm1502_vm8, %v1482_v15, %v4460_v39 }
 0x13f   : > { %v1516_v21 = vsel %vm1502_vm8, %v1483_v38, %v4461_v4  ;;  %v1353_v47 = vsel %vm1337_vm3, %v1320_v55, %v4186_v52  ;;  %v1352_v50 = vsel %vm1337_vm3, %v1319_v61, %v4185_v48  ;;  %v4471_v46 = vunpack.i.h.bf16 %v6606_v34  ;;  %v8304_v4 = vld [vmem:[#allocation16_spill] sm:$0xff] }
 0x140   : > { %1767 = vmatmul.mubr.bf16.gmra.mxu0 %v1545_v27  ;;  %v4470_v35 = vunpack.i.l.bf16 %v6606_v34  ;;  %v4110_v5 = vunpack.i.l.bf16 %v8293_v30  ;;  %v1385_v0 = vsel %vm1370_vm4, %v1352_v50, %v4265_v44  ;;  %v1386_v17 = vsel %vm1370_vm4, %v1353_v47, %v4266_v53  ;;  %v8305_v30 = vld [vmem:[#allocation24_spill] sm:$0xff]  ;;  %v8306_v53 = vld [vmem:[#allocation54_spill] sm:$0xff] }
 0x141   : > { %v6636_v11 = vpop.permute.xlu1 %4493  ;;  %3930 = vmatprep.mubr.msk.bf16.mxu0 %vm1304_vm2, %v1548_v32  ;;  %v1550_v58 = vpack.c.bf16 %v8297_v40, %v8296_v60  ;;  %v4190_v43 = vunpack.i.l.bf16 %v8298_v51  ;;  %v1418_v33 = vsel %vm1403_vm5, %v1385_v0, %v4345_v37  ;;  %v1419_v12 = vsel %vm1403_vm5, %v1386_v17, %v4346_v25  ;;  %v8307_v38 = vld [vmem:[#allocation84_spill] sm:$0xff]  ;;  %v8309_v40 = vld [vmem:[#allocation43_spill] sm:$0xff] }
 0x142   : > { %v6648_v16 = vpop.permute.xlu0 %4488  ;;  %v1547_v34 = vpack.c.bf16 %v1516_v21, %v1515_v54  ;;  %v1451_v22 = vsel %vm1436_vm6, %v1418_v33, %v4465_v23  ;;  %v1452_v59 = vsel %vm1436_vm6, %v1419_v12, %v4466_v24  ;;  %v4476_v55 = vunpack.i.h.bf16 %v6593_v8  ;;  %v8308_v24 = vld [vmem:[#allocation85_spill] sm:$0xff] }
 0x143   : > { %v4475_v62 = vunpack.i.l.bf16 %v6593_v8  ;;  %v4191_v10 = vunpack.i.h.bf16 %v8298_v51  ;;  %v4270_v18 = vunpack.i.l.bf16 %v8299_v31  ;;  %v1484_v28 = vsel %vm1469_vm7, %v1451_v22, %v4470_v35  ;;  %v8302_v8 = vld [vmem:[#allocation115_spill] sm:$0xff] }
 0x144   : > { %v1485_v29 = vsel %vm1469_vm7, %v1452_v59, %v4471_v46  ;;  %v1323_v32 = vsel %vm1304_vm2, %v8300_v26, %v4115_v7  ;;  %v1321_v19 = vsel %vm1304_vm2, %v8301_v36, %v4110_v5  ;;  %v4271_v6 = vunpack.i.h.bf16 %v8299_v31 }
 0x145   : > { %v6660_v13 = vpop.permute.xlu1 %4503  ;;  %v4350_v27 = vunpack.i.l.bf16 %v8302_v8  ;;  %v1322_v41 = vsel %vm1304_vm2, %v8303_v42, %v4111_v63  ;;  %v4126_v39 = vunpack.i.h.bf16 %v8304_v4  ;;  %v1354_v14 = vsel %vm1337_vm3, %v1321_v19, %v4190_v43  ;;  %v8310_v43 = vld [vmem:[#allocation59_spill] sm:$0xff] }
 0x146   : > { %v6670_v9 = vpop.permute.xlu0 %4498  ;;  %v4351_v61 = vunpack.i.h.bf16 %v8302_v8  ;;  %v4481_v7 = vunpack.i.h.bf16 %v6625_v49  ;;  %v4480_v52 = vunpack.i.l.bf16 %v6625_v49  ;;  %v1517_v48 = vsel %vm1502_vm8, %v1484_v28, %v4475_v62  ;;  %v8312_v28 = vld [vmem:[#allocation97_spill] sm:$0xff] }
 0x147   : > { %v1518_v1 = vsel %vm1502_vm8, %v1485_v29, %v4476_v55  ;;  %v4121_v57 = vunpack.i.h.bf16 %v8305_v30  ;;  %v4196_v63 = vunpack.i.h.bf16 %v8306_v53  ;;  %v1355_v44 = vsel %vm1337_vm3, %v1322_v41, %v4191_v10  ;;  %v8313_v41 = vld [vmem:[#allocation103_spill] sm:$0xff] }
 0x148   : > { %1775 = vmatmul.mubr.bf16.gmra.mxu0 %v1547_v34  ;;  %v1387_v20 = vsel %vm1370_vm4, %v1354_v14, %v4270_v18  ;;  %v4195_v37 = vunpack.i.l.bf16 %v8306_v53  ;;  %v1388_v15 = vsel %vm1370_vm4, %v1355_v44, %v4271_v6  ;;  %v1552_v23 = vpack.c.bf16 %v8308_v24, %v8307_v38 }
 0x149   : > { %v6678_v56 = vpop.permute.xlu1 %4513  ;;  %3931 = vmatprep.mubr.msk.bf16.mxu0 %vm1304_vm2, %v1550_v58  ;;  %v1420_v49 = vsel %vm1403_vm5, %v1387_v20, %v4350_v27  ;;  %v1421_v54 = vsel %vm1403_vm5, %v1388_v15, %v4351_v61  ;;  %v4486_v21 = vunpack.i.h.bf16 %v6615_v2  ;;  %v4485_v47 = vunpack.i.l.bf16 %v6615_v2  ;;  %v8314_v61 = vld [vmem:[#allocation82_spill] sm:$0xff] }
 0x14a   : > { %v6694_v45 = vpop.permute.xlu0 %4508  ;;  %v1549_v46 = vpack.c.bf16 %v1518_v1, %v1517_v48  ;;  %v1453_v35 = vsel %vm1436_vm6, %v1420_v49, %v4480_v52  ;;  %v1454_v5 = vsel %vm1436_vm6, %v1421_v54, %v4481_v7  ;;  %v4491_v0 = vunpack.i.h.bf16 %v6648_v16  ;;  %v8315_v7 = vld [vmem:[#allocation83_spill] sm:$0xff] }
 0x14b   : > { %v4490_v17 = vunpack.i.l.bf16 %v6648_v16  ;;  %v4125_v60 = vunpack.i.l.bf16 %v8304_v4  ;;  %v1326_v58 = vsel %vm1304_vm2, %v8309_v40, %v4121_v57  ;;  %v4120_v51 = vunpack.i.l.bf16 %v8305_v30  ;;  %v8311_v16 = vld [vmem:[#allocation114_spill] sm:$0xff] }
 0x14c   : > { %v4275_v2 = vunpack.i.l.bf16 %v8310_v43  ;;  %v1357_v12 = vsel %vm1337_vm3, %v6640_v3, %v4196_v63  ;;  %v1356_v34 = vsel %vm1337_vm3, %v1323_v32, %v4195_v37  ;;  %v4276_v22 = vunpack.i.h.bf16 %v8310_v43  ;;  %v8316_v37 = vld [vmem:[#allocation40_spill] sm:$0xff] }
 0x14d   : > { %v6704_v25 = vpop.permute.xlu1 %4523  ;;  %v4355_v59 = vunpack.i.l.bf16 %v8311_v16  ;;  %v4356_v55 = vunpack.i.h.bf16 %v8311_v16  ;;  %v4495_v62 = vunpack.i.l.bf16 %v6636_v11  ;;  %v1486_v31 = vsel %vm1469_vm7, %v1453_v35, %v4485_v47 }
 0x14e   : > { %v6714_v50 = vpop.permute.xlu0 %4518  ;;  %v1487_v18 = vsel %vm1469_vm7, %v1454_v5, %v4486_v21  ;;  %v4201_v3 = vunpack.i.h.bf16 %v8312_v28  ;;  %v4496_v29 = vunpack.i.h.bf16 %v6636_v11  ;;  %v1519_v26 = vsel %vm1502_vm8, %v1486_v31, %v4490_v17  ;;  %v8318_v21 = vld [vmem:[#allocation36_spill] sm:$0xff] }
 0x14f   : > { %v1520_v32 = vsel %vm1502_vm8, %v1487_v18, %v4491_v0  ;;  %v4200_v36 = vunpack.i.l.bf16 %v8312_v28  ;;  %v1389_v19 = vsel %vm1370_vm4, %v1356_v34, %v4275_v2  ;;  %v4501_v6 = vunpack.i.h.bf16 %v6670_v9  ;;  %v8323_v28 = vld [vmem:[#allocation102_spill] sm:$0xff] }
 0x150   : > { %1783 = vmatmul.mubr.bf16.gmra.mxu0 %v1549_v46  ;;  %v4500_v8 = vunpack.i.l.bf16 %v6670_v9  ;;  %v1390_v42 = vsel %vm1370_vm4, %v1357_v12, %v4276_v22  ;;  %v4281_v14 = vunpack.i.h.bf16 %v8313_v41  ;;  %v1422_v11 = vsel %vm1403_vm5, %v1389_v19, %v4355_v59  ;;  %v8319_v12 = vld [vmem:[#allocation34_spill] sm:$0xff]  ;;  %v8320_v22 = vld [vmem:[#allocation96_spill] sm:$0xff] }
 0x151   : > { %v6725_v33 = vpop.permute.xlu1 %4533  ;;  %3932 = vmatprep.mubr.msk.bf16.mxu0 %vm1304_vm2, %v1552_v23  ;;  %v1554_v52 = vpack.c.bf16 %v8315_v7, %v8314_v61  ;;  %v4280_v48 = vunpack.i.l.bf16 %v8313_v41  ;;  %v1423_v1 = vsel %vm1403_vm5, %v1390_v42, %v4356_v55  ;;  %v1455_v30 = vsel %vm1436_vm6, %v1422_v11, %v4495_v62  ;;  %v8317_v23 = vld [vmem:[#allocation38_spill] sm:$0xff]  ;;  %v8321_v55 = vld [vmem:[#allocation88_spill] sm:$0xff]  ;;  %v8322_v62 = vld [vmem:[#allocation89_spill] sm:$0xff] }
 0x152   : > { %v6735_v10 = vpop.permute.xlu0 %4528  ;;  %v1551_v9 = vpack.c.bf16 %v1520_v32, %v1519_v26  ;;  %v1456_v53 = vsel %vm1436_vm6, %v1423_v1, %v4496_v29  ;;  %v4506_v63 = vunpack.i.h.bf16 %v6660_v13  ;;  %v4505_v44 = vunpack.i.l.bf16 %v6660_v13 }
 0x153   : > { %v4510_v20 = vunpack.i.l.bf16 %v6694_v45  ;;  %v1325_v15 = vsel %vm1304_vm2, %v8316_v37, %v4120_v51  ;;  %v4511_v49 = vunpack.i.h.bf16 %v6694_v45  ;;  %v1488_v38 = vsel %vm1469_vm7, %v1455_v30, %v4500_v8 }
 0x154   : > { %v1489_v24 = vsel %vm1469_vm7, %v1456_v53, %v4501_v6  ;;  %v6772_v54 = vsel %vm1304_vm2, %v8317_v23, %v4126_v39  ;;  %v6776_v13 = vsel %vm1304_vm2, %v8318_v21, %v4125_v60  ;;  %v1358_v47 = vsel %vm1337_vm3, %v1325_v15, %v4200_v36 }
 0x155   : > { %v6747_v27 = vpop.permute.xlu1 %4543  ;;  %v1359_v46 = vsel %vm1337_vm3, %v1326_v58, %v4201_v3  ;;  %v1391_v45 = vsel %vm1370_vm4, %v1358_v47, %v4280_v48  ;;  %v4516_v4 = vunpack.i.h.bf16 %v6678_v56  ;;  %v4515_v5 = vunpack.i.l.bf16 %v6678_v56 }
 0x156   : > { %v6757_v57 = vpop.permute.xlu0 %4538  ;;  %v1392_v35 = vsel %vm1370_vm4, %v1359_v46, %v4281_v14  ;;  %v6790_v17 = vsel %vm1403_vm5, %v1391_v45, %v4510_v20  ;;  %v6793_v60 = vsel %vm1502_vm8, %v1488_v38, %v4505_v44  ;;  %v6796_v40 = vsel %vm1502_vm8, %v1489_v24, %v4506_v63  ;;  %v8328_v46 = vld [vmem:[#allocation86_spill] sm:$0xff]  ;;  %v8329_v45 = vld [vmem:[#allocation87_spill] sm:$0xff] }
 0x157   : > { %v6799_v58 = vsel %vm1403_vm5, %v1392_v35, %v4511_v49  ;;  %v4521_v51 = vunpack.i.h.bf16 %v6714_v50  ;;  %v4520_v43 = vunpack.i.l.bf16 %v6714_v50  ;;  %v5275_v2 = vmov 0.0  }
 0x158   : > { %1791 = vmatmul.mubr.bf16.gmra.mxu0 %v1551_v9  ;;  %1891 = vst.msk [vmem:[#allocation2 + $0x18] sm:$0xff] %vm1304_vm2, %v5275_v2  ;;  %1892 = vst.msk [vmem:[#allocation2 + $0x20] sm:$0xff] %vm1304_vm2, %v5275_v2  ;;  %v4131_v34 = vunpack.i.h.bf16 %v8319_v12  ;;  %v4206_v16 = vunpack.i.h.bf16 %v8320_v22  ;;  %v4205_v59 = vunpack.i.l.bf16 %v8320_v22  ;;  %v1556_v31 = vpack.c.bf16 %v8322_v62, %v8321_v55 }
 0x159   : > { %3933 = vmatprep.mubr.msk.bf16.mxu0 %vm1304_vm2, %v1554_v52  ;;  %v6787_v0 = vpop.permute.xlu1 %4553  ;;  %1887 = vst.msk [vmem:[#allocation2] sm:$0xff] %vm1304_vm2, %v5275_v2  ;;  %1888 = vst.msk [vmem:[#allocation2 + $0x8] sm:$0xff] %vm1304_vm2, %v5275_v2  ;;  %v4130_v18 = vunpack.i.l.bf16 %v8319_v12  ;;  %v4286_v3 = vunpack.i.h.bf16 %v8323_v28  ;;  %v4285_v29 = vunpack.i.l.bf16 %v8323_v28  ;;  %v1553_v32 = vpack.c.bf16 %v6796_v40, %v6793_v60  ;;  %v8325_v52 = vld [vmem:[#allocation49_spill] sm:$0xff] }
 0x15a   : > { %v6785_v39 = vpop.permute.xlu0 %4548  ;;  %1894 = vst.msk [vmem:[#allocation2 + $0x30] sm:$0xff] %vm1304_vm2, %v5275_v2  ;;  %1895 = vst.msk [vmem:[#allocation2 + $0x38] sm:$0xff] %vm1304_vm2, %v5275_v2  ;;  %v1457_v36 = vsel %vm1436_vm6, %v6790_v17, %v4515_v5  ;;  %v1458_v19 = vsel %vm1436_vm6, %v6799_v58, %v4516_v4  ;;  %v4526_v6 = vunpack.i.h.bf16 %v6704_v25  ;;  %v4525_v8 = vunpack.i.l.bf16 %v6704_v25 }
 0x15b   : > { %1897 = vst.msk [vmem:[#allocation2 + $0x48] sm:$0xff] %vm1304_vm2, %v5275_v2  ;;  %1898 = vst.msk [vmem:[#allocation2 + $0x50] sm:$0xff] %vm1304_vm2, %v5275_v2  ;;  %v4531_v42 = vunpack.i.h.bf16 %v6735_v10  ;;  %v4530_v41 = vunpack.i.l.bf16 %v6735_v10  ;;  %v1490_v11 = vsel %vm1469_vm7, %v1457_v36, %v4520_v43  ;;  %v1491_v56 = vsel %vm1469_vm7, %v1458_v19, %v4521_v51  ;;  %v8324_v10 = vld [vmem:[#allocation53_spill] sm:$0xff] }
 0x15c   : > { %1900 = vst.msk [vmem:[#allocation2 + $0x60] sm:$0xff] %vm1304_vm2, %v5275_v2  ;;  %1901 = vst.msk [vmem:[#allocation2 + $0x68] sm:$0xff] %vm1304_vm2, %v5275_v2  ;;  %v1361_v61 = vsel %vm1337_vm3, %v6772_v54, %v4206_v16  ;;  %v1360_v25 = vsel %vm1337_vm3, %v6776_v13, %v4205_v59  ;;  %v1330_v7 = vsel %vm1304_vm2, %v8324_v10, %v4131_v34  ;;  %v4536_v30 = vunpack.i.h.bf16 %v6725_v33  ;;  %v8326_v54 = vld [vmem:[#allocation99_spill] sm:$0xff]  ;;  %v8327_v13 = vld [vmem:[#allocation106_spill] sm:$0xff] }
 0x15d   : > { %1903 = vst.msk [vmem:[#allocation2 + $0x78] sm:$0xff] %vm1304_vm2, %v5275_v2  ;;  %1904 = vst.msk [vmem:[#allocation2 + $0x80] sm:$0xff] %vm1304_vm2, %v5275_v2  ;;  %v6881_v14 = vpop.permute.xlu1 %4563  ;;  %v1329_v48 = vsel %vm1304_vm2, %v8325_v52, %v4130_v18  ;;  %v1393_v1 = vsel %vm1370_vm4, %v1360_v25, %v4285_v29  ;;  %v1394_v50 = vsel %vm1370_vm4, %v1361_v61, %v4286_v3  ;;  %v4535_v9 = vunpack.i.l.bf16 %v6725_v33  ;;  %v8330_v59 = vld [vmem:[#allocation13_spill] sm:$0xff]  ;;  %v8332_v61 = vld [vmem:[#allocation98_spill] sm:$0xff] }
 0x15e   : > { %1906 = vst.msk [vmem:[#allocation2 + $0x90] sm:$0xff] %vm1304_vm2, %v5275_v2  ;;  %1907 = vst.msk [vmem:[#allocation2 + $0x98] sm:$0xff] %vm1304_vm2, %v5275_v2  ;;  %v6865_v26 = vpop.permute.xlu0 %4558  ;;  %v1523_v63 = vsel %vm1502_vm8, %v1490_v11, %v4525_v8  ;;  %v1524_v44 = vsel %vm1502_vm8, %v1491_v56, %v4526_v6  ;;  %v1427_v20 = vsel %vm1403_vm5, %v1394_v50, %v4531_v42  ;;  %v4541_v15 = vunpack.i.h.bf16 %v6757_v57  ;;  %v8331_v11 = vld [vmem:[#allocation47_spill] sm:$0xff]  ;;  %v8333_v10 = vld [vmem:[#allocation92_spill] sm:$0xff] }
 0x15f   : > { %1909 = vst.msk [vmem:[#allocation2 + $0xa8] sm:$0xff] %vm1304_vm2, %v5275_v2  ;;  %1910 = vst.msk [vmem:[#allocation2 + $0xb0] sm:$0xff] %vm1304_vm2, %v5275_v2  ;;  %v1426_v37 = vsel %vm1403_vm5, %v1393_v1, %v4530_v41  ;;  %v4540_v49 = vunpack.i.l.bf16 %v6757_v57  ;;  %v4211_v21 = vunpack.i.h.bf16 %v8326_v54  ;;  %v4210_v33 = vunpack.i.l.bf16 %v8326_v54  ;;  %v8336_v50 = vld [vmem:[#allocation104_spill] sm:$0xff]  ;;  %v8337_v54 = vld [vmem:[#allocation21_spill] sm:$0xff] }
 0x160   : > { %1912 = vst.msk [vmem:[#allocation2 + $0xc0] sm:$0xff] %vm1304_vm2, %v5275_v2  ;;  %1913 = vst.msk [vmem:[#allocation2 + $0xc8] sm:$0xff] %vm1304_vm2, %v5275_v2  ;;  %1799 = vmatmul.mubr.bf16.gmra.mxu0 %v1553_v32  ;;  %v2039_v38 = vld [vmem:[#allocation2 + $0x2] sm:$0xff]  ;;  %v4291_v47 = vunpack.i.h.bf16 %v8327_v13  ;;  %v1558_v35 = vpack.c.bf16 %v8329_v45, %v8328_v46  ;;  %v4290_v5 = vunpack.i.l.bf16 %v8327_v13  ;;  %v1555_v60 = vpack.c.bf16 %v1524_v44, %v1523_v63 }
 0x161   : > { %1915 = vst.msk [vmem:[#allocation2 + $0xd8] sm:$0xff] %vm1304_vm2, %v5275_v2  ;;  %1916 = vst.msk [vmem:[#allocation2 + $0xe0] sm:$0xff] %vm1304_vm2, %v5275_v2  ;;  %3934 = vmatprep.mubr.msk.bf16.mxu0 %vm1304_vm2, %v1556_v31  ;;  %v2007_v23 = vld [vmem:[#allocation2 + $0x1] sm:$0xff]  ;;  %v6916_v17 = vpop.permute.xlu1 %4573  ;;  %v1459_v58 = vsel %vm1436_vm6, %v1426_v37, %v4535_v9  ;;  %v1460_v51 = vsel %vm1436_vm6, %v1427_v20, %v4536_v30  ;;  %v4546_v43 = vunpack.i.h.bf16 %v6747_v27  ;;  %v4551_v12 = vunpack.i.h.bf16 %v6785_v39 }
 0x162   : > { %1918 = vst.msk [vmem:[#allocation2 + $0xf0] sm:$0xff] %vm1304_vm2, %v5275_v2  ;;  %1919 = vst.msk [vmem:[#allocation2 + $0xf8] sm:$0xff] %vm1304_vm2, %v5275_v2  ;;  %v6902_v53 = vpop.permute.xlu0 %4568  ;;  %v4550_v34 = vunpack.i.l.bf16 %v6785_v39  ;;  %v1492_v22 = vsel %vm1469_vm7, %v1459_v58, %v4540_v49  ;;  %v1493_v16 = vsel %vm1469_vm7, %v1460_v51, %v4541_v15  ;;  %v4136_v55 = vunpack.i.h.bf16 %v8330_v59 }
 0x163   : > { %1921 = vst.msk [vmem:[#allocation2 + $0x108] sm:$0xff] %vm1304_vm2, %v5275_v2  ;;  %1922 = vst.msk [vmem:[#allocation2 + $0x110] sm:$0xff] %vm1304_vm2, %v5275_v2  ;;  %v1362_v62 = vsel %vm1337_vm3, %v1329_v48, %v4210_v33  ;;  %v1363_v31 = vsel %vm1337_vm3, %v1330_v7, %v4211_v21  ;;  %v4556_v3 = vunpack.i.h.bf16 %v6787_v0  ;;  %v4555_v29 = vunpack.i.l.bf16 %v6787_v0  ;;  %v8334_v7 = vld [vmem:[#allocation93_spill] sm:$0xff]  ;;  %v8335_v48 = vld [vmem:[#allocation46_spill] sm:$0xff] }
 0x164   : > { %1924 = vst.msk [vmem:[#allocation2 + $0x120] sm:$0xff] %vm1304_vm2, %v5275_v2  ;;  %1925 = vst.msk [vmem:[#allocation2 + $0x128] sm:$0xff] %vm1304_vm2, %v5275_v2  ;;  %v1395_v39 = vsel %vm1370_vm4, %v1362_v62, %v4290_v5  ;;  %v1396_v28 = vsel %vm1370_vm4, %v1363_v31, %v4291_v47  ;;  %v1526_v36 = vsel %vm1502_vm8, %v1493_v16, %v4546_v43  ;;  %v4561_v8 = vunpack.i.h.bf16 %v6865_v26  ;;  %v8338_v33 = vld [vmem:[#allocation44_spill] sm:$0xff]  ;;  %v8342_v62 = vld [vmem:[#allocation91_spill] sm:$0xff] }
 0x165   : > { %1927 = vst.msk [vmem:[#allocation2 + $0x138] sm:$0xff] %vm1304_vm2, %v5275_v2  ;;  %1928 = vst.msk [vmem:[#allocation2 + $0x140] sm:$0xff] %vm1304_vm2, %v5275_v2  ;;  %v1428_v19 = vsel %vm1403_vm5, %v1395_v39, %v4550_v34  ;;  %v1429_v6 = vsel %vm1403_vm5, %v1396_v28, %v4551_v12  ;;  %v4560_v42 = vunpack.i.l.bf16 %v6865_v26  ;;  %v6945_v41 = vpop.permute.xlu1 %4583  ;;  %v1332_v56 = vsel %vm1304_vm2, %v8331_v11, %v4136_v55  ;;  %v8339_v12 = vld [vmem:[#allocation63_spill] sm:$0xff]  ;;  %v8341_v55 = vld [vmem:[#allocation90_spill] sm:$0xff] }
 0x166   : > { %1930 = vst.msk [vmem:[#allocation2 + $0x150] sm:$0xff] %vm1304_vm2, %v5275_v2  ;;  %1931 = vst.msk [vmem:[#allocation2 + $0x158] sm:$0xff] %vm1304_vm2, %v5275_v2  ;;  %v6930_v18 = vpop.permute.xlu0 %4578  ;;  %v4216_v25 = vunpack.i.h.bf16 %v8332_v61  ;;  %v4215_v0 = vunpack.i.l.bf16 %v8332_v61  ;;  %v1560_v52 = vpack.c.bf16 %v8334_v7, %v8333_v10  ;;  %v4296_v30 = vunpack.i.h.bf16 %v8336_v50  ;;  %v8344_v28 = vld [vmem:[#allocation111_spill] sm:$0xff] }
 0x167   : > { %1933 = vst.msk [vmem:[#allocation2 + $0x168] sm:$0xff] %vm1304_vm2, %v5275_v2  ;;  %1934 = vst.msk [vmem:[#allocation2 + $0x170] sm:$0xff] %vm1304_vm2, %v5275_v2  ;;  %v4295_v9 = vunpack.i.l.bf16 %v8336_v50  ;;  %v1461_v63 = vsel %vm1436_vm6, %v1428_v19, %v4555_v29  ;;  %v1462_v44 = vsel %vm1436_vm6, %v1429_v6, %v4556_v3  ;;  %v4566_v20 = vunpack.i.h.bf16 %v6881_v14 }
 0x168   : > { %1936 = vst.msk [vmem:[#allocation2 + $0x180] sm:$0xff] %vm1304_vm2, %v5275_v2  ;;  %1937 = vst.msk [vmem:[#allocation2 + $0x188] sm:$0xff] %vm1304_vm2, %v5275_v2  ;;  %1807 = vmatmul.mubr.bf16.gmra.mxu0 %v1555_v60  ;;  %v4565_v37 = vunpack.i.l.bf16 %v6881_v14  ;;  %v4571_v49 = vunpack.i.h.bf16 %v6902_v53  ;;  %v4146_v21 = vunpack.i.h.bf16 %v8337_v54  ;;  %v4141_v13 = vunpack.i.h.bf16 %v8338_v33 }
 0x169   : > { %1939 = vst.msk [vmem:[#allocation2 + $0x198] sm:$0xff] %vm1304_vm2, %v5275_v2  ;;  %1940 = vst.msk [vmem:[#allocation2 + $0x1a0] sm:$0xff] %vm1304_vm2, %v5275_v2  ;;  %3935 = vmatprep.mubr.msk.bf16.mxu0 %vm1304_vm2, %v1558_v35  ;;  %v1365_v47 = vsel %vm1337_vm3, %v1332_v56, %v4216_v25  ;;  %v4145_v14 = vunpack.i.l.bf16 %v8337_v54  ;;  %v4140_v45 = vunpack.i.l.bf16 %v8338_v33  ;;  %v4576_v5 = vunpack.i.h.bf16 %v6916_v17  ;;  %v8345_v25 = vld [vmem:[#allocation58_spill] sm:$0xff]  ;;  %v8349_v33 = vld [vmem:[#allocation95_spill] sm:$0xff] }
 0x16a   : > { %1893 = vst.msk [vmem:[#allocation2 + $0x28] sm:$0x3] %vm1889_vm9, %v5275_v2  ;;  %1890 = vst.msk [vmem:[#allocation2 + $0x10] sm:$0x3] %vm1889_vm9, %v5275_v2  ;;  %v4589_v15 = vpop.permute.xlu0 %4588  ;;  %v1398_v35 = vsel %vm1370_vm4, %v1365_v47, %v4296_v30  ;;  %v4575_v60 = vunpack.i.l.bf16 %v6916_v17  ;;  %v4581_v43 = vunpack.i.h.bf16 %v6930_v18  ;;  %v1334_v34 = vsel %vm1304_vm2, %v8339_v12, %v4141_v13  ;;  %v8350_v13 = vld [vmem:[#allocation112_spill] sm:$0xff] }
 0x16b   : > { %1896 = vst.msk [vmem:[#allocation2 + $0x40] sm:$0x3] %vm1889_vm9, %v5275_v2  ;;  %1899 = vst.msk [vmem:[#allocation2 + $0x58] sm:$0x3] %vm1889_vm9, %v5275_v2  ;;  %v1431_v58 = vsel %vm1403_vm5, %v1398_v35, %v4571_v49  ;;  %v1562_v31 = vpack.c.bf16 %v8342_v62, %v8341_v55  ;;  %v4301_v3 = vunpack.i.h.bf16 %v8344_v28  ;;  %v4300_v29 = vunpack.i.l.bf16 %v8344_v28  ;;  %v8352_v35 = vld [vmem:[#allocation109_spill] sm:$0xff] }
 0x16c   : > { %1902 = vst.msk [vmem:[#allocation2 + $0x70] sm:$0x3] %vm1889_vm9, %v5275_v2  ;;  %1905 = vst.msk [vmem:[#allocation2 + $0x88] sm:$0x3] %vm1889_vm9, %v5275_v2  ;;  %v4586_v19 = vunpack.i.h.bf16 %v6945_v41  ;;  %v4585_v6 = vunpack.i.l.bf16 %v6945_v41  ;;  %v1564_v47 = vpack.c.bf16 %v8350_v13, %v8349_v33 }
 0x16d   : > { %1908 = vst.msk [vmem:[#allocation2 + $0xa0] sm:$0x3] %vm1889_vm9, %v5275_v2  ;;  %1911 = vst.msk [vmem:[#allocation2 + $0xb8] sm:$0x3] %vm1889_vm9, %v5275_v2 }
 0x16e   : > { %1914 = vst.msk [vmem:[#allocation2 + $0xd0] sm:$0x3] %vm1889_vm9, %v5275_v2  ;;  %1917 = vst.msk [vmem:[#allocation2 + $0xe8] sm:$0x3] %vm1889_vm9, %v5275_v2  ;;  %v4599_v17 = vpop.permute.xlu0 %4598 }
 0x16f   : > { %1920 = vst.msk [vmem:[#allocation2 + $0x100] sm:$0x3] %vm1889_vm9, %v5275_v2  ;;  %1923 = vst.msk [vmem:[#allocation2 + $0x118] sm:$0x3] %vm1889_vm9, %v5275_v2  ;;  %v4601_v49 = vunpack.i.h.bf16 %v4599_v17 }
 0x170   : > { %1926 = vst.msk [vmem:[#allocation2 + $0x130] sm:$0x3] %vm1889_vm9, %v5275_v2  ;;  %1929 = vst.msk [vmem:[#allocation2 + $0x148] sm:$0x3] %vm1889_vm9, %v5275_v2 }
 0x171   : > { %1932 = vst.msk [vmem:[#allocation2 + $0x160] sm:$0x3] %vm1889_vm9, %v5275_v2  ;;  %1935 = vst.msk [vmem:[#allocation2 + $0x178] sm:$0x3] %vm1889_vm9, %v5275_v2  ;;  %v2040_v24 = vld [vmem:[#allocation2 + $0xa] sm:$0xff] }
 0x172   : > { %1938 = vst.msk [vmem:[#allocation2 + $0x190] sm:$0x3] %vm1889_vm9, %v5275_v2  ;;  %1941 = vst.msk [vmem:[#allocation2 + $0x1a8] sm:$0x3] %vm1889_vm9, %v5275_v2  ;;  %v2008_v4 = vld [vmem:[#allocation2 + $0x9] sm:$0xff]  ;;  %v4632_v40 = vpack.i.bf16 %v2040_v24, %v2039_v38  ;;  %v4545_v2 = vunpack.i.l.bf16 %v6747_v27  ;;  %v4135_v27 = vunpack.i.l.bf16 %v8330_v59  ;;  %v4570_v38 = vunpack.i.l.bf16 %v6902_v53 }
 0x173   : > { %v4627_v57 = vpack.i.bf16 %v2008_v4, %v2007_v23  ;;  %v1494_v24 = vsel %vm1469_vm7, %v1461_v63, %v4560_v42  ;;  %v1495_v23 = vsel %vm1469_vm7, %v1462_v44, %v4561_v8  ;;  %v4594_v4 = vpop.permute.xlu1 %4593  ;;  %v4591_v8 = vunpack.i.h.bf16 %v4589_v15  ;;  %v4609_v63 = vpop.permute.xlu0 %4608 }
 0x174   : > { %4633 = vrot.lane.b32.xlu1 %v4632_v40, %s5268_s11  ;;  %v1525_v32 = vsel %vm1502_vm8, %v1492_v22, %v4545_v2  ;;  %v1331_v1 = vsel %vm1304_vm2, %v8335_v48, %v4135_v27  ;;  %v1527_v40 = vsel %vm1502_vm8, %v1494_v24, %v4565_v37  ;;  %v4580_v2 = vunpack.i.l.bf16 %v6930_v18  ;;  %v8340_v22 = vld [vmem:[#allocation100_spill] sm:$0xff]  ;;  %v8347_v48 = vld [vmem:[#allocation50_spill] sm:$0xff] }
 0x175   : > { %4628 = vrot.lane.b32.xlu0 %v4627_v57, %s5267_s10  ;;  %v1557_v26 = vpack.c.bf16 %v1526_v36, %v1525_v32  ;;  %v1364_v46 = vsel %vm1337_vm3, %v1331_v1, %v4215_v0  ;;  %v1528_v57 = vsel %vm1502_vm8, %v1495_v23, %v4566_v20  ;;  %v4221_v16 = vunpack.i.h.bf16 %v8340_v22  ;;  %v8343_v27 = vld [vmem:[#allocation60_spill] sm:$0xff]  ;;  %v8348_v23 = vld [vmem:[#allocation110_spill] sm:$0xff] }
 0x176   : > { %v1397_v53 = vsel %vm1370_vm4, %v1364_v46, %v4295_v9  ;;  %v4220_v59 = vunpack.i.l.bf16 %v8340_v22  ;;  %v1333_v39 = vsel %vm1304_vm2, %v8343_v27, %v4140_v45  ;;  %v1559_v32 = vpack.c.bf16 %v1528_v57, %v1527_v40  ;;  %v8351_v45 = vld [vmem:[#allocation108_spill] sm:$0xff] }
 0x177   : > { %1815 = vmatmul.mubr.bf16.gmra.mxu0 %v1557_v26  ;;  %v1430_v51 = vsel %vm1403_vm5, %v1397_v53, %v4570_v38  ;;  %v1464_v36 = vsel %vm1436_vm6, %v1431_v58, %v4576_v5  ;;  %v4590_v42 = vunpack.i.l.bf16 %v4589_v15  ;;  %v4604_v11 = vpop.permute.xlu1 %4603  ;;  %v1336_v0 = vsel %vm1304_vm2, %v8345_v25, %v4146_v21  ;;  %v8353_v5 = vld [vmem:[#allocation105_spill] sm:$0xff] }
 0x178   : > { %3936 = vmatprep.mubr.msk.bf16.mxu0 %vm1304_vm2, %v1560_v52  ;;  %v1463_v18 = vsel %vm1436_vm6, %v1430_v51, %v4575_v60  ;;  %v1497_v61 = vsel %vm1469_vm7, %v1464_v36, %v4581_v43  ;;  %v1366_v10 = vsel %vm1337_vm3, %v1333_v39, %v4220_v59  ;;  %v1367_v7 = vsel %vm1337_vm3, %v1334_v34, %v4221_v16  ;;  %v8346_v52 = vld [vmem:[#allocation56_spill] sm:$0xff] }
 0x179   : > { %v1496_v56 = vsel %vm1469_vm7, %v1463_v18, %v4580_v2  ;;  %v1335_v41 = vsel %vm1304_vm2, %v8346_v52, %v4145_v14  ;;  %v4226_v1 = vunpack.i.h.bf16 %v8347_v48  ;;  %v1399_v50 = vsel %vm1370_vm4, %v1366_v10, %v4300_v29 }
 0x17a   : > { %v1400_v30 = vsel %vm1370_vm4, %v1367_v7, %v4301_v3  ;;  %v4596_v9 = vunpack.i.h.bf16 %v4594_v4  ;;  %v4595_v26 = vunpack.i.l.bf16 %v4594_v4  ;;  %v1529_v44 = vsel %vm1502_vm8, %v1496_v56, %v4585_v6 }
 0x17b   : > { %v1530_v20 = vsel %vm1502_vm8, %v1497_v61, %v4586_v19  ;;  %v1432_v37 = vsel %vm1403_vm5, %v1399_v50, %v4590_v42  ;;  %v1433_v15 = vsel %vm1403_vm5, %v1400_v30, %v4591_v8  ;;  %v4600_v38 = vunpack.i.l.bf16 %v4599_v17  ;;  %v4614_v46 = vpop.permute.xlu1 %4613  ;;  %v4619_v17 = vpop.permute.xlu0 %4618  ;;  %v5197_v50 = vld [vmem:[%s7958_s3 + $0x30] sm:$0xff]   ;;  %v5198_v30 = vld [vmem:[%s7958_s3 + $0x28] sm:$0xff]  }
 0x17c   : > { %v4225_v24 = vunpack.i.l.bf16 %v8347_v48  ;;  %v4306_v54 = vunpack.i.h.bf16 %v8348_v23  ;;  %v4305_v21 = vunpack.i.l.bf16 %v8348_v23  ;;  %v1561_v14 = vpack.c.bf16 %v1530_v20, %v1529_v44  ;;  %v5196_v48 = vld [vmem:[%s7958_s3 + $0x38] sm:$0xff]  }
 0x17d   : > { %v595_v53 = vrot.slane %v8351_v45, 2  ;;  %v596_v4 = vrot.slane %v8352_v35, 2  ;;  %v8354_v60 = vunpack.c.l.bf16 %v8353_v5  ;;  %v1465_v57 = vsel %vm1436_vm6, %v1432_v37, %v4595_v26  ;;  %3544 = vmatpush1.bf16.msra.mxu1 %v5196_v48 }
 0x17e   : > { %v1466_v58 = vsel %vm1436_vm6, %v1433_v15, %v4596_v9  ;;  %v4606_v51 = vunpack.i.h.bf16 %v4604_v11  ;;  %v4605_v43 = vunpack.i.l.bf16 %v4604_v11  ;;  %v4611_v2 = vunpack.i.h.bf16 %v4609_v63  ;;  %v7057_v9 = vld [vmem:[%s7957_s2] ss:$0 sm:$0xff] }
 0x17f   : > { %1823 = vmatmul.mubr.bf16.gmra.mxu0 %v1559_v32  ;;  %v598_v40 = vrot.slane %v8354_v60, 2  ;;  %v4610_v12 = vunpack.i.l.bf16 %v4609_v63  ;;  %v1498_v34 = vsel %vm1469_vm7, %v1465_v57, %v4600_v38  ;;  %v1499_v22 = vsel %vm1469_vm7, %v1466_v58, %v4601_v49  ;;  %v4624_v6 = vpop.permute.xlu1 %4623  ;;  %v5199_v63 = vld [vmem:[%s7958_s3 + $0x20] sm:$0xff]   ;;  %v5200_v49 = vld [vmem:[%s7958_s3 + $0x18] sm:$0xff]  }
 0x180   : > { %3937 = vmatprep.mubr.msk.bf16.mxu0 %vm1304_vm2, %v1562_v31  ;;  %v1369_v16 = vsel %vm1337_vm3, %v1336_v0, %v4226_v1  ;;  %v1368_v59 = vsel %vm1337_vm3, %v1335_v41, %v4225_v24  ;;  %v597_v31 = vsel %vm461_vm1, %v595_v53, %v596_v4  ;;  %v4616_v39 = vunpack.i.h.bf16 %v4614_v46 }
 0x181   : > { %v1401_v55 = vsel %vm1370_vm4, %v1368_v59, %v4305_v21  ;;  %v1402_v62 = vsel %vm1370_vm4, %v1369_v16, %v4306_v54  ;;  %v599_v27 = vsel %vm461_vm1, %v596_v4, %v598_v40  ;;  %v4615_v28 = vunpack.i.l.bf16 %v4614_v46  ;;  %v5201_v21 = vld [vmem:[%s7958_s3 + $0x10] sm:$0xff]  }
 0x182   : > { %v1531_v3 = vsel %vm1502_vm8, %v1498_v34, %v4605_v43  ;;  %v1532_v29 = vsel %vm1502_vm8, %v1499_v22, %v4606_v51  ;;  %v1435_v32 = vsel %vm1403_vm5, %v1402_v62, %v4611_v2  ;;  %v1434_v18 = vsel %vm1403_vm5, %v1401_v55, %v4610_v12  ;;  %v5203_v2 = vld [vmem:[%s7958_s3] sm:$0xff]  }
 0x183   : > { %v4621_v36 = vunpack.i.h.bf16 %v4619_v17  ;;  %v4620_v19 = vunpack.i.l.bf16 %v4619_v17  ;;  %v1566_v8 = vpack.c.bf16 %v599_v27, %v597_v31  ;;  %v1563_v42 = vpack.c.bf16 %v1532_v29, %v1531_v3  ;;  %v5204_v17 = vld [vmem:[%s7958_s3 + $0x40] sm:$0xff]  }
 0x184   : > { %v1467_v11 = vsel %vm1436_vm6, %v1434_v18, %v4615_v28  ;;  %v1468_v56 = vsel %vm1436_vm6, %v1435_v32, %v4616_v39  ;;  %v4626_v61 = vunpack.i.h.bf16 %v4624_v6  ;;  %v4625_v25 = vunpack.i.l.bf16 %v4624_v6 }
 0x185   : > { %v1500_v0 = vsel %vm1469_vm7, %v1467_v11, %v4620_v19  ;;  %v1501_v10 = vsel %vm1469_vm7, %v1468_v56, %v4621_v36  ;;  %v8355_v1 = vmov 0  }
 0x186   : > { %v1533_v7 = vsel %vm1502_vm8, %v1500_v0, %v4625_v25  ;;  %v1534_v52 = vsel %vm1502_vm8, %v1501_v10, %v4626_v61  ;;  %3545 = vmatprep.subr.bf16.mxu1 %v8355_v1 }
 0x187   : > { %1831 = vmatmul.mubr.bf16.gmra.mxu0 %v1561_v14  ;;  %v1565_v41 = vpack.c.bf16 %v1534_v52, %v1533_v7  ;;  %3546 = vmatpush1.bf16.msra.mxu1 %v5197_v50  ;;  %v5202_v14 = vld [vmem:[%s7958_s3 + $0x8] sm:$0xff]  }
 0x188   : > { %3938 = vmatprep.mubr.msk.bf16.mxu0 %vm1304_vm2, %v1564_v47  ;;  %3547 = vmatprep.subr.bf16.mxu1 %v8355_v1 }
 0x18b   : > { %3548 = vmatpush1.bf16.msra.mxu1 %v5198_v30 }
 0x18c   : > { %3549 = vmatprep.subr.bf16.mxu1 %v8355_v1 }
 0x18f   : > { %1839 = vmatmul.mubr.bf16.gmra.mxu0 %v1563_v42  ;;  %3550 = vmatpush1.bf16.msra.mxu1 %v5199_v63 }
 0x190   : > { %3939 = vmatprep.mubr.msk.bf16.mxu0 %vm1304_vm2, %v1566_v8  ;;  %3551 = vmatprep.subr.bf16.mxu1 %v8355_v1 }
 0x193   : > { %3552 = vmatpush1.bf16.msra.mxu1 %v5200_v49 }
 0x194   : > { %3553 = vmatprep.subr.bf16.mxu1 %v8355_v1 }
 0x197   : > { %1847 = vmatmul.mubr.bf16.gmra.mxu0 %v1565_v41  ;;  %3554 = vmatpush1.bf16.msra.mxu1 %v5201_v21 }
 0x198   : > { %3555 = vmatprep.subr.bf16.mxu1 %v8355_v1 }
 0x19b   : > { %3556 = vmatpush1.bf16.msra.mxu1 %v5202_v14 }
 0x19c   : > { %3557 = vmatprep.subr.bf16.mxu1 %v8355_v1 }
 0x19f   : > { %3558 = vmatpush1.bf16.msra.mxu1 %v5203_v2 }
 0x1a0   : > { %3573 = vmatprep.subr.bf16.mxu1 %v8355_v1 }
 0x1a3   : > { %3574 = vmatpush2.bf16.msra.mxu1 %v5204_v17 }
 0x1d8   : > { %v1728_v26 = vpop.f32.mrf.mxu0 }
 0x1d9   : > { %v1729_v44 = vadd.f32 %v7057_v9, %v1728_v26 }
 0x1da   : > { %v1730_v20 = vpop.f32.mrf.mxu0 }
 0x1db   : > { %v1855_v37 = vmax.f32 %v1729_v44, 0.0 }
 0x1dc   : > { %v1731_v15 = vpop.f32.mrf.mxu0 }
 0x1dd   : > { %1943 = vst.msk [vmem:[#allocation2 + $0x19] sm:$0xff] %vm1304_vm2, %v1855_v37  ;;  %v1732_v38 = vadd.f32 %v7057_v9, %v1731_v15 }
 0x1de   : > { %v1733_v24 = vpop.f32.mrf.mxu0 }
 0x1df   : > { %v1856_v23 = vmax.f32 %v1732_v38, 0.0 }
 0x1e0   : > { %v1736_v54 = vpop.f32.mrf.mxu0 }
 0x1e1   : > { %1944 = vst.msk [vmem:[#allocation2 + $0x21] sm:$0xff] %vm1304_vm2, %v1856_v23  ;;  %v1737_v33 = vadd.f32 %v7057_v9, %v1736_v54 }
 0x1e2   : > { %v1738_v13 = vpop.f32.mrf.mxu0 }
 0x1e3   : > { %v1857_v47 = vmax.f32 %v1737_v33, 0.0 }
 0x1e4   : > { %v1739_v46 = vpop.f32.mrf.mxu0  ;;  %v7082_v4 = vld [vmem:[#allocation2 + $0x18] sm:$0xff] }
 0x1e5   : > { %1945 = vst.msk [vmem:[#allocation2 + $0x31] sm:$0xff] %vm1304_vm2, %v1857_v47  ;;  %v1740_v45 = vadd.f32 %v7057_v9, %v1739_v46  ;;  %v2009_v40 = vld [vmem:[#allocation2 + $0x19] sm:$0xff] }
 0x1e6   : > { %v1741_v53 = vpop.f32.mrf.mxu0 }
 0x1e7   : > { %v1858_v35 = vmax.f32 %v1740_v45, 0.0 }
 0x1e8   : > { %v1744_v5 = vpop.f32.mrf.mxu0  ;;  %v7085_v60 = vld [vmem:[#allocation2 + $0x20] sm:$0xff] }
 0x1e9   : > { %v2010_v57 = vld [vmem:[#allocation2 + $0x21] sm:$0xff]  ;;  %1946 = vst.msk [vmem:[#allocation2 + $0x39] sm:$0xff] %vm1304_vm2, %v1858_v35  ;;  %v1745_v58 = vadd.f32 %v7057_v9, %v1744_v5  ;;  %v4642_v51 = vpack.i.bf16 %v7085_v60, %v7082_v4 }
 0x1ea   : > { %v4637_v43 = vpack.i.bf16 %v2010_v57, %v2009_v40  ;;  %v1746_v12 = vpop.f32.mrf.mxu0  ;;  %v2135_v34 = vld [vmem:[#allocation2 + $0x1a] sm:$0xff]  ;;  %v2136_v22 = vld [vmem:[#allocation2 + $0x22] sm:$0xff] }
 0x1eb   : > { %v1859_v16 = vmax.f32 %v1745_v58, 0.0  ;;  %4643 = vrot.lane.b32.xlu0 %v4642_v51, %s5269_s12  ;;  %v4652_v62 = vpack.i.bf16 %v2136_v22, %v2135_v34 }
 0x1ec   : > { %4638 = vrot.lane.b32.xlu1 %v4637_v43, %s5267_s10  ;;  %v1747_v59 = vpop.f32.mrf.mxu0  ;;  %v2011_v39 = vld [vmem:[#allocation2 + $0x31] sm:$0xff] }
 0x1ed   : > { %1947 = vst.msk [vmem:[#allocation2 + $0x49] sm:$0xff] %vm1304_vm2, %v1859_v16  ;;  %v1748_v55 = vadd.f32 %v7057_v9, %v1747_v59  ;;  %v7113_v61 = vld [vmem:[#allocation2 + $0x30] sm:$0xff] }
 0x1ee   : > { %v1749_v31 = vpop.f32.mrf.mxu0 }
 0x1ef   : > { %v1860_v27 = vmax.f32 %v1748_v55, 0.0  ;;  %4653 = vrot.lane.b32.xlu0 %v4652_v62, %s5273_s30 }
 0x1f0   : > { %4648 = vrot.lane.b32.xlu1 %v4637_v43, %s5271_s7  ;;  %v1752_v28 = vpop.f32.mrf.mxu0  ;;  %v2232_v3 = vld [vmem:[#allocation2 + $0x32] sm:$0xff]  ;;  %v2233_v29 = vld [vmem:[#allocation2 + $0x3a] sm:$0xff] }
 0x1f1   : > { %v2012_v32 = vld [vmem:[#allocation2 + $0x39] sm:$0xff]  ;;  %1948 = vst.msk [vmem:[#allocation2 + $0x51] sm:$0xff] %vm1304_vm2, %v1860_v27  ;;  %v1753_v18 = vadd.f32 %v7057_v9, %v1752_v28  ;;  %v3385_v36 = vpack.c.bf16 %v2233_v29, %v2232_v3  ;;  %v4687_v44 = vpack.i.bf16 %v2233_v29, %v2232_v3 }
 0x1f2   : > { %v4662_v19 = vpack.i.bf16 %v2012_v32, %v2011_v39  ;;  %v1754_v6 = vpop.f32.mrf.mxu0  ;;  %v7108_v42 = vld [vmem:[#allocation2 + $0x38] sm:$0xff] }
 0x1f3   : > { %v1861_v8 = vmax.f32 %v1753_v18, 0.0  ;;  %3950 = vmatprep.mubr.msk.bf16.mxu1 %vm1304_vm2, %v3385_v36  ;;  %v4667_v0 = vpack.i.bf16 %v7108_v42, %v7113_v61 }
 0x1f4   : > { %4663 = vrot.lane.b32.xlu0 %v4662_v19, %s5267_s10  ;;  %4658 = vrot.lane.b32.xlu1 %v4652_v62, %s5268_s11  ;;  %v1755_v11 = vpop.f32.mrf.mxu0  ;;  %v2202_v38 = vld [vmem:[#allocation2 + $0x49] sm:$0xff] }
 0x1f5   : > { %1949 = vst.msk [vmem:[#allocation2 + $0x61] sm:$0xff] %vm1304_vm2, %v1861_v8  ;;  %v1756_v56 = vadd.f32 %v7057_v9, %v1755_v11  ;;  %v7145_v45 = vld [vmem:[#allocation2 + $0x48] sm:$0xff] }
 0x1f6   : > { %v1757_v25 = vpop.f32.mrf.mxu0 }
 0x1f7   : > { %v1862_v10 = vmax.f32 %v1756_v56, 0.0 }
 0x1f8   : > { %4673 = vrot.lane.b32.xlu0 %v4662_v19, %s5274_s6  ;;  %4668 = vrot.lane.b32.xlu1 %v4667_v0, %s5272_s26  ;;  %v1760_v7 = vpop.f32.mrf.mxu0  ;;  %v7119_v52 = vld [vmem:[#allocation2 + $0x4a] sm:$0xff]  ;;  %v7123_v48 = vld [vmem:[#allocation2 + $0x52] sm:$0xff] }
 0x1f9   : > { %1950 = vst.msk [vmem:[#allocation2 + $0x69] sm:$0xff] %vm1304_vm2, %v1862_v10  ;;  %v1761_v41 = vadd.f32 %v7057_v9, %v1760_v7  ;;  %v3387_v50 = vpack.c.bf16 %v7123_v48, %v7119_v52  ;;  %v2203_v37 = vld [vmem:[#allocation2 + $0x51] sm:$0xff]  ;;  %v4722_v43 = vpack.i.bf16 %v7123_v48, %v7119_v52 }
 0x1fa   : > { %v1762_v1 = vpop.f32.mrf.mxu0  ;;  %v4707_v54 = vpack.i.bf16 %v2203_v37, %v2202_v38  ;;  %v7139_v13 = vld [vmem:[#allocation2 + $0x50] sm:$0xff] }
 0x1fb   : > { %v1863_v30 = vmax.f32 %v1761_v41, 0.0  ;;  %v4712_v35 = vpack.i.bf16 %v7139_v13, %v7145_v45 }
 0x1fc   : > { %4678 = vrot.lane.b32.xlu0 %v4667_v0, %s5269_s12  ;;  %4683 = vrot.lane.b32.xlu1 %v4662_v19, %s5271_s7  ;;  %v1763_v26 = vpop.f32.mrf.mxu0  ;;  %v2015_v17 = vld [vmem:[#allocation2 + $0x61] sm:$0xff] }
 0x1fd   : > { %1951 = vst.msk [vmem:[#allocation2 + $0x79] sm:$0xff] %vm1304_vm2, %v1863_v30  ;;  %v1764_v63 = vadd.f32 %v7057_v9, %v1763_v26  ;;  %v7175_v32 = vld [vmem:[#allocation2 + $0x60] sm:$0xff] }
 0x1fe   : > { %v1765_v20 = vpop.f32.mrf.mxu0 }
 0x1ff   : > { %v1864_v15 = vmax.f32 %v1764_v63, 0.0 }
 0x200   : > { %4688 = vrot.lane.b32.xlu0 %v4687_v44, %s5273_s30  ;;  %4693 = vrot.lane.b32.xlu1 %v4687_v44, %s5268_s11  ;;  %v1768_v49 = vpop.f32.mrf.mxu0  ;;  %v7133_v24 = vld [vmem:[#allocation2 + $0x62] sm:$0xff]  ;;  %v7137_v21 = vld [vmem:[#allocation2 + $0x6a] sm:$0xff] }
 0x201   : > { %1952 = vst.msk [vmem:[#allocation2 + $0x81] sm:$0xff] %vm1304_vm2, %v1864_v15  ;;  %v1769_v23 = vadd.f32 %v7057_v9, %v1768_v49  ;;  %v3389_v47 = vpack.c.bf16 %v7137_v21, %v7133_v24  ;;  %v2016_v34 = vld [vmem:[#allocation2 + $0x69] sm:$0xff]  ;;  %v4757_v41 = vpack.i.bf16 %v7137_v21, %v7133_v24 }
 0x202   : > { %v1770_v33 = vpop.f32.mrf.mxu0  ;;  %v4732_v62 = vpack.i.bf16 %v2016_v34, %v2015_v17  ;;  %v7168_v39 = vld [vmem:[#allocation2 + $0x68] sm:$0xff] }
 0x203   : > { %v1865_v46 = vmax.f32 %v1769_v23, 0.0  ;;  %v4737_v19 = vpack.i.bf16 %v7168_v39, %v7175_v32 }
 0x204   : > { %4708 = vrot.lane.b32.xlu0 %v4707_v54, %s5274_s6  ;;  %4698 = vrot.lane.b32.xlu1 %v4707_v54, %s5267_s10  ;;  %v1771_v14 = vpop.f32.mrf.mxu0  ;;  %v2206_v44 = vld [vmem:[#allocation2 + $0x79] sm:$0xff] }
 0x205   : > { %1953 = vst.msk [vmem:[#allocation2 + $0x91] sm:$0xff] %vm1304_vm2, %v1865_v46  ;;  %v1772_v53 = vadd.f32 %v7057_v9, %v1771_v14 }
 0x206   : > { %v1773_v5 = vpop.f32.mrf.mxu0 }
 0x207   : > { %v1866_v40 = vmax.f32 %v1772_v53, 0.0 }
 0x208   : > { %4713 = vrot.lane.b32.xlu0 %v4712_v35, %s5269_s12  ;;  %4703 = vrot.lane.b32.xlu1 %v4712_v35, %s5272_s26  ;;  %v1776_v57 = vpop.f32.mrf.mxu0  ;;  %v7153_v58 = vld [vmem:[#allocation2 + $0x7a] sm:$0xff]  ;;  %v7159_v2 = vld [vmem:[#allocation2 + $0x82] sm:$0xff] }
 0x209   : > { %1954 = vst.msk [vmem:[#allocation2 + $0x99] sm:$0xff] %vm1304_vm2, %v1866_v40  ;;  %v1777_v51 = vadd.f32 %v7057_v9, %v1776_v57  ;;  %v3391_v22 = vpack.c.bf16 %v7159_v2, %v7153_v58  ;;  %v2207_v30 = vld [vmem:[#allocation2 + $0x81] sm:$0xff]  ;;  %v4792_v40 = vpack.i.bf16 %v7159_v2, %v7153_v58 }
 0x20a   : > { %v1778_v12 = vpop.f32.mrf.mxu0  ;;  %v4777_v37 = vpack.i.bf16 %v2207_v30, %v2206_v44  ;;  %v7197_v49 = vld [vmem:[#allocation2 + $0x80] sm:$0xff] }
 0x20b   : > { %v1867_v16 = vmax.f32 %v1777_v51, 0.0 }
 0x20c   : > { %4723 = vrot.lane.b32.xlu0 %v4722_v43, %s5273_s30  ;;  %4718 = vrot.lane.b32.xlu1 %v4707_v54, %s5271_s7  ;;  %v1779_v59 = vpop.f32.mrf.mxu0  ;;  %v7201_v54 = vld [vmem:[#allocation2 + $0x78] sm:$0xff] }
 0x20d   : > { %1955 = vst.msk [vmem:[#allocation2 + $0xa9] sm:$0xff] %vm1304_vm2, %v1867_v16  ;;  %v1780_v55 = vadd.f32 %v7057_v9, %v1779_v59  ;;  %v4782_v46 = vpack.i.bf16 %v7197_v49, %v7201_v54  ;;  %v2019_v34 = vld [vmem:[#allocation2 + $0x91] sm:$0xff] }
 0x20e   : > { %v1781_v31 = vpop.f32.mrf.mxu0 }
 0x20f   : > { %v1868_v27 = vmax.f32 %v1780_v55, 0.0 }
 0x210   : > { %4733 = vrot.lane.b32.xlu0 %v4732_v62, %s5267_s10  ;;  %4728 = vrot.lane.b32.xlu1 %v4722_v43, %s5268_s11  ;;  %v1784_v28 = vpop.f32.mrf.mxu0  ;;  %v7171_v3 = vld [vmem:[#allocation2 + $0x92] sm:$0xff]  ;;  %v7177_v18 = vld [vmem:[#allocation2 + $0x9a] sm:$0xff] }
 0x211   : > { %1956 = vst.msk [vmem:[#allocation2 + $0xb1] sm:$0xff] %vm1304_vm2, %v1868_v27  ;;  %v1785_v29 = vadd.f32 %v7057_v9, %v1784_v28  ;;  %v3393_v6 = vpack.c.bf16 %v7177_v18, %v7171_v3  ;;  %v2020_v51 = vld [vmem:[#allocation2 + $0x99] sm:$0xff]  ;;  %v2176_v28 = vld [vmem:[#allocation2 + $0x90] sm:$0xff]  ;;  %v4827_v30 = vpack.i.bf16 %v7177_v18, %v7171_v3 }
 0x212   : > { %v1786_v36 = vpop.f32.mrf.mxu0  ;;  %v4802_v59 = vpack.i.bf16 %v2020_v51, %v2019_v34 }
 0x213   : > { %v1869_v8 = vmax.f32 %v1785_v29, 0.0 }
 0x214   : > { %4743 = vrot.lane.b32.xlu0 %v4732_v62, %s5274_s6  ;;  %4738 = vrot.lane.b32.xlu1 %v4737_v19, %s5272_s26  ;;  %v1787_v11 = vpop.f32.mrf.mxu0 }
 0x215   : > { %1957 = vst.msk [vmem:[#allocation2 + $0xc1] sm:$0xff] %vm1304_vm2, %v1869_v8  ;;  %v1788_v56 = vadd.f32 %v7057_v9, %v1787_v11 }
 0x216   : > { %v1789_v25 = vpop.f32.mrf.mxu0 }
 0x217   : > { %v1870_v0 = vmax.f32 %v1788_v56, 0.0 }
 0x218   : > { %4748 = vrot.lane.b32.xlu0 %v4737_v19, %s5269_s12  ;;  %4753 = vrot.lane.b32.xlu1 %v4732_v62, %s5271_s7  ;;  %v1792_v10 = vpop.f32.mrf.mxu0  ;;  %v2177_v62 = vld [vmem:[#allocation2 + $0x98] sm:$0xff] }
 0x219   : > { %1958 = vst.msk [vmem:[#allocation2 + $0xc9] sm:$0xff] %vm1304_vm2, %v1870_v0  ;;  %v1793_v7 = vadd.f32 %v7057_v9, %v1792_v10  ;;  %v4807_v36 = vpack.i.bf16 %v2177_v62, %v2176_v28  ;;  %v2148_v34 = vld [vmem:[#allocation2 + $0xb2] sm:$0xff] }
 0x21a   : > { %v1794_v1 = vpop.f32.mrf.mxu0 }
 0x21b   : > { %v1871_v26 = vmax.f32 %v1793_v7, 0.0 }
 0x21c   : > { %4758 = vrot.lane.b32.xlu0 %v4757_v41, %s5273_s30  ;;  %4763 = vrot.lane.b32.xlu1 %v4757_v41, %s5268_s11  ;;  %v1795_v63 = vpop.f32.mrf.mxu0 }
 0x21d   : > { %1959 = vst.msk [vmem:[#allocation2 + $0xd9] sm:$0xff] %vm1304_vm2, %v1871_v26  ;;  %v1796_v20 = vadd.f32 %v7057_v9, %v1795_v63  ;;  %v2211_v63 = vld [vmem:[#allocation2 + $0xb1] sm:$0xff] }
 0x21e   : > { %v1797_v15 = vpop.f32.mrf.mxu0 }
 0x21f   : > { %v1872_v38 = vmax.f32 %v1796_v20, 0.0 }
 0x220   : > { %4778 = vrot.lane.b32.xlu0 %v4777_v37, %s5274_s6  ;;  %4768 = vrot.lane.b32.xlu1 %v4777_v37, %s5267_s10  ;;  %v1800_v23 = vpop.f32.mrf.mxu0  ;;  %v2024_v28 = vld [vmem:[#allocation2 + $0xc9] sm:$0xff] }
 0x221   : > { %1960 = vst.msk [vmem:[#allocation2 + $0xe1] sm:$0xff] %vm1304_vm2, %v1872_v38  ;;  %v1801_v33 = vadd.f32 %v7057_v9, %v1800_v23 }
 0x222   : > { %v1802_v14 = vpop.f32.mrf.mxu0 }
 0x223   : > { %v1873_v53 = vmax.f32 %v1801_v33, 0.0  ;;  %v2084_v14 = vld [vmem:[#allocation2 + $0xb0] sm:$0xff] }
 0x224   : > { %4783 = vrot.lane.b32.xlu0 %v4782_v46, %s5269_s12  ;;  %4773 = vrot.lane.b32.xlu1 %v4782_v46, %s5272_s26  ;;  %v1803_v35 = vpop.f32.mrf.mxu0 }
 0x225   : > { %1961 = vst.msk [vmem:[#allocation2 + $0xf1] sm:$0xff] %vm1304_vm2, %v1873_v53  ;;  %v1804_v5 = vadd.f32 %v7057_v9, %v1803_v35 }
 0x226   : > { %v1805_v57 = vpop.f32.mrf.mxu0 }
 0x227   : > { %v1874_v43 = vmax.f32 %v1804_v5, 0.0 }
 0x228   : > { %4793 = vrot.lane.b32.xlu0 %v4792_v40, %s5273_s30  ;;  %4788 = vrot.lane.b32.xlu1 %v4777_v37, %s5271_s7  ;;  %v1808_v12 = vpop.f32.mrf.mxu0  ;;  %v2210_v37 = vld [vmem:[#allocation2 + $0xa9] sm:$0xff] }
 0x229   : > { %1962 = vst.msk [vmem:[#allocation2 + $0xf9] sm:$0xff] %vm1304_vm2, %v1874_v43  ;;  %v1809_v16 = vadd.f32 %v7057_v9, %v1808_v12  ;;  %v4847_v23 = vpack.i.bf16 %v2211_v63, %v2210_v37  ;;  %v2147_v12 = vld [vmem:[#allocation2 + $0xaa] sm:$0xff] }
 0x22a   : > { %v1810_v17 = vpop.f32.mrf.mxu0  ;;  %v4862_v62 = vpack.i.bf16 %v2148_v34, %v2147_v12 }
 0x22b   : > { %v1875_v55 = vmax.f32 %v1809_v16, 0.0 }
 0x22c   : > { %4803 = vrot.lane.b32.xlu0 %v4802_v59, %s5267_s10  ;;  %4798 = vrot.lane.b32.xlu1 %v4792_v40, %s5268_s11  ;;  %v1811_v31 = vpop.f32.mrf.mxu0  ;;  %v2083_v40 = vld [vmem:[#allocation2 + $0xa8] sm:$0xff] }
 0x22d   : > { %1963 = vst.msk [vmem:[#allocation2 + $0x109] sm:$0xff] %vm1304_vm2, %v1875_v55  ;;  %v1812_v27 = vadd.f32 %v7057_v9, %v1811_v31  ;;  %v4852_v51 = vpack.i.bf16 %v2084_v14, %v2083_v40  ;;  %v2149_v40 = vld [vmem:[#allocation2 + $0xc2] sm:$0xff] }
 0x22e   : > { %v1813_v29 = vpop.f32.mrf.mxu0 }
 0x22f   : > { %v1876_v19 = vmax.f32 %v1812_v27, 0.0 }
 0x230   : > { %4813 = vrot.lane.b32.xlu0 %v4802_v59, %s5274_s6  ;;  %4808 = vrot.lane.b32.xlu1 %v4807_v36, %s5272_s26  ;;  %v7223_v11 = vld [vmem:[#allocation2 + $0xf2] sm:$0xff]  ;;  %v7227_v25 = vld [vmem:[#allocation2 + $0xfa] sm:$0xff] }
 0x231   : > { %1964 = vst.msk [vmem:[#allocation2 + $0x111] sm:$0xff] %vm1304_vm2, %v1876_v19  ;;  %v3401_v10 = vpack.c.bf16 %v7227_v25, %v7223_v11 }
 0x234   : > { %4818 = vrot.lane.b32.xlu0 %v4807_v36, %s5269_s12  ;;  %4823 = vrot.lane.b32.xlu1 %v4802_v59, %s5271_s7 }
 0x237   : > { %v1816_v8 = vpop.f32.mrf.mxu0 }
 0x238   : > { %v1817_v56 = vadd.f32 %v7057_v9, %v1816_v8  ;;  %4828 = vrot.lane.b32.xlu0 %v4827_v30, %s5273_s30  ;;  %4833 = vrot.lane.b32.xlu1 %v4827_v30, %s5268_s11  ;;  %v7239_v15 = vld [vmem:[#allocation2 + $0x10a] sm:$0xff]  ;;  %v7243_v33 = vld [vmem:[#allocation2 + $0x112] sm:$0xff]  ;;  %v2023_v8 = vld [vmem:[#allocation2 + $0xc1] sm:$0xff] }
 0x239   : > { %v1818_v0 = vpop.f32.mrf.mxu0  ;;  %v3403_v53 = vpack.c.bf16 %v7243_v33, %v7239_v15 }
 0x23a   : > { %v1877_v7 = vmax.f32 %v1817_v56, 0.0  ;;  %v4872_v0 = vpack.i.bf16 %v2024_v28, %v2023_v8 }
 0x23b   : > { %v1819_v41 = vpop.f32.mrf.mxu0 }
 0x23c   : > { %1965 = vst.msk [vmem:[#allocation2 + $0x121] sm:$0xff] %vm1304_vm2, %v1877_v7  ;;  %v1820_v1 = vadd.f32 %v7057_v9, %v1819_v41  ;;  %4848 = vrot.lane.b32.xlu0 %v4847_v23, %s5274_s6  ;;  %4838 = vrot.lane.b32.xlu1 %v4847_v23, %s5267_s10 }
 0x23d   : > { %v1821_v26 = vpop.f32.mrf.mxu0 }
 0x23e   : > { %v1878_v44 = vmax.f32 %v1820_v1, 0.0  ;;  %v2181_v1 = vld [vmem:[#allocation2 + $0xc8] sm:$0xff] }
 0x23f   : > { %v1824_v20 = vpop.f32.mrf.mxu0 }
 0x240   : > { %1966 = vst.msk [vmem:[#allocation2 + $0x129] sm:$0xff] %vm1304_vm2, %v1878_v44  ;;  %v1825_v38 = vadd.f32 %v7057_v9, %v1824_v20  ;;  %4853 = vrot.lane.b32.xlu0 %v4852_v51, %s5269_s12  ;;  %4843 = vrot.lane.b32.xlu1 %v4852_v51, %s5272_s26  ;;  %v2180_v44 = vld [vmem:[#allocation2 + $0xc0] sm:$0xff] }
 0x241   : > { %v1826_v46 = vpop.f32.mrf.mxu0 }
 0x242   : > { %v1879_v35 = vmax.f32 %v1825_v38, 0.0  ;;  %v4877_v38 = vpack.i.bf16 %v2181_v1, %v2180_v44  ;;  %v4634_v1 = vpop.permute.xlu1 %4633 }
 0x243   : > { %v1827_v5 = vpop.f32.mrf.mxu0 }
 0x244   : > { %1967 = vst.msk [vmem:[#allocation2 + $0x139] sm:$0xff] %vm1304_vm2, %v1879_v35  ;;  %v1828_v57 = vadd.f32 %v7057_v9, %v1827_v5  ;;  %4863 = vrot.lane.b32.xlu0 %v4862_v62, %s5273_s30  ;;  %4858 = vrot.lane.b32.xlu1 %v4847_v23, %s5271_s7 }
 0x245   : > { %v1829_v43 = vpop.f32.mrf.mxu0 }
 0x246   : > { %v1880_v16 = vmax.f32 %v1828_v57, 0.0  ;;  %v2150_v57 = vld [vmem:[#allocation2 + $0xca] sm:$0xff] }
 0x247   : > { %v1832_v59 = vpop.f32.mrf.mxu0  ;;  %v7253_v17 = vld [vmem:[#allocation2 + $0x122] sm:$0xff]  ;;  %v7257_v31 = vld [vmem:[#allocation2 + $0x12a] sm:$0xff] }
 0x248   : > { %1968 = vst.msk [vmem:[#allocation2 + $0x141] sm:$0xff] %vm1304_vm2, %v1880_v16  ;;  %v1833_v55 = vadd.f32 %v7057_v9, %v1832_v59  ;;  %4873 = vrot.lane.b32.xlu0 %v4872_v0, %s5267_s10  ;;  %4868 = vrot.lane.b32.xlu1 %v4862_v62, %s5268_s11  ;;  %v4897_v16 = vpack.i.bf16 %v2150_v57, %v2149_v40  ;;  %v2215_v62 = vld [vmem:[#allocation2 + $0xe1] sm:$0xff]  ;;  %v2028_v57 = vld [vmem:[#allocation2 + $0xf9] sm:$0xff] }
 0x249   : > { %v1834_v27 = vpop.f32.mrf.mxu0 }
 0x24a   : > { %v1881_v36 = vmax.f32 %v1833_v55, 0.0 }
 0x24b   : > { %v1835_v19 = vpop.f32.mrf.mxu0 }
 0x24c   : > { %1969 = vst.msk [vmem:[#allocation2 + $0x151] sm:$0xff] %vm1304_vm2, %v1881_v36  ;;  %v1836_v56 = vadd.f32 %v7057_v9, %v1835_v19  ;;  %4883 = vrot.lane.b32.xlu0 %v4872_v0, %s5274_s6  ;;  %4878 = vrot.lane.b32.xlu1 %v4877_v38, %s5272_s26  ;;  %v2214_v19 = vld [vmem:[#allocation2 + $0xd9] sm:$0xff] }
 0x24d   : > { %v1837_v7 = vpop.f32.mrf.mxu0 }
 0x24e   : > { %v1882_v41 = vmax.f32 %v1836_v56, 0.0  ;;  %v4917_v56 = vpack.i.bf16 %v2215_v62, %v2214_v19  ;;  %v2088_v7 = vld [vmem:[#allocation2 + $0xe0] sm:$0xff]  ;;  %v1976_v62 = vld [vmem:[#allocation2 + $0x8] sm:$0xff] }
 0x24f   : > { %v1840_v30 = vpop.f32.mrf.mxu0  ;;  %v7267_v26 = vld [vmem:[#allocation2 + $0x13a] sm:$0xff]  ;;  %v7271_v20 = vld [vmem:[#allocation2 + $0x142] sm:$0xff] }
 0x250   : > { %1970 = vst.msk [vmem:[#allocation2 + $0x159] sm:$0xff] %vm1304_vm2, %v1882_v41  ;;  %v1841_v63 = vadd.f32 %v7057_v9, %v1840_v30  ;;  %4888 = vrot.lane.b32.xlu0 %v4877_v38, %s5269_s12  ;;  %4893 = vrot.lane.b32.xlu1 %v4872_v0, %s5271_s7  ;;  %v4629_v30 = vpop.permute.xlu0 %4628 }
 0x251   : > { %v1842_v37 = vpop.f32.mrf.mxu0 }
 0x252   : > { %v1883_v46 = vmax.f32 %v1841_v63, 0.0  ;;  %v2087_v63 = vld [vmem:[#allocation2 + $0xd8] sm:$0xff] }
 0x253   : > { %v1843_v14 = vpop.f32.mrf.mxu0  ;;  %v4922_v37 = vpack.i.bf16 %v2088_v7, %v2087_v63  ;;  %v4635_v7 = vunpack.i.l.bf16 %v4634_v1 }
 0x254   : > { %1971 = vst.msk [vmem:[#allocation2 + $0x169] sm:$0xff] %vm1304_vm2, %v1883_v46  ;;  %v1844_v35 = vadd.f32 %v7057_v9, %v1843_v14  ;;  %4898 = vrot.lane.b32.xlu0 %v4897_v16, %s5273_s30  ;;  %4903 = vrot.lane.b32.xlu1 %v4897_v16, %s5268_s11  ;;  %v2151_v46 = vld [vmem:[#allocation2 + $0xda] sm:$0xff]  ;;  %v2184_v14 = vld [vmem:[#allocation2 + $0xf0] sm:$0xff] }
 0x255   : > { %v1845_v5 = vpop.f32.mrf.mxu0 }
 0x256   : > { %v1884_v51 = vmax.f32 %v1844_v35, 0.0 }
 0x257   : > { %v1848_v43 = vpop.f32.mrf.mxu0  ;;  %v7281_v12 = vld [vmem:[#allocation2 + $0x152] sm:$0xff]  ;;  %v7285_v59 = vld [vmem:[#allocation2 + $0x15a] sm:$0xff] }
 0x258   : > { %1972 = vst.msk [vmem:[#allocation2 + $0x171] sm:$0xff] %vm1304_vm2, %v1884_v51  ;;  %v1849_v34 = vadd.f32 %v7057_v9, %v1848_v43  ;;  %4918 = vrot.lane.b32.xlu0 %v4917_v56, %s5274_s6  ;;  %4908 = vrot.lane.b32.xlu1 %v4917_v56, %s5267_s10  ;;  %v4631_v51 = vunpack.i.h.bf16 %v4629_v30  ;;  %v4630_v43 = vunpack.i.l.bf16 %v4629_v30 }
 0x259   : > { %v1850_v55 = vpop.f32.mrf.mxu0 }
 0x25a   : > { %v1885_v28 = vmax.f32 %v1849_v34, 0.0  ;;  %v2027_v34 = vld [vmem:[#allocation2 + $0xf1] sm:$0xff]  ;;  %v1975_v55 = vld [vmem:[#allocation2] sm:$0xff] }
 0x25b   : > { %v1851_v36 = vpop.f32.mrf.mxu0  ;;  %v4942_v19 = vpack.i.bf16 %v2028_v57, %v2027_v34  ;;  %v3160_v63 = vsel %vm1304_vm2, %v1975_v55, %v4630_v43 }
 0x25c   : > { %1973 = vst.msk [vmem:[#allocation2 + $0x181] sm:$0xff] %vm1304_vm2, %v1885_v28  ;;  %v1852_v8 = vadd.f32 %v7057_v9, %v1851_v36  ;;  %v2152_v9 = vld [vmem:[#allocation2 + $0xe2] sm:$0xff]  ;;  %4923 = vrot.lane.b32.xlu0 %v4922_v37, %s5269_s12  ;;  %4913 = vrot.lane.b32.xlu1 %v4922_v37, %s5272_s26  ;;  %v3192_v23 = vsel %vm1337_vm3, %v3160_v63, %v4635_v7 }
 0x25d   : > { %v1853_v0 = vpop.f32.mrf.mxu0  ;;  %v4644_v35 = vpop.permute.xlu0 %4643  ;;  %v4932_v40 = vpack.i.bf16 %v2152_v9, %v2151_v46 }
 0x25e   : > { %v1886_v41 = vmax.f32 %v1852_v8, 0.0  ;;  %v7304_v5 = vpop.permute.xlu1 %4638  ;;  %v4636_v0 = vunpack.i.h.bf16 %v4634_v1  ;;  %v4646_v37 = vunpack.i.h.bf16 %v4644_v35  ;;  %v4645_v46 = vunpack.i.l.bf16 %v4644_v35 }
 0x25f   : > { %v7295_v44 = vld [vmem:[#allocation2 + $0x16a] sm:$0xff]  ;;  %v7298_v38 = vld [vmem:[#allocation2 + $0x172] sm:$0xff] }
 0x260   : > { %1974 = vst.msk [vmem:[#allocation2 + $0x189] sm:$0xff] %vm1304_vm2, %v1886_v41  ;;  %4933 = vrot.lane.b32.xlu0 %v4932_v40, %s5273_s30  ;;  %4928 = vrot.lane.b32.xlu1 %v4917_v56, %s5271_s7  ;;  %v2185_v41 = vld [vmem:[#allocation2 + $0xf8] sm:$0xff]  ;;  %v3161_v56 = vsel %vm1304_vm2, %v1976_v62, %v4631_v51  ;;  %v3224_v43 = vsel %vm1370_vm4, %v3192_v23, %v4645_v46 }
 0x261   : > { %v4654_v28 = vpop.permute.xlu0 %4653  ;;  %v4947_v27 = vpack.i.bf16 %v2185_v41, %v2184_v14  ;;  %v3193_v29 = vsel %vm1337_vm3, %v3161_v56, %v4636_v0  ;;  %v4967_v56 = vpack.i.bf16 %v7227_v25, %v7223_v11 }
 0x262   : > { %v4649_v36 = vpop.permute.xlu1 %4648  ;;  %v3225_v51 = vsel %vm1370_vm4, %v3193_v29, %v4646_v37  ;;  %v4656_v35 = vunpack.i.h.bf16 %v4654_v28  ;;  %v4655_v55 = vunpack.i.l.bf16 %v4654_v28 }
 0x263   : > { %v4651_v9 = vunpack.i.h.bf16 %v4649_v36  ;;  %v4650_v57 = vunpack.i.l.bf16 %v4649_v36 }
 0x264   : > { %4943 = vrot.lane.b32.xlu0 %v4942_v19, %s5267_s10  ;;  %4938 = vrot.lane.b32.xlu1 %v4932_v40, %s5268_s11 }
 0x265   : > { %v3257_v40 = vsel %vm1403_vm5, %v3225_v51, %v4651_v9  ;;  %v3256_v62 = vsel %vm1403_vm5, %v3224_v43, %v4650_v57  ;;  %v2218_v43 = vld [vmem:[#allocation2 + $0x109] sm:$0xff] }
 0x266   : > { %v7318_v34 = vpop.permute.xlu0 %4663  ;;  %v4659_v1 = vpop.permute.xlu1 %4658  ;;  %v3288_v29 = vsel %vm1436_vm6, %v3256_v62, %v4655_v55  ;;  %v3289_v23 = vsel %vm1436_vm6, %v3257_v40, %v4656_v35  ;;  %v4641_v40 = vunpack.i.h.bf16 %v7304_v5  ;;  %v4640_v62 = vunpack.i.l.bf16 %v7304_v5 }
 0x267   : > { %v7308_v16 = vld [vmem:[#allocation2 + $0x182] sm:$0xff]  ;;  %v7310_v8 = vld [vmem:[#allocation2 + $0x18a] sm:$0xff] }
 0x268   : > { %v3413_v30 = vpack.c.bf16 %v7310_v8, %v7308_v16  ;;  %4953 = vrot.lane.b32.xlu0 %v4942_v19, %s5274_s6  ;;  %4948 = vrot.lane.b32.xlu1 %v4947_v27, %s5272_s26  ;;  %v3162_v52 = vsel %vm1304_vm2, %v7082_v4, %v4640_v62  ;;  %v3163_v48 = vsel %vm1304_vm2, %v7085_v60, %v4641_v40 }
 0x269   : > { %v5002_v60 = vpack.i.bf16 %v7243_v33, %v7239_v15 }
 0x26a   : > { %v4674_v36 = vpop.permute.xlu0 %4673  ;;  %v4669_v7 = vpop.permute.xlu1 %4668 }
 0x26b   : > { %v4676_v14 = vunpack.i.h.bf16 %v4674_v36  ;;  %v4675_v41 = vunpack.i.l.bf16 %v4674_v36  ;;  %v4671_v63 = vunpack.i.h.bf16 %v4669_v7  ;;  %v4670_v0 = vunpack.i.l.bf16 %v4669_v7 }
 0x26c   : > { %4958 = vrot.lane.b32.xlu0 %v4947_v27, %s5269_s12  ;;  %4963 = vrot.lane.b32.xlu1 %v4942_v19, %s5271_s7  ;;  %v2219_v27 = vld [vmem:[#allocation2 + $0x111] sm:$0xff]  ;;  %v4660_v7 = vunpack.i.l.bf16 %v4659_v1 }
 0x26d   : > { %v3320_v37 = vsel %vm1469_vm7, %v3288_v29, %v4670_v0  ;;  %v3321_v46 = vsel %vm1469_vm7, %v3289_v23, %v4671_v63  ;;  %v4987_v55 = vpack.i.bf16 %v2219_v27, %v2218_v43  ;;  %v7352_v29 = vld [vmem:[#allocation2 + $0x108] sm:$0xff] }
 0x26e   : > { %v4679_v28 = vpop.permute.xlu0 %4678  ;;  %v4684_v9 = vpop.permute.xlu1 %4683  ;;  %v3352_v57 = vsel %vm1502_vm8, %v3320_v37, %v4675_v41  ;;  %v3353_v51 = vsel %vm1502_vm8, %v3321_v46, %v4676_v14  ;;  %v7348_v14 = vld [vmem:[#allocation2 + $0x110] sm:$0xff]  ;;  %v4661_v41 = vunpack.i.h.bf16 %v4659_v1  ;;  %v3194_v1 = vsel %vm1337_vm3, %v3162_v52, %v4660_v7 }
 0x26f   : > { %v3384_v19 = vpack.c.bf16 %v3353_v51, %v3352_v57  ;;  %v4681_v63 = vunpack.i.h.bf16 %v4679_v28  ;;  %v4680_v0 = vunpack.i.l.bf16 %v4679_v28  ;;  %v4992_v23 = vpack.i.bf16 %v7348_v14, %v7352_v29  ;;  %v2032_v43 = vld [vmem:[#allocation2 + $0x129] sm:$0xff] }
 0x270   : > { %4968 = vrot.lane.b32.xlu0 %v4967_v56, %s5273_s30  ;;  %4973 = vrot.lane.b32.xlu1 %v4967_v56, %s5268_s11  ;;  %v3195_v28 = vsel %vm1337_vm3, %v3163_v48, %v4661_v41  ;;  %v4686_v56 = vunpack.i.h.bf16 %v4684_v9  ;;  %v4685_v37 = vunpack.i.l.bf16 %v4684_v9 }
 0x271   : > { %3576 = vmatmul.mubr.bf16.vlgmr.msra.gmra.mxu1 %v3384_v19  ;;  %v3226_v46 = vsel %vm1370_vm4, %v3194_v1, %v4680_v0  ;;  %v3227_v57 = vsel %vm1370_vm4, %v3195_v28, %v4681_v63 }
 0x272   : > { %v4689_v35 = vpop.permute.xlu0 %4688  ;;  %v7342_v36 = vpop.permute.xlu1 %4693  ;;  %3951 = vmatprep.mubr.msk.bf16.mxu1 %vm1304_vm2, %v3387_v50  ;;  %v3258_v40 = vsel %vm1403_vm5, %v3226_v46, %v4685_v37  ;;  %v3259_v9 = vsel %vm1403_vm5, %v3227_v57, %v4686_v56  ;;  %v4666_v56 = vunpack.i.h.bf16 %v7318_v34  ;;  %v4665_v37 = vunpack.i.l.bf16 %v7318_v34 }
 0x273   : > { %v4691_v51 = vunpack.i.h.bf16 %v4689_v35  ;;  %v4690_v27 = vunpack.i.l.bf16 %v4689_v35 }
 0x274   : > { %4988 = vrot.lane.b32.xlu0 %v4987_v55, %s5274_s6  ;;  %4978 = vrot.lane.b32.xlu1 %v4987_v55, %s5267_s10 }
 0x275   : > { %v3290_v7 = vsel %vm1436_vm6, %v3258_v40, %v4690_v27  ;;  %v3291_v35 = vsel %vm1436_vm6, %v3259_v9, %v4691_v51 }
 0x276   : > { %v4709_v5 = vpop.permute.xlu0 %4708  ;;  %v7360_v50 = vpop.permute.xlu1 %4698 }
 0x277   : > { %v4711_v63 = vunpack.i.h.bf16 %v4709_v5  ;;  %v4710_v0 = vunpack.i.l.bf16 %v4709_v5  ;;  %v4696_v5 = vunpack.i.h.bf16 %v7342_v36 }
 0x278   : > { %4993 = vrot.lane.b32.xlu0 %v4992_v23, %s5269_s12  ;;  %4983 = vrot.lane.b32.xlu1 %v4992_v23, %s5272_s26  ;;  %v2031_v23 = vld [vmem:[#allocation2 + $0x121] sm:$0xff] }
 0x279   : > { %v5012_v28 = vpack.i.bf16 %v2032_v43, %v2031_v23 }
 0x27a   : > { %v4714_v4 = vpop.permute.xlu0 %4713  ;;  %v4704_v19 = vpop.permute.xlu1 %4703 }
 0x27b   : > { %v4706_v62 = vunpack.i.h.bf16 %v4704_v19  ;;  %v4705_v41 = vunpack.i.l.bf16 %v4704_v19  ;;  %v7385_v19 = vld [vmem:[#allocation2 + $0x128] sm:$0xff]  ;;  %v4716_v40 = vunpack.i.h.bf16 %v4714_v4  ;;  %v4715_v43 = vunpack.i.l.bf16 %v4714_v4 }
 0x27c   : > { %5003 = vrot.lane.b32.xlu0 %v5002_v60, %s5273_s30  ;;  %4998 = vrot.lane.b32.xlu1 %v4987_v55, %s5271_s7  ;;  %v4695_v55 = vunpack.i.l.bf16 %v7342_v36  ;;  %v3164_v36 = vsel %vm1304_vm2, %v7113_v61, %v4665_v37 }
 0x27d   : > { %v3322_v52 = vsel %vm1469_vm7, %v3290_v7, %v4705_v41  ;;  %v3323_v48 = vsel %vm1469_vm7, %v3291_v35, %v4706_v62  ;;  %v7390_v41 = vld [vmem:[#allocation2 + $0x120] sm:$0xff]  ;;  %v3165_v7 = vsel %vm1304_vm2, %v7108_v42, %v4666_v56 }
 0x27e   : > { %v4724_v1 = vpop.permute.xlu0 %4723  ;;  %v4719_v46 = vpop.permute.xlu1 %4718  ;;  %v3354_v57 = vsel %vm1502_vm8, %v3322_v52, %v4710_v0  ;;  %v3355_v51 = vsel %vm1502_vm8, %v3323_v48, %v4711_v63  ;;  %v5017_v4 = vpack.i.bf16 %v7385_v19, %v7390_v41  ;;  %v3196_v63 = vsel %vm1337_vm3, %v3164_v36, %v4695_v55 }
 0x27f   : > { %v3386_v27 = vpack.c.bf16 %v3355_v51, %v3354_v57  ;;  %v4721_v9 = vunpack.i.h.bf16 %v4719_v46  ;;  %v4720_v34 = vunpack.i.l.bf16 %v4719_v46  ;;  %v3228_v42 = vsel %vm1370_vm4, %v3196_v63, %v4715_v43 }
 0x280   : > { %5013 = vrot.lane.b32.xlu0 %v5012_v28, %s5267_s10  ;;  %5008 = vrot.lane.b32.xlu1 %v5002_v60, %s5268_s11  ;;  %v3197_v60 = vsel %vm1337_vm3, %v3165_v7, %v4696_v5  ;;  %v4726_v61 = vunpack.i.h.bf16 %v4724_v1  ;;  %v4725_v23 = vunpack.i.l.bf16 %v4724_v1  ;;  %v4700_v63 = vunpack.i.l.bf16 %v7360_v50 }
 0x281   : > { %3584 = vmatmul.mubr.bf16.gmra.mxu1 %v3386_v27  ;;  %v3229_v0 = vsel %vm1370_vm4, %v3197_v60, %v4716_v40  ;;  %v3260_v24 = vsel %vm1403_vm5, %v3228_v42, %v4720_v34  ;;  %v5037_v27 = vpack.i.bf16 %v7257_v31, %v7253_v17  ;;  %v2223_v34 = vld [vmem:[#allocation2 + $0x141] sm:$0xff]  ;;  %v4701_v60 = vunpack.i.h.bf16 %v7360_v50 }
 0x282   : > { %v7388_v62 = vpop.permute.xlu0 %4733  ;;  %v4729_v35 = vpop.permute.xlu1 %4728  ;;  %3952 = vmatprep.mubr.msk.bf16.mxu1 %vm1304_vm2, %v3389_v47  ;;  %v3261_v21 = vsel %vm1403_vm5, %v3229_v0, %v4721_v9  ;;  %v3292_v57 = vsel %vm1436_vm6, %v3260_v24, %v4725_v23  ;;  %v7430_v0 = vld [vmem:[#allocation2 + $0x140] sm:$0xff]  ;;  %v3166_v2 = vsel %vm1304_vm2, %v7145_v45, %v4700_v63  ;;  %v5072_v45 = vpack.i.bf16 %v7271_v20, %v7267_v26 }
 0x283   : > { %v3293_v51 = vsel %vm1436_vm6, %v3261_v21, %v4726_v61  ;;  %v4731_v61 = vunpack.i.h.bf16 %v4729_v35  ;;  %v4730_v23 = vunpack.i.l.bf16 %v4729_v35  ;;  %v3167_v58 = vsel %vm1304_vm2, %v7139_v13, %v4701_v60  ;;  %v2035_v60 = vld [vmem:[#allocation2 + $0x151] sm:$0xff] }
 0x284   : > { %5023 = vrot.lane.b32.xlu0 %v5012_v28, %s5274_s6  ;;  %5018 = vrot.lane.b32.xlu1 %v5017_v4, %s5272_s26 }
 0x285   : > { %v3198_v35 = vsel %vm1337_vm3, %v3166_v2, %v4730_v23 }
 0x286   : > { %v4744_v47 = vpop.permute.xlu0 %4743  ;;  %v4739_v56 = vpop.permute.xlu1 %4738 }
 0x287   : > { %v4746_v52 = vunpack.i.h.bf16 %v4744_v47  ;;  %v4745_v48 = vunpack.i.l.bf16 %v4744_v47  ;;  %v4741_v37 = vunpack.i.h.bf16 %v4739_v56  ;;  %v4740_v46 = vunpack.i.l.bf16 %v4739_v56  ;;  %v7434_v47 = vld [vmem:[#allocation2 + $0x138] sm:$0xff] }
 0x288   : > { %5028 = vrot.lane.b32.xlu0 %v5017_v4, %s5269_s12  ;;  %5033 = vrot.lane.b32.xlu1 %v5012_v28, %s5271_s7  ;;  %v2222_v28 = vld [vmem:[#allocation2 + $0x139] sm:$0xff] }
 0x289   : > { %v3324_v1 = vsel %vm1469_vm7, %v3292_v57, %v4740_v46  ;;  %v3325_v5 = vsel %vm1469_vm7, %v3293_v51, %v4741_v37  ;;  %v5057_v4 = vpack.i.bf16 %v2223_v34, %v2222_v28 }
 0x28a   : > { %v4749_v55 = vpop.permute.xlu0 %4748  ;;  %v4754_v40 = vpop.permute.xlu1 %4753  ;;  %v3356_v43 = vsel %vm1502_vm8, %v3324_v1, %v4745_v48  ;;  %v3357_v9 = vsel %vm1502_vm8, %v3325_v5, %v4746_v52  ;;  %v5062_v52 = vpack.i.bf16 %v7430_v0, %v7434_v47  ;;  %v3199_v48 = vsel %vm1337_vm3, %v3167_v58, %v4731_v61 }
 0x28b   : > { %v3388_v7 = vpack.c.bf16 %v3357_v9, %v3356_v43  ;;  %v4751_v24 = vunpack.i.h.bf16 %v4749_v55  ;;  %v4750_v21 = vunpack.i.l.bf16 %v4749_v55  ;;  %v4756_v56 = vunpack.i.h.bf16 %v4754_v40  ;;  %v2036_v55 = vld [vmem:[#allocation2 + $0x159] sm:$0xff] }
 0x28c   : > { %5038 = vrot.lane.b32.xlu0 %v5037_v27, %s5273_s30  ;;  %5043 = vrot.lane.b32.xlu1 %v5037_v27, %s5268_s11  ;;  %v4755_v37 = vunpack.i.l.bf16 %v4754_v40 }
 0x28d   : > { %3592 = vmatmul.mubr.bf16.gmra.mxu1 %v3388_v7  ;;  %v3230_v46 = vsel %vm1370_vm4, %v3198_v35, %v4750_v21  ;;  %v3231_v57 = vsel %vm1370_vm4, %v3199_v48, %v4751_v24  ;;  %v5082_v24 = vpack.i.bf16 %v2036_v55, %v2035_v60  ;;  %v4736_v21 = vunpack.i.h.bf16 %v7388_v62 }
 0x28e   : > { %v4759_v36 = vpop.permute.xlu0 %4758  ;;  %v7424_v42 = vpop.permute.xlu1 %4763  ;;  %3953 = vmatprep.mubr.msk.bf16.mxu1 %vm1304_vm2, %v3391_v22  ;;  %v3262_v27 = vsel %vm1403_vm5, %v3230_v46, %v4755_v37  ;;  %v3263_v40 = vsel %vm1403_vm5, %v3231_v57, %v4756_v56  ;;  %v7467_v56 = vld [vmem:[#allocation2 + $0x158] sm:$0xff] }
 0x28f   : > { %v4761_v51 = vunpack.i.h.bf16 %v4759_v36  ;;  %v4760_v1 = vunpack.i.l.bf16 %v4759_v36 }
 0x290   : > { %5058 = vrot.lane.b32.xlu0 %v5057_v4, %s5274_s6  ;;  %5048 = vrot.lane.b32.xlu1 %v5057_v4, %s5267_s10 }
 0x291   : > { %v3294_v34 = vsel %vm1436_vm6, %v3262_v27, %v4760_v1  ;;  %v3295_v7 = vsel %vm1436_vm6, %v3263_v40, %v4761_v51  ;;  %v7472_v1 = vld [vmem:[#allocation2 + $0x150] sm:$0xff] }
 0x292   : > { %v4779_v50 = vpop.permute.xlu0 %4778  ;;  %v7442_v22 = vpop.permute.xlu1 %4768 }
 0x293   : > { %v4781_v28 = vunpack.i.h.bf16 %v4779_v50  ;;  %v4780_v36 = vunpack.i.l.bf16 %v4779_v50  ;;  %v4766_v50 = vunpack.i.h.bf16 %v7424_v42 }
 0x294   : > { %5063 = vrot.lane.b32.xlu0 %v5062_v52, %s5269_s12  ;;  %5053 = vrot.lane.b32.xlu1 %v5062_v52, %s5272_s26  ;;  %v4735_v52 = vunpack.i.l.bf16 %v7388_v62 }
 0x296   : > { %v4784_v13 = vpop.permute.xlu0 %4783  ;;  %v4774_v5 = vpop.permute.xlu1 %4773 }
 0x297   : > { %v4776_v43 = vunpack.i.h.bf16 %v4774_v5  ;;  %v4775_v9 = vunpack.i.l.bf16 %v4774_v5  ;;  %v4786_v37 = vunpack.i.h.bf16 %v4784_v13  ;;  %v4785_v46 = vunpack.i.l.bf16 %v4784_v13 }
 0x298   : > { %5073 = vrot.lane.b32.xlu0 %v5072_v45, %s5273_s30  ;;  %5068 = vrot.lane.b32.xlu1 %v5057_v4, %s5271_s7  ;;  %v4765_v4 = vunpack.i.l.bf16 %v7424_v42  ;;  %v3169_v5 = vsel %vm1304_vm2, %v7168_v39, %v4736_v21  ;;  %v3168_v42 = vsel %vm1304_vm2, %v7175_v32, %v4735_v52  ;;  %v5087_v13 = vpack.i.bf16 %v7467_v56, %v7472_v1 }
 0x299   : > { %v3326_v63 = vsel %vm1469_vm7, %v3294_v34, %v4775_v9  ;;  %v3327_v61 = vsel %vm1469_vm7, %v3295_v7, %v4776_v43  ;;  %v5107_v52 = vpack.i.bf16 %v7285_v59, %v7281_v12 }
 0x29a   : > { %v4794_v23 = vpop.permute.xlu0 %4793  ;;  %v4789_v58 = vpop.permute.xlu1 %4788  ;;  %v3358_v2 = vsel %vm1502_vm8, %v3326_v63, %v4780_v36  ;;  %v3359_v35 = vsel %vm1502_vm8, %v3327_v61, %v4781_v28  ;;  %v3200_v27 = vsel %vm1337_vm3, %v3168_v42, %v4765_v4  ;;  %v7506_v42 = vld [vmem:[#allocation2 + $0x168] sm:$0xff] }
 0x29b   : > { %v3390_v48 = vpack.c.bf16 %v3359_v35, %v3358_v2  ;;  %v4791_v57 = vunpack.i.h.bf16 %v4789_v58  ;;  %v4790_v62 = vunpack.i.l.bf16 %v4789_v58  ;;  %v3232_v39 = vsel %vm1370_vm4, %v3200_v27, %v4785_v46  ;;  %v2242_v58 = vld [vmem:[#allocation2 + $0xaa] sm:$0xff]  ;;  %v2243_v2 = vld [vmem:[#allocation2 + $0xb2] sm:$0xff] }
 0x29c   : > { %5083 = vrot.lane.b32.xlu0 %v5082_v24, %s5267_s10  ;;  %5078 = vrot.lane.b32.xlu1 %v5072_v45, %s5268_s11  ;;  %v3201_v45 = vsel %vm1337_vm3, %v3169_v5, %v4766_v50  ;;  %v4796_v32 = vunpack.i.h.bf16 %v4794_v23  ;;  %v4795_v43 = vunpack.i.l.bf16 %v4794_v23  ;;  %v3395_v46 = vpack.c.bf16 %v2243_v2, %v2242_v58 }
 0x29d   : > { %3600 = vmatmul.mubr.bf16.gmra.mxu1 %v3390_v48  ;;  %v3233_v40 = vsel %vm1370_vm4, %v3201_v45, %v4786_v37  ;;  %v3264_v3 = vsel %vm1403_vm5, %v3232_v39, %v4790_v62  ;;  %v2227_v48 = vld [vmem:[#allocation2 + $0x171] sm:$0xff]  ;;  %v4770_v45 = vunpack.i.l.bf16 %v7442_v22 }
 0x29e   : > { %v7470_v51 = vpop.permute.xlu0 %4803  ;;  %v4799_v55 = vpop.permute.xlu1 %4798  ;;  %3954 = vmatprep.mubr.msk.bf16.mxu1 %vm1304_vm2, %v3393_v6  ;;  %v3265_v18 = vsel %vm1403_vm5, %v3233_v40, %v4791_v57  ;;  %v3296_v60 = vsel %vm1436_vm6, %v3264_v3, %v4795_v43  ;;  %v2226_v57 = vld [vmem:[#allocation2 + $0x169] sm:$0xff] }
 0x29f   : > { %v3297_v63 = vsel %vm1436_vm6, %v3265_v18, %v4796_v32  ;;  %v5122_v5 = vpack.i.bf16 %v2227_v48, %v2226_v57  ;;  %v4801_v40 = vunpack.i.h.bf16 %v4799_v55  ;;  %v4800_v32 = vunpack.i.l.bf16 %v4799_v55 }
 0x2a0   : > { %5093 = vrot.lane.b32.xlu0 %v5082_v24, %s5274_s6  ;;  %5088 = vrot.lane.b32.xlu1 %v5087_v13, %s5272_s26 }
 0x2a2   : > { %v4814_v6 = vpop.permute.xlu0 %4813  ;;  %v4809_v7 = vpop.permute.xlu1 %4808 }
 0x2a3   : > { %v4816_v9 = vunpack.i.h.bf16 %v4814_v6  ;;  %v4815_v34 = vunpack.i.l.bf16 %v4814_v6  ;;  %v4811_v28 = vunpack.i.h.bf16 %v4809_v7  ;;  %v4810_v36 = vunpack.i.l.bf16 %v4809_v7 }
 0x2a4   : > { %5098 = vrot.lane.b32.xlu0 %v5087_v13, %s5269_s12  ;;  %5103 = vrot.lane.b32.xlu1 %v5082_v24, %s5271_s7  ;;  %v7503_v24 = vld [vmem:[#allocation2 + $0x170] sm:$0xff]  ;;  %v4771_v13 = vunpack.i.h.bf16 %v7442_v22  ;;  %v3170_v22 = vsel %vm1304_vm2, %v7201_v54, %v4770_v45  ;;  %v5137_v54 = vpack.i.bf16 %v7298_v38, %v7295_v44 }
 0x2a5   : > { %v3328_v61 = vsel %vm1469_vm7, %v3296_v60, %v4810_v36  ;;  %v3329_v23 = vsel %vm1469_vm7, %v3297_v63, %v4811_v28  ;;  %v5117_v39 = vpack.i.bf16 %v7503_v24, %v7506_v42 }
 0x2a6   : > { %v4819_v21 = vpop.permute.xlu0 %4818  ;;  %v4824_v35 = vpop.permute.xlu1 %4823  ;;  %v3360_v50 = vsel %vm1502_vm8, %v3328_v61, %v4815_v34  ;;  %v3361_v4 = vsel %vm1502_vm8, %v3329_v23, %v4816_v9  ;;  %v3171_v6 = vsel %vm1304_vm2, %v7197_v49, %v4771_v13  ;;  %v3202_v34 = vsel %vm1337_vm3, %v3170_v22, %v4800_v32  ;;  %v2229_v22 = vld [vmem:[#allocation2 + $0x189] sm:$0xff] }
 0x2a7   : > { %v3392_v37 = vpack.c.bf16 %v3361_v4, %v3360_v50  ;;  %v4821_v43 = vunpack.i.h.bf16 %v4819_v21  ;;  %v4820_v3 = vunpack.i.l.bf16 %v4819_v21  ;;  %v3203_v7 = vsel %vm1337_vm3, %v3171_v6, %v4801_v40  ;;  %v2197_v21 = vld [vmem:[#allocation2 + $0x188] sm:$0xff] }
 0x2a8   : > { %5108 = vrot.lane.b32.xlu0 %v5107_v52, %s5273_s30  ;;  %5113 = vrot.lane.b32.xlu1 %v5107_v52, %s5268_s11  ;;  %v4826_v55 = vunpack.i.h.bf16 %v4824_v35  ;;  %v4825_v28 = vunpack.i.l.bf16 %v4824_v35  ;;  %v2245_v40 = vld [vmem:[#allocation2 + $0xca] sm:$0xff]  ;;  %v4806_v32 = vunpack.i.h.bf16 %v7470_v51 }
 0x2a9   : > { %3608 = vmatmul.mubr.bf16.gmra.mxu1 %v3392_v37  ;;  %v3234_v36 = vsel %vm1370_vm4, %v3202_v34, %v4820_v3  ;;  %v3235_v60 = vsel %vm1370_vm4, %v3203_v7, %v4821_v43  ;;  %v4805_v43 = vunpack.i.l.bf16 %v7470_v51  ;;  %v1987_v51 = vld [vmem:[#allocation2 + $0x90] sm:$0xff] }
 0x2aa   : > { %v4829_v62 = vpop.permute.xlu0 %4828  ;;  %v7510_v27 = vpop.permute.xlu1 %4833  ;;  %3955 = vmatprep.mubr.msk.bf16.mxu1 %vm1304_vm2, %v3395_v46  ;;  %v3266_v52 = vsel %vm1403_vm5, %v3234_v36, %v4825_v28  ;;  %v3267_v58 = vsel %vm1403_vm5, %v3235_v60, %v4826_v55  ;;  %v2196_v46 = vld [vmem:[#allocation2 + $0x180] sm:$0xff] }
 0x2ab   : > { %v4831_v63 = vunpack.i.h.bf16 %v4829_v62  ;;  %v4830_v61 = vunpack.i.l.bf16 %v4829_v62  ;;  %v5152_v45 = vpack.i.bf16 %v2197_v21, %v2196_v46  ;;  %v4835_v34 = vunpack.i.l.bf16 %v7510_v27  ;;  %v2228_v60 = vld [vmem:[#allocation2 + $0x181] sm:$0xff] }
 0x2ac   : > { %5123 = vrot.lane.b32.xlu0 %v5122_v5, %s5274_s6  ;;  %5118 = vrot.lane.b32.xlu1 %v5117_v39, %s5272_s26  ;;  %v2199_v46 = vld [vmem:[#allocation2 + $0x1a0] sm:$0xff] }
 0x2ad   : > { %v3298_v50 = vsel %vm1436_vm6, %v3266_v52, %v4830_v61  ;;  %v3299_v4 = vsel %vm1436_vm6, %v3267_v58, %v4831_v63  ;;  %v1988_v63 = vld [vmem:[#allocation2 + $0x98] sm:$0xff]  ;;  %v5157_v52 = vpack.i.bf16 %v2229_v22, %v2228_v60 }
 0x2ae   : > { %v4849_v18 = vpop.permute.xlu0 %4848  ;;  %v7521_v9 = vpop.permute.xlu1 %4838  ;;  %v3173_v58 = vsel %vm1304_vm2, %v1988_v63, %v4806_v32  ;;  %v2231_v32 = vld [vmem:[#allocation2 + $0x1a1] sm:$0xff] }
 0x2af   : > { %v4851_v48 = vunpack.i.h.bf16 %v4849_v18  ;;  %v4850_v37 = vunpack.i.l.bf16 %v4849_v18  ;;  %v2246_v60 = vld [vmem:[#allocation2 + $0xda] sm:$0xff] }
 0x2b0   : > { %5128 = vrot.lane.b32.xlu0 %v5117_v39, %s5269_s12  ;;  %5133 = vrot.lane.b32.xlu1 %v5122_v5, %s5271_s7  ;;  %v2244_v39 = vld [vmem:[#allocation2 + $0xc2] sm:$0xff] }
 0x2b1   : > { %v3397_v36 = vpack.c.bf16 %v2245_v40, %v2244_v39  ;;  %v2230_v40 = vld [vmem:[#allocation2 + $0x199] sm:$0xff] }
 0x2b2   : > { %v4854_v49 = vpop.permute.xlu0 %4853  ;;  %v4844_v23 = vpop.permute.xlu1 %4843 }
 0x2b3   : > { %v4846_v2 = vunpack.i.h.bf16 %v4844_v23  ;;  %v4845_v35 = vunpack.i.l.bf16 %v4844_v23  ;;  %v4856_v55 = vunpack.i.h.bf16 %v4854_v49  ;;  %v4855_v28 = vunpack.i.l.bf16 %v4854_v49 }
 0x2b4   : > { %5138 = vrot.lane.b32.xlu0 %v5137_v54, %s5273_s30  ;;  %5143 = vrot.lane.b32.xlu1 %v5122_v5, %s5267_s10  ;;  %v4836_v5 = vunpack.i.h.bf16 %v7510_v27  ;;  %v3172_v27 = vsel %vm1304_vm2, %v1987_v51, %v4805_v43  ;;  %v2247_v51 = vld [vmem:[#allocation2 + $0xe2] sm:$0xff]  ;;  %s215_s10 = sand.u32 1, %s5257_s19  }
 0x2b5   : > { %v3330_v57 = vsel %vm1469_vm7, %v3298_v50, %v4845_v35  ;;  %v3331_v62 = vsel %vm1469_vm7, %v3299_v4, %v4846_v2  ;;  %v3204_v2 = vsel %vm1337_vm3, %v3172_v27, %v4835_v34  ;;  %s7915_s16 = scalar_lea.sflag [#allocation4], %s215_s10 }
 0x2b6   : > { %v4864_v13 = vpop.permute.xlu0 %4863  ;;  %v4859_v3 = vpop.permute.xlu1 %4858  ;;  %v3362_v6 = vsel %vm1502_vm8, %v3330_v57, %v4850_v37  ;;  %v3363_v18 = vsel %vm1502_vm8, %v3331_v62, %v4851_v48  ;;  %v3205_v49 = vsel %vm1337_vm3, %v3173_v58, %v4836_v5  ;;  %v3236_v35 = vsel %vm1370_vm4, %v3204_v2, %v4855_v28  ;;  %v2198_v37 = vld [vmem:[#allocation2 + $0x198] sm:$0xff] }
 0x2b7   : > { %v3394_v7 = vpack.c.bf16 %v3363_v18, %v3362_v6  ;;  %v4861_v61 = vunpack.i.h.bf16 %v4859_v3  ;;  %v4860_v23 = vunpack.i.l.bf16 %v4859_v3  ;;  %v3237_v50 = vsel %vm1370_vm4, %v3205_v49, %v4856_v55 }
 0x2b8   : > { %5148 = vrot.lane.b32.xlu0 %v5137_v54, %s5268_s11  ;;  %5153 = vrot.lane.b32.xlu1 %v5152_v45, %s5272_s26  ;;  %v4866_v4 = vunpack.i.h.bf16 %v4864_v13  ;;  %v4865_v48 = vunpack.i.l.bf16 %v4864_v13  ;;  %v5172_v18 = vpack.i.bf16 %v7310_v8, %v7308_v16  ;;  %v5177_v13 = vpack.i.bf16 %v2199_v46, %v2198_v37  ;;  %v1989_v46 = vld [vmem:[#allocation2 + $0xa8] sm:$0xff] }
 0x2b9   : > { %3616 = vmatmul.mubr.bf16.gmra.mxu1 %v3394_v7  ;;  %v3268_v57 = vsel %vm1403_vm5, %v3236_v35, %v4860_v23  ;;  %v3269_v62 = vsel %vm1403_vm5, %v3237_v50, %v4861_v61  ;;  %v5182_v7 = vpack.i.bf16 %v2231_v32, %v2230_v40  ;;  %v3399_v58 = vpack.c.bf16 %v2247_v51, %v2246_v60 }
 0x2ba   : > { %v7547_v21 = vpop.permute.xlu0 %4873  ;;  %v4869_v54 = vpop.permute.xlu1 %4868  ;;  %3956 = vmatprep.mubr.msk.bf16.mxu1 %vm1304_vm2, %v3397_v36  ;;  %v3301_v34 = vsel %vm1436_vm6, %v3269_v62, %v4866_v4  ;;  %v4841_v49 = vunpack.i.h.bf16 %v7521_v9  ;;  %v4840_v2 = vunpack.i.l.bf16 %v7521_v9 }
 0x2bb   : > { %v4871_v50 = vunpack.i.h.bf16 %v4869_v54  ;;  %v4870_v4 = vunpack.i.l.bf16 %v4869_v54 }
 0x2bc   : > { %5158 = vrot.lane.b32.xlu0 %v5157_v52, %s5274_s6  ;;  %5163 = vrot.lane.b32.xlu1 %v5152_v45, %s5269_s12  ;;  %v3300_v45 = vsel %vm1436_vm6, %v3268_v57, %v4865_v48  ;;  %v1990_v57 = vld [vmem:[#allocation2 + $0xb0] sm:$0xff]  ;;  %v3174_v40 = vsel %vm1304_vm2, %v1989_v46, %v4840_v2 }
 0x2be   : > { %v4884_v39 = vpop.permute.xlu0 %4883  ;;  %v4879_v6 = vpop.permute.xlu1 %4878 }
 0x2bf   : > { %v4886_v43 = vunpack.i.h.bf16 %v4884_v39  ;;  %v4885_v3 = vunpack.i.l.bf16 %v4884_v39  ;;  %v4881_v22 = vunpack.i.h.bf16 %v4879_v6  ;;  %v4880_v5 = vunpack.i.l.bf16 %v4879_v6 }
 0x2c0   : > { %5168 = vrot.lane.b32.xlu0 %v5157_v52, %s5271_s7  ;;  %5173 = vrot.lane.b32.xlu1 %v5172_v18, %s5273_s30  ;;  %v3175_v39 = vsel %vm1304_vm2, %v1990_v57, %v4841_v49  ;;  %s3912_s7 = sshll.u32 %s215_s10, 8  ;;  %s3971_s30 = sshll.u32 %s5330_s22, 12 }
 0x2c1   : > { %v3332_v55 = vsel %vm1469_vm7, %v3300_v45, %v4880_v5  ;;  %v3333_v28 = vsel %vm1469_vm7, %v3301_v34, %v4881_v22  ;;  %v3207_v9 = vsel %vm1337_vm3, %v3175_v39, %v4871_v50  ;;  %v1992_v39 = vld [vmem:[#allocation2 + $0xc8] sm:$0xff]  ;;  %s7908_s15 = scalar_lea.hbm %s7960_s5, %s3971_s30 }
 0x2c2   : > { %v4889_v36 = vpop.permute.xlu0 %4888  ;;  %v4894_v63 = vpop.permute.xlu1 %4893  ;;  %v3364_v61 = vsel %vm1502_vm8, %v3332_v55, %v4885_v3  ;;  %v3365_v23 = vsel %vm1502_vm8, %v3333_v28, %v4886_v43  ;;  %v3206_v43 = vsel %vm1337_vm3, %v3174_v40, %v4870_v4 }
 0x2c3   : > { %v3396_v52 = vpack.c.bf16 %v3365_v23, %v3364_v61  ;;  %v4891_v48 = vunpack.i.h.bf16 %v4889_v36  ;;  %v4890_v37 = vunpack.i.l.bf16 %v4889_v36  ;;  %v4896_v3 = vunpack.i.h.bf16 %v4894_v63 }
 0x2c4   : > { %5178 = vrot.lane.b32.xlu0 %v5177_v13, %s5272_s26  ;;  %5183 = vrot.lane.b32.xlu1 %v5182_v7, %s5274_s6  ;;  %v4895_v6 = vunpack.i.l.bf16 %v4894_v63  ;;  %s7776_s26 = scalar_lea.vmem [#allocation3], %s3912_s7 }
 0x2c5   : > { %3624 = vmatmul.mubr.bf16.gmra.mxu1 %v3396_v52  ;;  %v3238_v18 = vsel %vm1370_vm4, %v3206_v43, %v4890_v37  ;;  %v3239_v54 = vsel %vm1370_vm4, %v3207_v9, %v4891_v48  ;;  %s3846_s6 = sshll.u32 %s7776_s26, 4  ;;  %s7910_s6 = int_to_ptr.vmem [resolvable:$true] %s3846_s6 }
 0x2c6   : > { %v4899_v27 = vpop.permute.xlu0 %4898  ;;  %v4904_v35 = vpop.permute.xlu1 %4903  ;;  %3957 = vmatprep.mubr.msk.bf16.mxu1 %vm1304_vm2, %v3399_v58  ;;  %v3270_v34 = vsel %vm1403_vm5, %v3238_v18, %v4895_v6  ;;  %v3271_v7 = vsel %vm1403_vm5, %v3239_v54, %v4896_v3  ;;  %v4876_v58 = vunpack.i.h.bf16 %v7547_v21  ;;  %s5205_s22 = scalar_lea.vmem %s7910_s6, 4096  ;;  %p5212_p0 = scmp.lt.s32.totalorder %s7910_s6, %s5210_s23 }
 0x2c7   : > { %v4901_v22 = vunpack.i.h.bf16 %v4899_v27  ;;  %v4900_v5 = vunpack.i.l.bf16 %v4899_v27  ;;  %v4875_v27 = vunpack.i.l.bf16 %v7547_v21  ;;  %v4906_v4 = vunpack.i.h.bf16 %v4904_v35  ;;  %p5206_p11 = scmp.ne.s32.totalorder %s7910_s6, %s5205_s22  ;;  %p5213_p1 = scmp.lt.s32.totalorder %s5211_s25, %s5205_s22 }
 0x2c8   : > { %v4905_v48 = vunpack.i.l.bf16 %v4904_v35  ;;  %v3177_v3 = vsel %vm1304_vm2, %v1992_v39, %v4876_v58  ;;  %v1994_v39 = vld [vmem:[#allocation2 + $0xe0] sm:$0xff] }
 0x2c9   : > { %v3302_v36 = vsel %vm1436_vm6, %v3270_v34, %v4900_v5  ;;  %v3303_v60 = vsel %vm1436_vm6, %v3271_v7, %v4901_v22  ;;  %v3209_v35 = vsel %vm1337_vm3, %v3177_v3, %v4906_v4  ;;  %p5207_p12 = pnand %p5206_p11, %p5347_p5  ;;  %p5214_p2 = por %p5213_p1, %p5212_p0 }
 0x2ca   : > { %v4919_v62 = vpop.permute.xlu0 %4918  ;;  %v7577_v32 = vpop.permute.xlu1 %4908 }
 0x2cb   : > { %v4921_v51 = vunpack.i.h.bf16 %v4919_v62  ;;  %v4920_v63 = vunpack.i.l.bf16 %v4919_v62  ;;  %v1991_v62 = vld [vmem:[#allocation2 + $0xc0] sm:$0xff]  ;;  %p5208_p13 = pneg %p5207_p12 }
 0x2cc   : > { %v3176_v21 = vsel %vm1304_vm2, %v1991_v62, %v4875_v27  ;;  %v1993_v62 = vld [vmem:[#allocation2 + $0xd8] sm:$0xff] }
 0x2cd   : > { %v3208_v18 = vsel %vm1337_vm3, %v3176_v21, %v4905_v48  ;;  %p5215_p3 = pnand %p5214_p2, %p5208_p13 }
 0x2ce   : > { %v4924_v13 = vpop.permute.xlu0 %4923  ;;  %v4914_v45 = vpop.permute.xlu1 %4913 }
 0x2cf   : > { %v4916_v55 = vunpack.i.h.bf16 %v4914_v45  ;;  %v4915_v28 = vunpack.i.l.bf16 %v4914_v45  ;;  %v4926_v46 = vunpack.i.h.bf16 %v4924_v13  ;;  %v4925_v57 = vunpack.i.l.bf16 %v4924_v13 }
 0x2d1   : > { %v3334_v61 = vsel %vm1469_vm7, %v3302_v36, %v4915_v28  ;;  %v3335_v23 = vsel %vm1469_vm7, %v3303_v60, %v4916_v55  ;;  %v3240_v54 = vsel %vm1370_vm4, %v3208_v18, %v4925_v57  ;;  %v3241_v22 = vsel %vm1370_vm4, %v3209_v35, %v4926_v46 }
 0x2d2   : > { %v4934_v52 = vpop.permute.xlu0 %4933  ;;  %v4929_v49 = vpop.permute.xlu1 %4928  ;;  %v3366_v2 = vsel %vm1502_vm8, %v3334_v61, %v4920_v63  ;;  %v3367_v50 = vsel %vm1502_vm8, %v3335_v23, %v4921_v51 }
 0x2d3   : > { %v3398_v37 = vpack.c.bf16 %v3367_v50, %v3366_v2  ;;  %v4931_v40 = vunpack.i.h.bf16 %v4929_v49  ;;  %v4930_v43 = vunpack.i.l.bf16 %v4929_v49  ;;  %v4936_v5 = vunpack.i.h.bf16 %v4934_v52 }
 0x2d4   : > { %v4935_v13 = vunpack.i.l.bf16 %v4934_v52  ;;  %v4911_v2 = vunpack.i.h.bf16 %v7577_v32  ;;  %v4910_v50 = vunpack.i.l.bf16 %v7577_v32 }
 0x2d5   : > { %3632 = vmatmul.mubr.bf16.gmra.mxu1 %v3398_v37  ;;  %v3272_v45 = vsel %vm1403_vm5, %v3240_v54, %v4930_v43  ;;  %v3273_v34 = vsel %vm1403_vm5, %v3241_v22, %v4931_v40 }
 0x2d6   : > { %v7593_v9 = vpop.permute.xlu0 %4943  ;;  %v4939_v6 = vpop.permute.xlu1 %4938  ;;  %3958 = vmatprep.mubr.msk.bf16.mxu1 %vm1304_vm2, %v3401_v10  ;;  %v3304_v36 = vsel %vm1436_vm6, %v3272_v45, %v4935_v13  ;;  %v3305_v60 = vsel %vm1436_vm6, %v3273_v34, %v4936_v5  ;;  %v3179_v43 = vsel %vm1304_vm2, %v1994_v39, %v4911_v2  ;;  %v3178_v3 = vsel %vm1304_vm2, %v1993_v62, %v4910_v50 }
 0x2d7   : > { %v4941_v48 = vunpack.i.h.bf16 %v4939_v6  ;;  %v4940_v37 = vunpack.i.l.bf16 %v4939_v6 }
 0x2d9   : > { %v3210_v32 = vsel %vm1337_vm3, %v3178_v3, %v4940_v37  ;;  %v3211_v35 = vsel %vm1337_vm3, %v3179_v43, %v4941_v48  ;;  %v1995_v48 = vld [vmem:[#allocation2 + $0xf0] sm:$0xff]  ;;  %v1996_v37 = vld [vmem:[#allocation2 + $0xf8] sm:$0xff]  ;;  %v8356_v43 = vpack.c.bf16 %v7257_v31, %v7253_v17 }
 0x2da   : > { %v4954_v7 = vpop.permute.xlu0 %4953  ;;  %v4949_v11 = vpop.permute.xlu1 %4948 }
 0x2db   : > { %v4956_v55 = vunpack.i.h.bf16 %v4954_v7  ;;  %v4955_v28 = vunpack.i.l.bf16 %v4954_v7  ;;  %v4951_v25 = vunpack.i.h.bf16 %v4949_v11  ;;  %v4950_v10 = vunpack.i.l.bf16 %v4949_v11 }
 0x2dd   : > { %v3336_v51 = vsel %vm1469_vm7, %v3304_v36, %v4950_v10  ;;  %v3337_v63 = vsel %vm1469_vm7, %v3305_v60, %v4951_v25 }
 0x2de   : > { %v4959_v61 = vpop.permute.xlu0 %4958  ;;  %v4964_v23 = vpop.permute.xlu1 %4963  ;;  %v3368_v52 = vsel %vm1502_vm8, %v3336_v51, %v4955_v28  ;;  %v3369_v58 = vsel %vm1502_vm8, %v3337_v63, %v4956_v55  ;;  %v4946_v51 = vunpack.i.h.bf16 %v7593_v9  ;;  %v4945_v63 = vunpack.i.l.bf16 %v7593_v9 }
 0x2df   : > { %v3400_v27 = vpack.c.bf16 %v3369_v58, %v3368_v52  ;;  %v4961_v46 = vunpack.i.h.bf16 %v4959_v61  ;;  %v4960_v57 = vunpack.i.l.bf16 %v4959_v61  ;;  %v4966_v15 = vunpack.i.h.bf16 %v4964_v23 }
 0x2e0   : > { %v4965_v33 = vunpack.i.l.bf16 %v4964_v23  ;;  %v3181_v39 = vsel %vm1304_vm2, %v1996_v37, %v4946_v51  ;;  %v3180_v9 = vsel %vm1304_vm2, %v1995_v48, %v4945_v63 }
 0x2e1   : > { %3640 = vmatmul.mubr.bf16.gmra.mxu1 %v3400_v27  ;;  %v3243_v6 = vsel %vm1370_vm4, %v3211_v35, %v4961_v46 }
 0x2e2   : > { %v4969_v49 = vpop.permute.xlu0 %4968  ;;  %v4974_v4 = vpop.permute.xlu1 %4973  ;;  %3959 = vmatprep.mubr.msk.bf16.mxu1 %vm1304_vm2, %v3403_v53  ;;  %v3242_v53 = vsel %vm1370_vm4, %v3210_v32, %v4960_v57  ;;  %v3275_v45 = vsel %vm1403_vm5, %v3243_v6, %v4966_v15 }
 0x2e3   : > { %v4971_v18 = vunpack.i.h.bf16 %v4969_v49  ;;  %v4970_v54 = vunpack.i.l.bf16 %v4969_v49  ;;  %v3274_v13 = vsel %vm1403_vm5, %v3242_v53, %v4965_v33  ;;  %v4976_v58 = vunpack.i.h.bf16 %v4974_v4 }
 0x2e4   : > { %v4975_v27 = vunpack.i.l.bf16 %v4974_v4 }
 0x2e5   : > { %v3306_v55 = vsel %vm1436_vm6, %v3274_v13, %v4970_v54  ;;  %v3307_v28 = vsel %vm1436_vm6, %v3275_v45, %v4971_v18  ;;  %v3213_v4 = vsel %vm1337_vm3, %v3181_v39, %v4976_v58 }
 0x2e6   : > { %v4989_v40 = vpop.permute.xlu0 %4988  ;;  %v7621_v21 = vpop.permute.xlu1 %4978  ;;  %v3212_v3 = vsel %vm1337_vm3, %v3180_v9, %v4975_v27 }
 0x2e7   : > { %v4991_v11 = vunpack.i.h.bf16 %v4989_v40  ;;  %v4990_v25 = vunpack.i.l.bf16 %v4989_v40  ;;  %v4980_v51 = vunpack.i.l.bf16 %v7621_v21 }
 0x2ea   : > { %v4994_v22 = vpop.permute.xlu0 %4993  ;;  %v4984_v5 = vpop.permute.xlu1 %4983 }
 0x2eb   : > { %v4986_v34 = vunpack.i.h.bf16 %v4984_v5  ;;  %v4985_v7 = vunpack.i.l.bf16 %v4984_v5  ;;  %v4996_v2 = vunpack.i.h.bf16 %v4994_v22  ;;  %v4995_v50 = vunpack.i.l.bf16 %v4994_v22 }
 0x2ed   : > { %v3338_v10 = vsel %vm1469_vm7, %v3306_v55, %v4985_v7  ;;  %v3339_v36 = vsel %vm1469_vm7, %v3307_v28, %v4986_v34  ;;  %v3244_v32 = vsel %vm1370_vm4, %v3212_v3, %v4995_v50  ;;  %v3245_v35 = vsel %vm1370_vm4, %v3213_v4, %v4996_v2 }
 0x2ee   : > { %v5004_v60 = vpop.permute.xlu0 %5003  ;;  %v4999_v61 = vpop.permute.xlu1 %4998  ;;  %v3370_v23 = vsel %vm1502_vm8, %v3338_v10, %v4990_v25  ;;  %v3371_v52 = vsel %vm1502_vm8, %v3339_v36, %v4991_v11  ;;  %v3182_v50 = vsel %vm1304_vm2, %v7352_v29, %v4980_v51 }
 0x2ef   : > { %v3402_v49 = vpack.c.bf16 %v3371_v52, %v3370_v23  ;;  %v5001_v46 = vunpack.i.h.bf16 %v4999_v61  ;;  %v5000_v57 = vunpack.i.l.bf16 %v4999_v61  ;;  %v5006_v15 = vunpack.i.h.bf16 %v5004_v60 }
 0x2f0   : > { %v5005_v33 = vunpack.i.l.bf16 %v5004_v60  ;;  %v4981_v60 = vunpack.i.h.bf16 %v7621_v21  ;;  %v8357_v61 = vpack.c.bf16 %v7271_v20, %v7267_v26 }
 0x2f1   : > { %3648 = vmatmul.mubr.bf16.gmra.mxu1 %v3402_v49  ;;  %v3276_v53 = vsel %vm1403_vm5, %v3244_v32, %v5000_v57  ;;  %v3277_v6 = vsel %vm1403_vm5, %v3245_v35, %v5001_v46 }
 0x2f2   : > { %v7637_v62 = vpop.permute.xlu0 %5013  ;;  %v5009_v40 = vpop.permute.xlu1 %5008  ;;  %3960 = vmatprep.mubr.msk.bf16.mxu1 %vm1304_vm2, %v8356_v43  ;;  %v3308_v13 = vsel %vm1436_vm6, %v3276_v53, %v5005_v33  ;;  %v3309_v45 = vsel %vm1436_vm6, %v3277_v6, %v5006_v15  ;;  %v3183_v2 = vsel %vm1304_vm2, %v7348_v14, %v4981_v60  ;;  %v8358_v60 = vpack.c.bf16 %v7285_v59, %v7281_v12 }
 0x2f3   : > { %v5011_v23 = vunpack.i.h.bf16 %v5009_v40  ;;  %v5010_v52 = vunpack.i.l.bf16 %v5009_v40 }
 0x2f5   : > { %v3214_v21 = vsel %vm1337_vm3, %v3182_v50, %v5010_v52  ;;  %v3215_v37 = vsel %vm1337_vm3, %v3183_v2, %v5011_v23 }
 0x2f6   : > { %v5024_v18 = vpop.permute.xlu0 %5023  ;;  %v5019_v17 = vpop.permute.xlu1 %5018 }
 0x2f7   : > { %v5026_v54 = vunpack.i.h.bf16 %v5024_v18  ;;  %v5025_v22 = vunpack.i.l.bf16 %v5024_v18  ;;  %v5021_v31 = vunpack.i.h.bf16 %v5019_v17  ;;  %v5020_v5 = vunpack.i.l.bf16 %v5019_v17 }
 0x2f9   : > { %v3340_v34 = vsel %vm1469_vm7, %v3308_v13, %v5020_v5  ;;  %v3341_v7 = vsel %vm1469_vm7, %v3309_v45, %v5021_v31 }
 0x2fa   : > { %v5029_v55 = vpop.permute.xlu0 %5028  ;;  %v5034_v28 = vpop.permute.xlu1 %5033  ;;  %v3372_v11 = vsel %vm1502_vm8, %v3340_v34, %v5025_v22  ;;  %v3373_v25 = vsel %vm1502_vm8, %v3341_v7, %v5026_v54  ;;  %v5016_v54 = vunpack.i.h.bf16 %v7637_v62  ;;  %v5015_v22 = vunpack.i.l.bf16 %v7637_v62 }
 0x2fb   : > { %v3404_v10 = vpack.c.bf16 %v3373_v25, %v3372_v11  ;;  %v5031_v58 = vunpack.i.h.bf16 %v5029_v55  ;;  %v5030_v27 = vunpack.i.l.bf16 %v5029_v55  ;;  %v5036_v26 = vunpack.i.h.bf16 %v5034_v28 }
 0x2fc   : > { %v5035_v20 = vunpack.i.l.bf16 %v5034_v28  ;;  %v3184_v62 = vsel %vm1304_vm2, %v7390_v41, %v5015_v22 }
 0x2fd   : > { %3656 = vmatmul.mubr.bf16.gmra.mxu1 %v3404_v10  ;;  %v3246_v46 = vsel %vm1370_vm4, %v3214_v21, %v5030_v27  ;;  %v3247_v57 = vsel %vm1370_vm4, %v3215_v37, %v5031_v58  ;;  %v3185_v10 = vsel %vm1304_vm2, %v7385_v19, %v5016_v54 }
 0x2fe   : > { %v5039_v36 = vpop.permute.xlu0 %5038  ;;  %v5044_v63 = vpop.permute.xlu1 %5043  ;;  %3961 = vmatprep.mubr.msk.bf16.mxu1 %vm1304_vm2, %v8357_v61  ;;  %v3278_v14 = vsel %vm1403_vm5, %v3246_v46, %v5035_v20  ;;  %v3279_v29 = vsel %vm1403_vm5, %v3247_v57, %v5036_v26 }
 0x2ff   : > { %v5041_v39 = vunpack.i.h.bf16 %v5039_v36  ;;  %v5040_v9 = vunpack.i.l.bf16 %v5039_v36  ;;  %v5046_v13 = vunpack.i.h.bf16 %v5044_v63  ;;  %v5045_v45 = vunpack.i.l.bf16 %v5044_v63 }
 0x301   : > { %v3310_v32 = vsel %vm1436_vm6, %v3278_v14, %v5040_v9  ;;  %v3311_v35 = vsel %vm1436_vm6, %v3279_v29, %v5041_v39  ;;  %v3217_v51 = vsel %vm1337_vm3, %v3185_v10, %v5046_v13  ;;  %v3216_v63 = vsel %vm1337_vm3, %v3184_v62, %v5045_v45 }
 0x302   : > { %v5059_v49 = vpop.permute.xlu0 %5058  ;;  %v7667_v48 = vpop.permute.xlu1 %5048 }
 0x303   : > { %v5061_v15 = vunpack.i.h.bf16 %v5059_v49  ;;  %v5060_v33 = vunpack.i.l.bf16 %v5059_v49  ;;  %v5051_v57 = vunpack.i.h.bf16 %v7667_v48  ;;  %v5050_v39 = vunpack.i.l.bf16 %v7667_v48 }
 0x304   : > { %v8359_v48 = vpack.c.bf16 %v7298_v38, %v7295_v44 }
 0x306   : > { %v5064_v40 = vpop.permute.xlu0 %5063  ;;  %v5054_v43 = vpop.permute.xlu1 %5053 }
 0x307   : > { %v5056_v4 = vunpack.i.h.bf16 %v5054_v43  ;;  %v5055_v3 = vunpack.i.l.bf16 %v5054_v43  ;;  %v5066_v7 = vunpack.i.h.bf16 %v5064_v40  ;;  %v5065_v55 = vunpack.i.l.bf16 %v5064_v40 }
 0x309   : > { %v3342_v53 = vsel %vm1469_vm7, %v3310_v32, %v5055_v3  ;;  %v3343_v6 = vsel %vm1469_vm7, %v3311_v35, %v5056_v4  ;;  %v3248_v61 = vsel %vm1370_vm4, %v3216_v63, %v5065_v55  ;;  %v3249_v23 = vsel %vm1370_vm4, %v3217_v51, %v5066_v7 }
 0x30a   : > { %v5074_v18 = vpop.permute.xlu0 %5073  ;;  %v5069_v17 = vpop.permute.xlu1 %5068  ;;  %v3374_v31 = vsel %vm1502_vm8, %v3342_v53, %v5060_v33  ;;  %v3375_v5 = vsel %vm1502_vm8, %v3343_v6, %v5061_v15  ;;  %v3187_v15 = vsel %vm1304_vm2, %v7430_v0, %v5051_v57  ;;  %v3186_v33 = vsel %vm1304_vm2, %v7434_v47, %v5050_v39 }
 0x30b   : > { %v3406_v34 = vpack.c.bf16 %v3375_v5, %v3374_v31  ;;  %v5071_v28 = vunpack.i.h.bf16 %v5069_v17  ;;  %v5070_v11 = vunpack.i.l.bf16 %v5069_v17  ;;  %v5076_v52 = vunpack.i.h.bf16 %v5074_v18 }
 0x30c   : > { %v5075_v58 = vunpack.i.l.bf16 %v5074_v18 }
 0x30d   : > { %3664 = vmatmul.mubr.bf16.gmra.mxu1 %v3406_v34  ;;  %v3280_v19 = vsel %vm1403_vm5, %v3248_v61, %v5070_v11  ;;  %v3281_v41 = vsel %vm1403_vm5, %v3249_v23, %v5071_v28 }
 0x30e   : > { %v7683_v25 = vpop.permute.xlu0 %5083  ;;  %v5079_v36 = vpop.permute.xlu1 %5078  ;;  %3962 = vmatprep.mubr.msk.bf16.mxu1 %vm1304_vm2, %v8358_v60  ;;  %v3312_v21 = vsel %vm1436_vm6, %v3280_v19, %v5075_v58  ;;  %v3313_v37 = vsel %vm1436_vm6, %v3281_v41, %v5076_v52 }
 0x30f   : > { %v5081_v14 = vunpack.i.h.bf16 %v5079_v36  ;;  %v5080_v29 = vunpack.i.l.bf16 %v5079_v36  ;;  %v5085_v61 = vunpack.i.l.bf16 %v7683_v25  ;;  %v5086_v52 = vunpack.i.h.bf16 %v7683_v25 }
 0x311   : > { %v3218_v6 = vsel %vm1337_vm3, %v3186_v33, %v5080_v29  ;;  %v3219_v18 = vsel %vm1337_vm3, %v3187_v15, %v5081_v14 }
 0x312   : > { %v5094_v27 = vpop.permute.xlu0 %5093  ;;  %v5089_v12 = vpop.permute.xlu1 %5088 }
 0x313   : > { %v5096_v49 = vunpack.i.h.bf16 %v5094_v27  ;;  %v5095_v2 = vunpack.i.l.bf16 %v5094_v27  ;;  %v5091_v59 = vunpack.i.h.bf16 %v5089_v12  ;;  %v5090_v50 = vunpack.i.l.bf16 %v5089_v12 }
 0x314   : > { %v3188_v12 = vsel %vm1304_vm2, %v7472_v1, %v5085_v61 }
 0x315   : > { %v3344_v26 = vsel %vm1469_vm7, %v3312_v21, %v5090_v50  ;;  %v3345_v20 = vsel %vm1469_vm7, %v3313_v37, %v5091_v59  ;;  %v3189_v59 = vsel %vm1304_vm2, %v7467_v56, %v5086_v52 }
 0x316   : > { %v5099_v46 = vpop.permute.xlu0 %5098  ;;  %v5104_v9 = vpop.permute.xlu1 %5103  ;;  %v3376_v40 = vsel %vm1502_vm8, %v3344_v26, %v5095_v2  ;;  %v3377_v43 = vsel %vm1502_vm8, %v3345_v20, %v5096_v49 }
 0x317   : > { %v3408_v4 = vpack.c.bf16 %v3377_v43, %v3376_v40  ;;  %v5101_v3 = vunpack.i.h.bf16 %v5099_v46  ;;  %v5100_v32 = vunpack.i.l.bf16 %v5099_v46  ;;  %v5106_v54 = vunpack.i.h.bf16 %v5104_v9 }
 0x318   : > { %v5105_v22 = vunpack.i.l.bf16 %v5104_v9 }
 0x319   : > { %3672 = vmatmul.mubr.bf16.gmra.mxu1 %v3408_v4  ;;  %v3250_v17 = vsel %vm1370_vm4, %v3218_v6, %v5100_v32  ;;  %v3251_v31 = vsel %vm1370_vm4, %v3219_v18, %v5101_v3  ;;  %v2262_v4 = vld [vmem:[#allocation2 + $0x19a] sm:$0xff]  ;;  %v2263_v3 = vld [vmem:[#allocation2 + $0x1a2] sm:$0xff] }
 0x31a   : > { %v5109_v35 = vpop.permute.xlu0 %5108  ;;  %v5114_v53 = vpop.permute.xlu1 %5113  ;;  %3963 = vmatprep.mubr.msk.bf16.mxu1 %vm1304_vm2, %v8359_v48  ;;  %v3282_v44 = vsel %vm1403_vm5, %v3250_v17, %v5105_v22  ;;  %v3283_v38 = vsel %vm1403_vm5, %v3251_v31, %v5106_v54  ;;  %v7751_v22 = vld [vmem:[%s7959_s4] ss:$0 sm:$0xff] }
 0x31b   : > { %v5111_v0 = vunpack.i.h.bf16 %v5109_v35  ;;  %v5110_v5 = vunpack.i.l.bf16 %v5109_v35  ;;  %v5115_v58 = vunpack.i.l.bf16 %v5114_v53  ;;  %v5116_v19 = vunpack.i.h.bf16 %v5114_v53 }
 0x31d   : > { %v3314_v28 = vsel %vm1436_vm6, %v3282_v44, %v5110_v5  ;;  %v3315_v11 = vsel %vm1436_vm6, %v3283_v38, %v5111_v0  ;;  %v3220_v25 = vsel %vm1337_vm3, %v3188_v12, %v5115_v58  ;;  %v3221_v21 = vsel %vm1337_vm3, %v3189_v59, %v5116_v19  ;;  %v8361_v58 = vld [vmem:[#allocation15_spill] sm:$0xff] }
 0x31e   : > { %v5124_v13 = vpop.permute.xlu0 %5123  ;;  %v5119_v34 = vpop.permute.xlu1 %5118  ;;  %v3415_v5 = vpack.c.bf16 %v2263_v3, %v2262_v4  ;;  %v3705_v19 = vsel %vm1304_vm2, %v8361_v58, 0.0  ;;  %v8363_v4 = vld [vmem:[#allocation9_spill] sm:$0xff] }
 0x31f   : > { %v5126_v47 = vunpack.i.h.bf16 %v5124_v13  ;;  %v5125_v45 = vunpack.i.l.bf16 %v5124_v13  ;;  %v5121_v7 = vunpack.i.h.bf16 %v5119_v34  ;;  %v5120_v55 = vunpack.i.l.bf16 %v5119_v34  ;;  %v8360_v34 = vld [vmem:[#allocation14_spill] sm:$0xff]  ;;  %v8368_v58 = vld [vmem:[#allocation17_spill] sm:$0xff] }
 0x320   : > { %v3704_v44 = vsel %vm1304_vm2, %v8360_v34, 0.0  ;;  %v3707_v3 = vsel %vm1304_vm2, %v8363_v4, 0.0 }
 0x321   : > { %v3346_v10 = vsel %vm1469_vm7, %v3314_v28, %v5120_v55  ;;  %v3347_v62 = vsel %vm1469_vm7, %v3315_v11, %v5121_v7 }
 0x322   : > { %v5129_v36 = vpop.permute.xlu0 %5128  ;;  %v5134_v60 = vpop.permute.xlu1 %5133  ;;  %v3378_v51 = vsel %vm1502_vm8, %v3346_v10, %v5125_v45  ;;  %v3379_v63 = vsel %vm1502_vm8, %v3347_v62, %v5126_v47 }
 0x323   : > { %v3410_v23 = vpack.c.bf16 %v3379_v63, %v3378_v51  ;;  %v5130_v41 = vunpack.i.l.bf16 %v5129_v36  ;;  %v5131_v49 = vunpack.i.h.bf16 %v5129_v36  ;;  %v5135_v50 = vunpack.i.l.bf16 %v5134_v60 }
 0x324   : > { %v5136_v26 = vunpack.i.h.bf16 %v5134_v60 }
 0x325   : > { %3680 = vmatmul.mubr.bf16.gmra.mxu1 %v3410_v23  ;;  %v3252_v37 = vsel %vm1370_vm4, %v3220_v25, %v5130_v41  ;;  %v3253_v16 = vsel %vm1370_vm4, %v3221_v21, %v5131_v49 }
 0x326   : > { %v5139_v27 = vpop.permute.xlu0 %5138  ;;  %v5144_v2 = vpop.permute.xlu1 %5143  ;;  %3964 = vmatprep.mubr.msk.bf16.mxu1 %vm1304_vm2, %v3413_v30  ;;  %v3284_v1 = vsel %vm1403_vm5, %v3252_v37, %v5135_v50  ;;  %v3285_v56 = vsel %vm1403_vm5, %v3253_v16, %v5136_v26 }
 0x327   : > { %v5140_v20 = vunpack.i.l.bf16 %v5139_v27  ;;  %v5141_v8 = vunpack.i.h.bf16 %v5139_v27  ;;  %v5145_v9 = vunpack.i.l.bf16 %v5144_v2  ;;  %v5146_v43 = vunpack.i.h.bf16 %v5144_v2 }
 0x329   : > { %v3316_v40 = vsel %vm1436_vm6, %v3284_v1, %v5140_v20  ;;  %v3317_v32 = vsel %vm1436_vm6, %v3285_v56, %v5141_v8  ;;  %v3190_v17 = vsel %vm1304_vm2, %v7506_v42, %v5145_v9  ;;  %v3191_v13 = vsel %vm1304_vm2, %v7503_v24, %v5146_v43  ;;  %v8362_v9 = vld [vmem:[#allocation8_spill] sm:$0xff] }
 0x32a   : > { %v5149_v46 = vpop.permute.xlu0 %5148  ;;  %v5154_v30 = vpop.permute.xlu1 %5153  ;;  %v3706_v56 = vsel %vm1304_vm2, %v8362_v9, 0.0 }
 0x32b   : > { %v5156_v57 = vunpack.i.h.bf16 %v5154_v30  ;;  %v5155_v39 = vunpack.i.l.bf16 %v5154_v30  ;;  %v5150_v14 = vunpack.i.l.bf16 %v5149_v46  ;;  %v5151_v35 = vunpack.i.h.bf16 %v5149_v46 }
 0x32d   : > { %v3348_v48 = vsel %vm1469_vm7, %v3316_v40, %v5155_v39  ;;  %v3349_v6 = vsel %vm1469_vm7, %v3317_v32, %v5156_v57  ;;  %v3222_v47 = vsel %vm1337_vm3, %v3190_v17, %v5150_v14  ;;  %v3223_v55 = vsel %vm1337_vm3, %v3191_v13, %v5151_v35 }
 0x32e   : > { %v5159_v29 = vpop.permute.xlu0 %5158  ;;  %v5164_v53 = vpop.permute.xlu1 %5163 }
 0x32f   : > { %v5161_v15 = vunpack.i.h.bf16 %v5159_v29  ;;  %v5160_v33 = vunpack.i.l.bf16 %v5159_v29  ;;  %v5166_v18 = vunpack.i.h.bf16 %v5164_v53  ;;  %v5165_v54 = vunpack.i.l.bf16 %v5164_v53 }
 0x331   : > { %v3380_v31 = vsel %vm1502_vm8, %v3348_v48, %v5160_v33  ;;  %v3381_v0 = vsel %vm1502_vm8, %v3349_v6, %v5161_v15  ;;  %v3577_v45 = vpop.f32.mrf.mxu1  ;;  %v3254_v62 = vsel %vm1370_vm4, %v3222_v47, %v5165_v54  ;;  %v3255_v24 = vsel %vm1370_vm4, %v3223_v55, %v5166_v18  ;;  %v8364_v6 = vld [vmem:[#allocation11_spill] sm:$0xff]  ;;  %v8366_v55 = vld [vmem:[#allocation22_spill] sm:$0xff] }
 0x332   : > { %v5169_v38 = vpop.permute.xlu0 %5168  ;;  %v3412_v7 = vpack.c.bf16 %v3381_v0, %v3380_v31  ;;  %v3578_v42 = vadd.f32 %v7751_v22, %v3577_v45  ;;  %v5174_v10 = vpop.permute.xlu1 %5173  ;;  %v3708_v18 = vsel %vm1304_vm2, %v8364_v6, 0.0 }
 0x333   : > { %v5171_v28 = vunpack.i.h.bf16 %v5169_v38  ;;  %v5170_v11 = vunpack.i.l.bf16 %v5169_v38  ;;  %v5176_v36 = vunpack.i.h.bf16 %v5174_v10  ;;  %v5175_v60 = vunpack.i.l.bf16 %v5174_v10  ;;  %v3579_v51 = vpop.f32.mrf.mxu1 }
 0x334   : > { %3688 = vmatmul.mubr.bf16.gmra.mxu1 %v3412_v7  ;;  %v3736_v63 = vadd.f32 %v3704_v44, %v3578_v42  ;;  %v3710_v42 = vsel %vm1304_vm2, %v8366_v55, 0.0 }
 0x335   : > { %v3286_v61 = vsel %vm1403_vm5, %v3254_v62, %v5170_v11  ;;  %v3287_v23 = vsel %vm1403_vm5, %v3255_v24, %v5171_v28  ;;  %3965 = vmatprep.mubr.msk.bf16.mxu1 %vm1304_vm2, %v3415_v5  ;;  %v3580_v52 = vpop.f32.mrf.mxu1  ;;  %v8365_v5 = vld [vmem:[#allocation12_spill] sm:$0xff]  ;;  %v8367_v24 = vld [vmem:[#allocation23_spill] sm:$0xff] }
 0x336   : > { %v5179_v41 = vpop.permute.xlu0 %5178  ;;  %v3768_v27 = vmax.f32 %v3736_v63, 0.0  ;;  %v3581_v49 = vadd.f32 %v7751_v22, %v3580_v52  ;;  %v5184_v59 = vpop.permute.xlu1 %5183  ;;  %v3318_v25 = vsel %vm1436_vm6, %v3286_v61, %v5175_v60  ;;  %v3319_v50 = vsel %vm1436_vm6, %v3287_v23, %v5176_v36 }
 0x337   : > { %v5181_v2 = vunpack.i.h.bf16 %v5179_v41  ;;  %v5180_v12 = vunpack.i.l.bf16 %v5179_v41  ;;  %v5186_v21 = vunpack.i.h.bf16 %v5184_v59  ;;  %v5185_v37 = vunpack.i.l.bf16 %v5184_v59  ;;  %v3582_v26 = vpop.f32.mrf.mxu1 }
 0x338   : > { %3800 = vst [vmem:[%s7776_s26] sm:$0xff] %v3768_v27  ;;  %v3737_v20 = vadd.f32 %v3705_v19, %v3581_v49  ;;  %v3709_v13 = vsel %vm1304_vm2, %v8365_v5, 0.0  ;;  %v3711_v36 = vsel %vm1304_vm2, %v8367_v24, 0.0  ;;  %v3712_v19 = vsel %vm1304_vm2, %v8368_v58, 0.0 }
 0x339   : > { %v3350_v46 = vsel %vm1469_vm7, %v3318_v25, %v5180_v12  ;;  %v3351_v16 = vsel %vm1469_vm7, %v3319_v50, %v5181_v2  ;;  %v8369_v12 = vld [vmem:[#allocation18_spill] sm:$0xff] }
 0x33a   : > { %v3382_v8 = vsel %vm1502_vm8, %v3350_v46, %v5185_v37  ;;  %v3383_v30 = vsel %vm1502_vm8, %v3351_v16, %v5186_v21  ;;  %v3769_v57 = vmax.f32 %v3737_v20, 0.0  ;;  %v3713_v59 = vsel %vm1304_vm2, %v8369_v12, 0.0  ;;  %v8370_v46 = vld [vmem:[#allocation31_spill] sm:$0xff] }
 0x33b   : > { %v3414_v39 = vpack.c.bf16 %v3383_v30, %v3382_v8  ;;  %v3714_v16 = vsel %vm1304_vm2, %v8370_v46, 0.0 }
 0x33c   : > { %3801 = vst [vmem:[%s7776_s26 + $0x8] sm:$0xff] %v3769_v57 }
 0x33d   : > { %3696 = vmatmul.mubr.bf16.gmra.mxu1 %v3414_v39 }
 0x341   : > { %v3585_v1 = vpop.f32.mrf.mxu1 }
 0x342   : > { %v3586_v40 = vadd.f32 %v7751_v22, %v3585_v1  ;;  %v8371_v1 = vld [vmem:[#allocation32_spill] sm:$0xff] }
 0x343   : > { %v3587_v43 = vpop.f32.mrf.mxu1  ;;  %v3715_v9 = vsel %vm1304_vm2, %v8371_v1, 0.0 }
 0x344   : > { %v3738_v14 = vadd.f32 %v3706_v56, %v3586_v40 }
 0x345   : > { %v3588_v29 = vpop.f32.mrf.mxu1 }
 0x346   : > { %v3770_v32 = vmax.f32 %v3738_v14, 0.0  ;;  %v3589_v35 = vadd.f32 %v7751_v22, %v3588_v29 }
 0x347   : > { %v3590_v15 = vpop.f32.mrf.mxu1 }
 0x348   : > { %3802 = vst [vmem:[%s7776_s26 + $0x10] sm:$0xff] %v3770_v32  ;;  %v3739_v33 = vadd.f32 %v3707_v3, %v3589_v35  ;;  %v8372_v3 = vld [vmem:[#allocation25_spill] sm:$0xff] }
 0x349   : > { %v3716_v32 = vsel %vm1304_vm2, %v8372_v3, 0.0 }
 0x34a   : > { %v3771_v53 = vmax.f32 %v3739_v33, 0.0 }
 0x34c   : > { %3803 = vst [vmem:[%s7776_s26 + $0x18] sm:$0xff] %v3771_v53 }
 0x34d   : > { %v3593_v48 = vpop.f32.mrf.mxu1 }
 0x34e   : > { %v3594_v54 = vadd.f32 %v7751_v22, %v3593_v48  ;;  %v8373_v48 = vld [vmem:[#allocation28_spill] sm:$0xff] }
 0x34f   : > { %v3595_v17 = vpop.f32.mrf.mxu1  ;;  %v3717_v6 = vsel %vm1304_vm2, %v8373_v48, 0.0 }
 0x350   : > { %v3740_v31 = vadd.f32 %v3708_v18, %v3594_v54 }
 0x351   : > { %v3596_v0 = vpop.f32.mrf.mxu1 }
 0x352   : > { %v3772_v47 = vmax.f32 %v3740_v31, 0.0  ;;  %v3597_v45 = vadd.f32 %v7751_v22, %v3596_v0 }
 0x353   : > { %v3598_v34 = vpop.f32.mrf.mxu1 }
 0x354   : > { %3804 = vst [vmem:[%s7776_s26 + $0x20] sm:$0xff] %v3772_v47  ;;  %v3741_v44 = vadd.f32 %v3709_v13, %v3597_v45  ;;  %v8374_v13 = vld [vmem:[#allocation41_spill] sm:$0xff] }
 0x355   : > { %v3718_v47 = vsel %vm1304_vm2, %v8374_v13, 0.0 }
 0x356   : > { %v3773_v38 = vmax.f32 %v3741_v44, 0.0 }
 0x358   : > { %3805 = vst [vmem:[%s7776_s26 + $0x28] sm:$0xff] %v3773_v38 }
 0x35d   : > { %v3601_v7 = vpop.f32.mrf.mxu1 }
 0x35e   : > { %v3602_v28 = vadd.f32 %v7751_v22, %v3601_v7  ;;  %v8375_v7 = vld [vmem:[#allocation42_spill] sm:$0xff] }
 0x35f   : > { %v3603_v11 = vpop.f32.mrf.mxu1  ;;  %v3719_v55 = vsel %vm1304_vm2, %v8375_v7, 0.0 }
 0x360   : > { %v3742_v10 = vadd.f32 %v3710_v42, %v3602_v28 }
 0x361   : > { %v3604_v62 = vpop.f32.mrf.mxu1 }
 0x362   : > { %v3774_v60 = vmax.f32 %v3742_v10, 0.0  ;;  %v3605_v51 = vadd.f32 %v7751_v22, %v3604_v62 }
 0x363   : > { %v3606_v63 = vpop.f32.mrf.mxu1 }
 0x364   : > { %3806 = vst [vmem:[%s7776_s26 + $0x30] sm:$0xff] %v3774_v60  ;;  %v3743_v61 = vadd.f32 %v3711_v36, %v3605_v51  ;;  %v8376_v36 = vld [vmem:[#allocation35_spill] sm:$0xff] }
 0x365   : > { %v3720_v60 = vsel %vm1304_vm2, %v8376_v36, 0.0 }
 0x366   : > { %v3775_v23 = vmax.f32 %v3743_v61, 0.0 }
 0x368   : > { %3807 = vst [vmem:[%s7776_s26 + $0x38] sm:$0xff] %v3775_v23 }
 0x369   : > { %v3609_v52 = vpop.f32.mrf.mxu1 }
 0x36a   : > { %v3610_v41 = vadd.f32 %v7751_v22, %v3609_v52  ;;  %v8377_v52 = vld [vmem:[#allocation37_spill] sm:$0xff] }
 0x36b   : > { %v3611_v27 = vpop.f32.mrf.mxu1  ;;  %v3721_v58 = vsel %vm1304_vm2, %v8377_v52, 0.0 }
 0x36c   : > { %v3744_v49 = vadd.f32 %v3712_v19, %v3610_v41 }
 0x36d   : > { %v3612_v2 = vpop.f32.mrf.mxu1 }
 0x36e   : > { %v3776_v25 = vmax.f32 %v3744_v49, 0.0  ;;  %v3613_v50 = vadd.f32 %v7751_v22, %v3612_v2 }
 0x36f   : > { %v3614_v21 = vpop.f32.mrf.mxu1 }
 0x370   : > { %3808 = vst [vmem:[%s7776_s26 + $0x40] sm:$0xff] %v3776_v25  ;;  %v3745_v37 = vadd.f32 %v3713_v59, %v3613_v50  ;;  %v8378_v59 = vld [vmem:[#allocation51_spill] sm:$0xff] }
 0x371   : > { %v3722_v25 = vsel %vm1304_vm2, %v8378_v59, 0.0 }
 0x372   : > { %v3777_v26 = vmax.f32 %v3745_v37, 0.0 }
 0x374   : > { %3809 = vst [vmem:[%s7776_s26 + $0x48] sm:$0xff] %v3777_v26 }
 0x379   : > { %v3617_v20 = vpop.f32.mrf.mxu1 }
 0x37a   : > { %v3618_v8 = vadd.f32 %v7751_v22, %v3617_v20  ;;  %v8379_v20 = vld [vmem:[#allocation52_spill] sm:$0xff] }
 0x37b   : > { %v3619_v30 = vpop.f32.mrf.mxu1  ;;  %v3723_v46 = vsel %vm1304_vm2, %v8379_v20, 0.0 }
 0x37c   : > { %v3746_v57 = vadd.f32 %v3714_v16, %v3618_v8 }
 0x37d   : > { %v3620_v39 = vpop.f32.mrf.mxu1 }
 0x37e   : > { %v3778_v56 = vmax.f32 %v3746_v57, 0.0  ;;  %v3621_v40 = vadd.f32 %v7751_v22, %v3620_v39 }
 0x37f   : > { %v3622_v43 = vpop.f32.mrf.mxu1 }
 0x380   : > { %3810 = vst [vmem:[%s7776_s26 + $0x50] sm:$0xff] %v3778_v56  ;;  %v3747_v14 = vadd.f32 %v3715_v9, %v3621_v40  ;;  %v8380_v9 = vld [vmem:[#allocation45_spill] sm:$0xff] }
 0x381   : > { %v3724_v56 = vsel %vm1304_vm2, %v8380_v9, 0.0 }
 0x382   : > { %v3779_v29 = vmax.f32 %v3747_v14, 0.0 }
 0x384   : > { %3811 = vst [vmem:[%s7776_s26 + $0x58] sm:$0xff] %v3779_v29 }
 0x385   : > { %v3625_v4 = vpop.f32.mrf.mxu1 }
 0x386   : > { %v3626_v35 = vadd.f32 %v7751_v22, %v3625_v4  ;;  %v8381_v4 = vld [vmem:[#allocation48_spill] sm:$0xff] }
 0x387   : > { %v3627_v15 = vpop.f32.mrf.mxu1  ;;  %v3725_v3 = vsel %vm1304_vm2, %v8381_v4, 0.0 }
 0x388   : > { %v3748_v33 = vadd.f32 %v3716_v32, %v3626_v35 }
 0x389   : > { %v3628_v53 = vpop.f32.mrf.mxu1 }
 0x38a   : > { %v3780_v18 = vmax.f32 %v3748_v33, 0.0  ;;  %v3629_v54 = vadd.f32 %v7751_v22, %v3628_v53 }
 0x38b   : > { %v3630_v17 = vpop.f32.mrf.mxu1 }
 0x38c   : > { %3812 = vst [vmem:[%s7776_s26 + $0x60] sm:$0xff] %v3780_v18  ;;  %v3749_v31 = vadd.f32 %v3717_v6, %v3629_v54  ;;  %v8382_v6 = vld [vmem:[#allocation61_spill] sm:$0xff] }
 0x38d   : > { %v3726_v18 = vsel %vm1304_vm2, %v8382_v6, 0.0 }
 0x38e   : > { %v3781_v0 = vmax.f32 %v3749_v31, 0.0 }
 0x390   : > { %3813 = vst [vmem:[%s7776_s26 + $0x68] sm:$0xff] %v3781_v0 }
 0x395   : > { %v3633_v5 = vpop.f32.mrf.mxu1 }
 0x396   : > { %v3634_v45 = vadd.f32 %v7751_v22, %v3633_v5  ;;  %v8383_v5 = vld [vmem:[#allocation62_spill] sm:$0xff] }
 0x397   : > { %v3635_v34 = vpop.f32.mrf.mxu1  ;;  %v3727_v13 = vsel %vm1304_vm2, %v8383_v5, 0.0 }
 0x398   : > { %v3750_v44 = vadd.f32 %v3718_v47, %v3634_v45 }
 0x399   : > { %v3636_v38 = vpop.f32.mrf.mxu1 }
 0x39a   : > { %v3782_v42 = vmax.f32 %v3750_v44, 0.0  ;;  %v3637_v28 = vadd.f32 %v7751_v22, %v3636_v38 }
 0x39b   : > { %v3638_v11 = vpop.f32.mrf.mxu1 }
 0x39c   : > { %3814 = vst [vmem:[%s7776_s26 + $0x70] sm:$0xff] %v3782_v42  ;;  %v3751_v10 = vadd.f32 %v3719_v55, %v3637_v28  ;;  %v8384_v55 = vld [vmem:[#allocation55_spill] sm:$0xff] }
 0x39d   : > { %v3728_v42 = vsel %vm1304_vm2, %v8384_v55, 0.0 }
 0x39e   : > { %v3783_v62 = vmax.f32 %v3751_v10, 0.0 }
 0x3a0   : > { %3815 = vst [vmem:[%s7776_s26 + $0x78] sm:$0xff] %v3783_v62 }
 0x3a1   : > { %v3641_v24 = vpop.f32.mrf.mxu1 }
 0x3a2   : > { %v3642_v51 = vadd.f32 %v7751_v22, %v3641_v24  ;;  %v8385_v24 = vld [vmem:[#allocation57_spill] sm:$0xff] }
 0x3a3   : > { %v3643_v63 = vpop.f32.mrf.mxu1  ;;  %v3729_v36 = vsel %vm1304_vm2, %v8385_v24, 0.0 }
 0x3a4   : > { %v3752_v61 = vadd.f32 %v3720_v60, %v3642_v51 }
 0x3a5   : > { %v3644_v23 = vpop.f32.mrf.mxu1 }
 0x3a6   : > { %v3784_v19 = vmax.f32 %v3752_v61, 0.0  ;;  %v3645_v41 = vadd.f32 %v7751_v22, %v3644_v23 }
 0x3a7   : > { %v3646_v27 = vpop.f32.mrf.mxu1 }
 0x3a8   : > { %3816 = vst [vmem:[%s7776_s26 + $0x80] sm:$0xff] %v3784_v19  ;;  %v3753_v49 = vadd.f32 %v3721_v58, %v3645_v41  ;;  %v8386_v58 = vld [vmem:[#allocation67_spill] sm:$0xff] }
 0x3a9   : > { %v3730_v19 = vsel %vm1304_vm2, %v8386_v58, 0.0 }
 0x3aa   : > { %v3785_v2 = vmax.f32 %v3753_v49, 0.0 }
 0x3ac   : > { %3817 = vst [vmem:[%s7776_s26 + $0x88] sm:$0xff] %v3785_v2 }
 0x3b1   : > { %v3649_v12 = vpop.f32.mrf.mxu1 }
 0x3b2   : > { %v3650_v50 = vadd.f32 %v7751_v22, %v3649_v12  ;;  %v8387_v12 = vld [vmem:[#allocation68_spill] sm:$0xff] }
 0x3b3   : > { %v3651_v21 = vpop.f32.mrf.mxu1  ;;  %v3731_v59 = vsel %vm1304_vm2, %v8387_v12, 0.0 }
 0x3b4   : > { %v3754_v37 = vadd.f32 %v3722_v25, %v3650_v50 }
 0x3b5   : > { %v3652_v26 = vpop.f32.mrf.mxu1 }
 0x3b6   : > { %v3786_v16 = vmax.f32 %v3754_v37, 0.0  ;;  %v3653_v8 = vadd.f32 %v7751_v22, %v3652_v26 }
 0x3b7   : > { %v3654_v30 = vpop.f32.mrf.mxu1 }
 0x3b8   : > { %3818 = vst [vmem:[%s7776_s26 + $0x90] sm:$0xff] %v3786_v16  ;;  %v3755_v57 = vadd.f32 %v3723_v46, %v3653_v8  ;;  %v8388_v46 = vld [vmem:[#allocation65_spill] sm:$0xff] }
 0x3b9   : > { %v3732_v16 = vsel %vm1304_vm2, %v8388_v46, 0.0 }
 0x3ba   : > { %v3787_v39 = vmax.f32 %v3755_v57, 0.0 }
 0x3bc   : > { %3819 = vst [vmem:[%s7776_s26 + $0x98] sm:$0xff] %v3787_v39 }
 0x3bd   : > { %v3657_v1 = vpop.f32.mrf.mxu1 }
 0x3be   : > { %v3658_v40 = vadd.f32 %v7751_v22, %v3657_v1  ;;  %v8389_v1 = vld [vmem:[#allocation66_spill] sm:$0xff] }
 0x3bf   : > { %v3659_v43 = vpop.f32.mrf.mxu1  ;;  %v3733_v9 = vsel %vm1304_vm2, %v8389_v1, 0.0 }
 0x3c0   : > { %v3756_v14 = vadd.f32 %v3724_v56, %v3658_v40 }
 0x3c1   : > { %v3660_v29 = vpop.f32.mrf.mxu1 }
 0x3c2   : > { %v3788_v32 = vmax.f32 %v3756_v14, 0.0  ;;  %v3661_v35 = vadd.f32 %v7751_v22, %v3660_v29 }
 0x3c3   : > { %v3662_v15 = vpop.f32.mrf.mxu1 }
 0x3c4   : > { %3820 = vst [vmem:[%s7776_s26 + $0xa0] sm:$0xff] %v3788_v32  ;;  %v3757_v33 = vadd.f32 %v3725_v3, %v3661_v35  ;;  %v8390_v3 = vld [vmem:[#allocation94_spill] sm:$0xff] }
 0x3c5   : > { %v3734_v32 = vsel %vm1304_vm2, %v8390_v3, 0.0 }
 0x3c6   : > { %v3789_v53 = vmax.f32 %v3757_v33, 0.0 }
 0x3c8   : > { %3821 = vst [vmem:[%s7776_s26 + $0xa8] sm:$0xff] %v3789_v53 }
 0x3cd   : > { %v3665_v48 = vpop.f32.mrf.mxu1 }
 0x3ce   : > { %v3666_v54 = vadd.f32 %v7751_v22, %v3665_v48  ;;  %v8391_v48 = vld [vmem:[#allocation107_spill] sm:$0xff] }
 0x3cf   : > { %v3667_v17 = vpop.f32.mrf.mxu1  ;;  %v3735_v6 = vsel %vm1304_vm2, %v8391_v48, 0.0 }
 0x3d0   : > { %v3758_v31 = vadd.f32 %v3726_v18, %v3666_v54 }
 0x3d1   : > { %v3668_v0 = vpop.f32.mrf.mxu1 }
 0x3d2   : > { %v3790_v47 = vmax.f32 %v3758_v31, 0.0  ;;  %v3669_v45 = vadd.f32 %v7751_v22, %v3668_v0 }
 0x3d3   : > { %v3670_v34 = vpop.f32.mrf.mxu1 }
 0x3d4   : > { %3822 = vst [vmem:[%s7776_s26 + $0xb0] sm:$0xff] %v3790_v47  ;;  %v3759_v44 = vadd.f32 %v3727_v13, %v3669_v45 }
 0x3d6   : > { %v3791_v38 = vmax.f32 %v3759_v44, 0.0 }
 0x3d8   : > { %3823 = vst [vmem:[%s7776_s26 + $0xb8] sm:$0xff] %v3791_v38 }
 0x3d9   : > { %v3673_v7 = vpop.f32.mrf.mxu1 }
 0x3da   : > { %v3674_v28 = vadd.f32 %v7751_v22, %v3673_v7 }
 0x3db   : > { %v3675_v11 = vpop.f32.mrf.mxu1 }
 0x3dc   : > { %v3760_v10 = vadd.f32 %v3728_v42, %v3674_v28 }
 0x3dd   : > { %v3676_v62 = vpop.f32.mrf.mxu1 }
 0x3de   : > { %v3792_v60 = vmax.f32 %v3760_v10, 0.0  ;;  %v3677_v51 = vadd.f32 %v7751_v22, %v3676_v62 }
 0x3df   : > { %v3678_v63 = vpop.f32.mrf.mxu1 }
 0x3e0   : > { %3824 = vst [vmem:[%s7776_s26 + $0xc0] sm:$0xff] %v3792_v60  ;;  %v3761_v61 = vadd.f32 %v3729_v36, %v3677_v51 }
 0x3e2   : > { %v3793_v23 = vmax.f32 %v3761_v61, 0.0 }
 0x3e4   : > { %3825 = vst [vmem:[%s7776_s26 + $0xc8] sm:$0xff] %v3793_v23 }
 0x3e5   : > { %v3681_v52 = vpop.f32.mrf.mxu1 }
 0x3e6   : > { %v3682_v41 = vadd.f32 %v7751_v22, %v3681_v52 }
 0x3e7   : > { %v3683_v27 = vpop.f32.mrf.mxu1 }
 0x3e8   : > { %v3762_v49 = vadd.f32 %v3730_v19, %v3682_v41 }
 0x3e9   : > { %v3684_v2 = vpop.f32.mrf.mxu1 }
 0x3ea   : > { %v3794_v25 = vmax.f32 %v3762_v49, 0.0  ;;  %v3685_v50 = vadd.f32 %v7751_v22, %v3684_v2 }
 0x3eb   : > { %v3686_v21 = vpop.f32.mrf.mxu1 }
 0x3ec   : > { %3826 = vst [vmem:[%s7776_s26 + $0xd0] sm:$0xff] %v3794_v25  ;;  %v3763_v37 = vadd.f32 %v3731_v59, %v3685_v50 }
 0x3ee   : > { %v3795_v26 = vmax.f32 %v3763_v37, 0.0 }
 0x3f0   : > { %3827 = vst [vmem:[%s7776_s26 + $0xd8] sm:$0xff] %v3795_v26 }
 0x3f4   : > { %v3689_v20 = vpop.f32.mrf.mxu1 }
 0x3f5   : > { %v3690_v8 = vadd.f32 %v7751_v22, %v3689_v20 }
 0x3f6   : > { %v3691_v30 = vpop.f32.mrf.mxu1 }
 0x3f7   : > { %v3764_v57 = vadd.f32 %v3732_v16, %v3690_v8 }
 0x3f8   : > { %v3692_v39 = vpop.f32.mrf.mxu1 }
 0x3f9   : > { %v3796_v56 = vmax.f32 %v3764_v57, 0.0  ;;  %v3693_v40 = vadd.f32 %v7751_v22, %v3692_v39 }
 0x3fa   : > { %v3694_v43 = vpop.f32.mrf.mxu1 }
 0x3fb   : > { %3828 = vst [vmem:[%s7776_s26 + $0xe0] sm:$0xff] %v3796_v56  ;;  %v3765_v14 = vadd.f32 %v3733_v9, %v3693_v40 }
 0x3fd   : > { %v3797_v29 = vmax.f32 %v3765_v14, 0.0  ;;  %v3697_v4 = vpop.f32.mrf.mxu1 }
 0x3fe   : > { %v3698_v35 = vadd.f32 %v7751_v22, %v3697_v4 }
 0x3ff   : > { %3829 = vst [vmem:[%s7776_s26 + $0xe8] sm:$0xff] %v3797_v29  ;;  %v3699_v15 = vpop.f32.mrf.mxu1 }
 0x400   : > { %v3766_v33 = vadd.f32 %v3734_v32, %v3698_v35 }
 0x401   : > { %v3700_v53 = vpop.f32.mrf.mxu1 }
 0x402   : > { %v3798_v18 = vmax.f32 %v3766_v33, 0.0  ;;  %v3701_v54 = vadd.f32 %v7751_v22, %v3700_v53 }
 0x403   : > { %v3702_v17 = vpop.f32.mrf.mxu1 }
 0x404   : > { %3830 = vst [vmem:[%s7776_s26 + $0xf0] sm:$0xff] %v3798_v18  ;;  %v3767_v31 = vadd.f32 %v3735_v6, %v3701_v54 }
 0x406   : > { %v3799_v0 = vmax.f32 %v3767_v31, 0.0 }
 0x408   : > { %3831 = vst [vmem:[%s7776_s26 + $0xf8] sm:$0xff] %v3799_v0 }
 0x409   : > { %5218 = shalt.err (!%p5215_p3)
}
 0x40a   : > { %s5219_s9 = scalar_lea.hbm %s7908_s15, 4096  ;;  %s5223_s11 = scalar_lea.hbm %s7960_s5, 8192 }
 0x40b   : > { %p5220_p4 = scmp.ne.s32.totalorder %s7908_s15, %s5219_s9  ;;  %p5224_p9 = scmp.lt.s32.totalorder %s7908_s15, %s7960_s5 }
 0x40c   : > { %p5225_p10 = scmp.lt.s32.totalorder %s5223_s11, %s5219_s9 }
 0x40d   : > { %p5221_p7 = pnand %p5220_p4, %p5347_p5 }
 0x40e   : > { %p5226_p11 = por %p5225_p10, %p5224_p9 }
 0x40f   : > { %p5222_p8 = pneg %p5221_p7 }
 0x411   : > { %p5227_p12 = pnand %p5226_p11, %p5222_p8 }
 0x413   : > { %5230 = shalt.err (!%p5227_p12)
}
 0x414   : > { %s5277_s26 = smov 128   ;;  %s5278_s30 = smov 8  }
 0x415   : > { %4017 = dma.vmem_to_hbm [thread:$0]  (%p5347_p5), %s7910_s6, 4096, %s7908_s15, %s7915_s16, %s5277_s26, %s5277_s26, %s5278_s30  }
 0x416 PF: > { %p4023_p13 = scmp.ge.s32.totalorder %s5265_s21, 2  ;;  %s3861_s13 = sand.u32 1, %s5253_s18  }
 0x417   : > { %s3862_s14 = scalar_lea.sflag [#allocation4], %s3861_s13 }
 0x418   : > { %p4020_p0 = pnand %p4023_p13, %p5351_p6 }
 0x41a   : > { %p4021_p1 = pneg %p4020_p0 }
 0x41c   : > { %5248 = dma.done.wait (%p4021_p1), %s3862_s14, 4096  }
 0x41d   : > { %5250 = vsyncadd (%p4021_p1), %s3862_s14, 4294963200  ;;  %p15_p2 = scmp.ge.s32.totalorder %s5334_s24, 4   ;;  %s8392_s18 = smov %s5257_s19 }
 0x41e   : > { %s8393_s19 = smov %s5261_s20  ;;  %s8394_s20 = smov %s5345_s27 }
 0x41f   : > { %s8395_s21 = smov %s5334_s24  ;;  %17 = sbr.rel (!%p15_p2) target bundleno = 3 (0x3), region = 77 }
 0x424   :  { %3867 = vsyncpa [#allocation4], 1 }
 0x425   :  { %3869 = vsyncpa [#allocation4 + $0x1], 1 }

</bundles_post_ra>
